<compile_context>
chip_gen: v7x
topology: tpu7x:2x2x1
jax: 0.10.0
libtpu: 0.0.40
codegen_flags: <defaults>
</compile_context>

<pallas_src>
import functools

import jax
import jax.numpy as jnp
from jax.experimental import pallas as pl
from jax.experimental.pallas import tpu as pltpu

VMEM = pltpu.MemorySpace.VMEM


# ==========================================================================
# Fused IAN2m forward kernel (single invocation, no grid)
# ==========================================================================
def _ian2m_kernel(txt_x_ref, img_x_ref, aux_ref, w_in_ref, whh_ref, w_tail_ref,
                  out_ref, *, B, H, Lc, La, Li, Lmax):
    H2, H4, H8, H16, H24 = 2 * H, 4 * H, 8 * H, 16 * H, 24 * H
    E = txt_x_ref.shape[1]
    Eimg = img_x_ref.shape[1]
    R = w_in_ref.shape[0] - 1            # bias row index in the input-weight slab
    P = w_tail_ref.shape[1] - 6 * H

    # ---- hoisted input projections (+ folded biases), one matmul per slab ----
    txt_xw = jnp.dot(txt_x_ref[...], w_in_ref[0:E, 0:H8],
                     preferred_element_type=jnp.float32) + w_in_ref[R:R + 1, 0:H8]
    img_pj = jnp.dot(img_x_ref[...], w_in_ref[0:Eimg, H8:H24],
                     preferred_element_type=jnp.float32) + w_in_ref[R:R + 1, H8:H24]
    ctx_xw = txt_xw[0:Lc * B, 0:H4]                    # [Lc*B, 4H]
    asp_xw = txt_xw[Lc * B:(Lc + La) * B, H4:H8]       # [La*B, 4H]
    img_xf = img_pj[:, 0:H8]                           # forward dir, gate-major wide
    img_xb = img_pj[:, H8:H16]                         # backward dir, gate-major wide

    # bf16 recurrent weights (single-pass MXU on the serial chain)
    ctx_whh = whh_ref[0:H, 0:H4]
    asp_whh = whh_ref[0:H, H4:H8]
    img_whh = whh_ref[0:H2, H8:H16]                    # block-diag fused [2H, 8H]

    # aux slab row offsets (all static Python ints)
    ctx_m0 = 0
    asp_m0 = Lc * B
    img_m0 = (Lc + La) * B
    inv0 = (Lc + La + Li) * B
    sel0 = inv0 + 3 * B
    selT0 = sel0 + Lmax * B

    def chain(L, W, whh_w, xw_at, m_at, collect):
        """Masked LSTM recurrence, fully unrolled (pack_padded semantics)."""
        h = jnp.zeros((B, W), jnp.float32)
        c = jnp.zeros((B, W), jnp.float32)
        acc = jnp.zeros((B, W), jnp.float32)
        outs = []
        for t in range(L):
            gates = xw_at(t) + jnp.dot(h.astype(jnp.bfloat16), whh_w,
                                       preferred_element_type=jnp.float32)
            i = jax.nn.sigmoid(gates[:, 0 * W:1 * W])
            f = jax.nn.sigmoid(gates[:, 1 * W:2 * W])
            g = jnp.tanh(gates[:, 2 * W:3 * W])
            o = jax.nn.sigmoid(gates[:, 3 * W:4 * W])
            c_new = f * c + i * g
            h_new = o * jnp.tanh(c_new)
            m = m_at(t)                                # lane-wide validity mask
            c = c + m * (c_new - c)                    # freeze carry past length
            h = h + m * (h_new - h)
            h_out = m * h_new                          # zero outputs past length
            acc = acc + h_out
            if collect:
                outs.append(h_out)
        return acc, outs

    ctx_acc, ctx_hs = chain(
        Lc, H, ctx_whh,
        lambda t: ctx_xw[t * B:(t + 1) * B, :],
        lambda t: aux_ref[ctx_m0 + t * B:ctx_m0 + (t + 1) * B, 0:H],
        collect=True)
    asp_acc, asp_hs = chain(
        La, H, asp_whh,
        lambda t: asp_xw[t * B:(t + 1) * B, :],
        lambda t: aux_ref[asp_m0 + t * B:asp_m0 + (t + 1) * B, 0:H],
        collect=True)
    # Both image directions run as ONE fused [B, 2H] chain; the backward half
    # consumes the forward-order projection at index Li-1-t (masked tail keeps
    # its carry at zero, which is exactly the reversed-valid-prefix recurrence).
    img_acc, _ = chain(
        Li, H2, img_whh,
        lambda t: (img_xf[t * B:(t + 1) * B, :]
                   + img_xb[(Li - 1 - t) * B:(Li - t) * B, :]),
        lambda t: aux_ref[img_m0 + t * B:img_m0 + (t + 1) * B, :],
        collect=False)

    # Length-normalized mean pools (reciprocal lengths precomputed; no divides).
    ctx_pool = ctx_acc * aux_ref[inv0 + 0 * B:inv0 + 1 * B, 0:H]
    asp_pool = asp_acc * aux_ref[inv0 + 1 * B:inv0 + 2 * B, 0:H]
    et_img = img_acc * aux_ref[inv0 + 2 * B:inv0 + 3 * B, :]        # [B, 2H]

    ctx_hseq = jnp.concatenate(ctx_hs, axis=0)         # [Lc*B, H]  (values only)
    asp_hseq = jnp.concatenate(asp_hs, axis=0)         # [La*B, H]

    def attention(hseq, q_pool, L, wb):
        """ABSA bi-linear attention, kept 2-D / lane-aligned (no [L,B,H] relayout)."""
        LB = L * B
        wk = w_tail_ref[0:H, wb:wb + H]
        bk = w_tail_ref[H4:H4 + 1, wb:wb + H]
        wqbl = w_tail_ref[0:H, wb + H:wb + 2 * H]       # wq @ wbl (pre-folded)
        bqbl = w_tail_ref[H4:H4 + 1, wb + H:wb + 2 * H]
        wp = w_tail_ref[0:H, wb + 2 * H:wb + 3 * H]
        bp = w_tail_ref[H4:H4 + 1, wb + 2 * H:wb + 3 * H]
        sel = aux_ref[sel0:sel0 + LB, 0:B]              # [LB, B] one-hot row->batch
        selT = aux_ref[selT0:selT0 + B, 0:LB]           # [B, LB]
        kx = jnp.dot(hseq, wk, preferred_element_type=jnp.float32) + bk        # [LB, H]
        qw = jnp.dot(q_pool, wqbl, preferred_element_type=jnp.float32) + bqbl  # [B, H]
        qr = jnp.dot(sel, qw, preferred_element_type=jnp.float32)              # [LB, H]
        score = jnp.sum(kx * qr, axis=-1, keepdims=True)                       # [LB, 1]
        # per-batch max (softmax stabilizer) via the selector, still fully 2-D
        masked = score * sel + (sel - 1.0) * jnp.float32(1e30)                 # [LB, B]
        colmax = jnp.max(masked, axis=0, keepdims=True)                        # [1, B]
        mx_rows = jnp.sum(sel * colmax, axis=1, keepdims=True)                 # [LB, 1]
        e = jnp.exp(score - mx_rows)
        num = jnp.dot(selT, e * kx, preferred_element_type=jnp.float32)        # [B, H]
        den = jnp.dot(selT, e, preferred_element_type=jnp.float32)             # [B, 1]
        ctx_vec = num / den
        return jnp.dot(ctx_vec, wp, preferred_element_type=jnp.float32) + bp   # [B, H]

    aspect_final = attention(asp_hseq, ctx_pool, La, 0)
    context_final = attention(ctx_hseq, asp_pool, Lc, 3 * H)

    fc_w = w_tail_ref[0:H4, 6 * H:6 * H + P]
    fc_b = w_tail_ref[H4:H4 + 1, 6 * H:6 * H + P]
    x = jnp.concatenate([aspect_final, context_final, et_img], axis=-1)  # [B, 4H]
    out_ref[...] = jnp.dot(x, fc_w, preferred_element_type=jnp.float32) + fc_b


# ==========================================================================
# Wrapper: embedding gather + slab assembly in XLA glue, everything else in
# the single fused kernel (6 inputs, 1 output, no scratch, no grid).
# ==========================================================================
def ian2m_forward(packed, text_raw_indices, aspect_indices, imgs, num_imgs):
    emb = packed['embedding']
    B, Lc = text_raw_indices.shape
    La = aspect_indices.shape[1]
    Li = imgs.shape[1]
    E = emb.shape[1]
    Eimg = imgs.shape[2]
    H = packed['whh'].shape[0] // 2
    P = packed['w_tail'].shape[1] - 6 * H
    Lmax = max(Lc, La)
    assert Lmax * B <= 2 * H and B <= 2 * H, "selector blocks must fit aux slab width"

    text_len = jnp.sum(text_raw_indices != 0, axis=-1).astype(jnp.float32)
    aspect_len = jnp.sum(aspect_indices != 0, axis=-1).astype(jnp.float32)
    img_len = num_imgs.astype(jnp.float32)

    # Embeddings gathered directly in time-major order, flattened to 2-D.
    ctx_x = emb[text_raw_indices.T].reshape(Lc * B, E)
    asp_x = emb[aspect_indices.T].reshape(La * B, E)
    txt_x = jnp.concatenate([ctx_x, asp_x], axis=0)                  # [(Lc+La)*B, E]
    img_x = jnp.transpose(imgs, (1, 0, 2)).reshape(Li * B, Eimg)     # forward order only

    def step_mask(lens, L):      # [L*B, 1], rows t*B+b, 1.0 where t < len
        t = jnp.arange(L, dtype=jnp.float32)[:, None]
        return (t < lens[None, :]).astype(jnp.float32).reshape(L * B, 1)

    ones_h = jnp.ones((1, H), jnp.float32)
    ones_2h = jnp.ones((1, 2 * H), jnp.float32)
    ctx_m = step_mask(text_len, Lc) * ones_2h
    asp_m = step_mask(aspect_len, La) * ones_2h
    img_mf = step_mask(img_len, Li)
    img_mb = img_mf.reshape(Li, B, 1)[::-1].reshape(Li * B, 1)       # mask at Li-1-t
    img_m = jnp.concatenate([img_mf * ones_h, img_mb * ones_h], axis=1)
    # No zero-length guard: matches torch.div semantics of the reference.
    inv_rows = jnp.concatenate([(1.0 / text_len)[:, None] * ones_2h,
                                (1.0 / aspect_len)[:, None] * ones_2h,
                                (1.0 / img_len)[:, None] * ones_2h], axis=0)
    sel = jnp.tile(jnp.eye(B, dtype=jnp.float32), (Lmax, 1))         # [Lmax*B, B]
    sel_rows = jnp.zeros((Lmax * B, 2 * H), jnp.float32).at[:, :B].set(sel)
    selT_rows = jnp.zeros((B, 2 * H), jnp.float32).at[:, :Lmax * B].set(sel.T)
    aux = jnp.concatenate([ctx_m, asp_m, img_m, inv_rows, sel_rows, selT_rows], axis=0)

    kernel = functools.partial(_ian2m_kernel, B=B, H=H, Lc=Lc, La=La, Li=Li, Lmax=Lmax)
    args = (txt_x, img_x, aux, packed['w_in'], packed['whh'], packed['w_tail'])
    return pl.pallas_call(
        kernel,
        out_shape=jax.ShapeDtypeStruct((B, P), jnp.float32),
        in_specs=[pl.BlockSpec(memory_space=VMEM) for _ in args],
        out_specs=pl.BlockSpec(memory_space=VMEM),
    )(*args)


# ==========================================================================
# Parameters: per-module init (consumed orientation, x @ W) + one-time packing
# into the kernel slabs.  Packing runs once, outside the forward path.
# ==========================================================================
def init_params(key, vocab, E, Eimg, H, P):
    it = iter(jax.random.split(key, 64))

    def nrm(shape, scale=0.1):
        return (scale * jax.random.normal(next(it), shape)).astype(jnp.float32)

    def lstm_p(in_dim):
        # w_ih: [in, 4H], w_hh: [H, 4H], b = (b_ih + b_hh) folded, as [1, 4H].
        return dict(w_ih=nrm((in_dim, 4 * H)), w_hh=nrm((H, 4 * H)), b=nrm((1, 4 * H)))

    def attn_p():
        return dict(wk=nrm((H, H)), bk=nrm((1, H)),
                    wq=nrm((H, H)), bq=nrm((1, H)),
                    wbl=nrm((H, H)),
                    wp=nrm((H, H)), bp=nrm((1, H)))

    embedding = nrm((vocab, E), 0.5).at[0].set(0.0)    # padding row 0 = zeros
    return dict(embedding=embedding,
                lstm_ctx=lstm_p(E), lstm_asp=lstm_p(E),
                lstm_img_f=lstm_p(Eimg), lstm_img_b=lstm_p(Eimg),
                attn_aspect=attn_p(), attn_context=attn_p(),
                fc=dict(w=nrm((4 * H, P)), b=nrm((1, P))))


def pack_params(p, H):
    f32 = jnp.float32
    E = p['lstm_ctx']['w_ih'].shape[0]
    Eimg = p['lstm_img_f']['w_ih'].shape[0]
    P = p['fc']['w'].shape[1]
    R = max(E, Eimg)

    def widen(w, d):
        """[*, 4H] -> [*, 8H]: gate-major placement for the fused img pair."""
        out = jnp.zeros((w.shape[0], 8 * H), f32)
        for k in range(4):
            out = out.at[:, k * 2 * H + d * H:k * 2 * H + (d + 1) * H].set(
                w[:, k * H:(k + 1) * H])
        return out

    # input weights (+ one bias row) for all four LSTMs:  [R+1, 24H]
    w_in = jnp.zeros((R + 1, 24 * H), f32)
    w_in = w_in.at[:E, 0:4 * H].set(p['lstm_ctx']['w_ih'])
    w_in = w_in.at[:E, 4 * H:8 * H].set(p['lstm_asp']['w_ih'])
    w_in = w_in.at[:Eimg, 8 * H:16 * H].set(widen(p['lstm_img_f']['w_ih'], 0))
    w_in = w_in.at[:Eimg, 16 * H:24 * H].set(widen(p['lstm_img_b']['w_ih'], 1))
    w_in = w_in.at[R, 0:4 * H].set(p['lstm_ctx']['b'][0])
    w_in = w_in.at[R, 4 * H:8 * H].set(p['lstm_asp']['b'][0])
    w_in = w_in.at[R, 8 * H:16 * H].set(widen(p['lstm_img_f']['b'], 0)[0])
    w_in = w_in.at[R, 16 * H:24 * H].set(widen(p['lstm_img_b']['b'], 1)[0])

    # recurrent weights, bf16, img pair block-diagonal:  [2H, 16H]
    whh = jnp.zeros((2 * H, 16 * H), f32)
    whh = whh.at[:H, 0:4 * H].set(p['lstm_ctx']['w_hh'])
    whh = whh.at[:H, 4 * H:8 * H].set(p['lstm_asp']['w_hh'])
    whh = whh.at[:H, 8 * H:16 * H].set(widen(p['lstm_img_f']['w_hh'], 0))
    whh = whh.at[H:2 * H, 8 * H:16 * H].set(widen(p['lstm_img_b']['w_hh'], 1))
    whh = whh.astype(jnp.bfloat16)

    # attentions (wq @ wbl pre-folded) + fc:  [4H+1, 6H+P], bias in the last row
    w_tail = jnp.zeros((4 * H + 1, 6 * H + P), f32)

    def put_attn(slab, a, base):
        wqbl = jnp.dot(a['wq'], a['wbl'])
        bqbl = jnp.dot(a['bq'], a['wbl'])
        slab = slab.at[:H, base:base + H].set(a['wk'])
        slab = slab.at[4 * H, base:base + H].set(a['bk'][0])
        slab = slab.at[:H, base + H:base + 2 * H].set(wqbl)
        slab = slab.at[4 * H, base + H:base + 2 * H].set(bqbl[0])
        slab = slab.at[:H, base + 2 * H:base + 3 * H].set(a['wp'])
        slab = slab.at[4 * H, base + 2 * H:base + 3 * H].set(a['bp'][0])
        return slab

    w_tail = put_attn(w_tail, p['attn_aspect'], 0)
    w_tail = put_attn(w_tail, p['attn_context'], 3 * H)
    w_tail = w_tail.at[:4 * H, 6 * H:].set(p['fc']['w'])
    w_tail = w_tail.at[4 * H, 6 * H:].set(p['fc']['b'][0])

    return dict(embedding=p['embedding'], w_in=w_in, whh=whh, w_tail=w_tail)


if __name__ == "__main__":
    B, Lc, La, Li = 2, 16, 8, 4
    vocab, E, Eimg, H, P = 50, 32, 32, 32, 3

    root = jax.random.PRNGKey(0)
    kp, kt, ka, kim = jax.random.split(root, 4)

    params = init_params(kp, vocab, E, Eimg, H, P)
    packed = pack_params(params, H)

    text_lens = jnp.array([16, 11], dtype=jnp.int32)
    asp_lens = jnp.array([8, 5], dtype=jnp.int32)
    num_imgs = jnp.array([4, 3], dtype=jnp.int32)

    pos_c = jnp.arange(Lc)[None, :]
    text_raw_indices = jnp.where(pos_c < text_lens[:, None],
                                 jax.random.randint(kt, (B, Lc), 1, vocab), 0).astype(jnp.int32)
    pos_a = jnp.arange(La)[None, :]
    aspect_indices = jnp.where(pos_a < asp_lens[:, None],
                               jax.random.randint(ka, (B, La), 1, vocab), 0).astype(jnp.int32)
    imgs = jax.random.normal(kim, (B, Li, Eimg), dtype=jnp.float32)

    fwd = jax.jit(ian2m_forward)
    out = fwd(packed, text_raw_indices, aspect_indices, imgs, num_imgs)
    jax.block_until_ready(out)
    assert out.shape == (B, P) and out.dtype == jnp.float32
    print("KERNEL_OK")
</pallas_src>

<mosaic_0001>
module attributes {stable_mosaic.version = 11 : i64} {
  func.func @_ian2m_kernel(%arg0: memref<48x32xf32, #tpu.memory_space<vmem>>, %arg1: memref<8x32xf32, #tpu.memory_space<vmem>>, %arg2: memref<96x64xf32, #tpu.memory_space<vmem>>, %arg3: memref<33x768xf32, #tpu.memory_space<vmem>>, %arg4: memref<64x512xbf16, #tpu.memory_space<vmem>>, %arg5: memref<129x195xf32, #tpu.memory_space<vmem>>, %arg6: memref<2x3xf32, #tpu.memory_space<vmem>>) attributes {dimension_semantics = [], scalar_prefetch = 0 : i64, scratch_operands = 0 : i64, tpu.core_type = #tpu.core_type<tc>} {
    %c0 = arith.constant 0 : index
    %c0_0 = arith.constant 0 : index
    %0 = vector.load %arg0[%c0, %c0_0] : memref<48x32xf32, #tpu.memory_space<vmem>>, vector<48x32xf32>
    %c0_1 = arith.constant 0 : index
    %c0_2 = arith.constant 0 : index
    %1 = vector.load %arg3[%c0_1, %c0_2] : memref<33x768xf32, #tpu.memory_space<vmem>>, vector<32x256xf32>
    %cst = arith.constant dense<0.000000e+00> : vector<48x256xf32>
    %2 = tpu.matmul %0, %1, %cst {dimension_numbers = #tpu.dot_dimension_numbers<[1], [0], [0], [1], [0, 0, 1, 1], [], []>} : vector<48x32xf32>, vector<32x256xf32>, vector<48x256xf32> -> vector<48x256xf32>
    %c32 = arith.constant 32 : index
    %c0_3 = arith.constant 0 : index
    %3 = vector.load %arg3[%c32, %c0_3] : memref<33x768xf32, #tpu.memory_space<vmem>>, vector<1x256xf32>
    %4 = vector.broadcast %3 : vector<1x256xf32> to vector<48x256xf32>
    %5 = arith.addf %2, %4 : vector<48x256xf32>
    %c0_4 = arith.constant 0 : index
    %c0_5 = arith.constant 0 : index
    %6 = vector.load %arg1[%c0_4, %c0_5] : memref<8x32xf32, #tpu.memory_space<vmem>>, vector<8x32xf32>
    %c0_6 = arith.constant 0 : index
    %c256 = arith.constant 256 : index
    %7 = vector.load %arg3[%c0_6, %c256] : memref<33x768xf32, #tpu.memory_space<vmem>>, vector<32x512xf32>
    %cst_7 = arith.constant dense<0.000000e+00> : vector<8x512xf32>
    %8 = tpu.matmul %6, %7, %cst_7 {dimension_numbers = #tpu.dot_dimension_numbers<[1], [0], [0], [1], [0, 0, 1, 1], [], []>} : vector<8x32xf32>, vector<32x512xf32>, vector<8x512xf32> -> vector<8x512xf32>
    %c32_8 = arith.constant 32 : index
    %c256_9 = arith.constant 256 : index
    %9 = vector.load %arg3[%c32_8, %c256_9] : memref<33x768xf32, #tpu.memory_space<vmem>>, vector<1x512xf32>
    %10 = vector.broadcast %9 : vector<1x512xf32> to vector<8x512xf32>
    %11 = arith.addf %8, %10 : vector<8x512xf32>
    %12 = vector.extract_strided_slice %5 {offsets = [0, 0], sizes = [32, 128], strides = [1, 1]} : vector<48x256xf32> to vector<32x128xf32>
    %13 = vector.extract_strided_slice %5 {offsets = [32, 128], sizes = [16, 128], strides = [1, 1]} : vector<48x256xf32> to vector<16x128xf32>
    %14 = vector.extract_strided_slice %11 {offsets = [0, 0], sizes = [8, 256], strides = [1, 1]} : vector<8x512xf32> to vector<8x256xf32>
    %15 = vector.extract_strided_slice %11 {offsets = [0, 256], sizes = [8, 256], strides = [1, 1]} : vector<8x512xf32> to vector<8x256xf32>
    %c0_10 = arith.constant 0 : index
    %c0_11 = arith.constant 0 : index
    %16 = vector.load %arg4[%c0_10, %c0_11] : memref<64x512xbf16, #tpu.memory_space<vmem>>, vector<32x128xbf16>
    %c0_12 = arith.constant 0 : index
    %c128 = arith.constant 128 : index
    %17 = vector.load %arg4[%c0_12, %c128] : memref<64x512xbf16, #tpu.memory_space<vmem>>, vector<32x128xbf16>
    %c0_13 = arith.constant 0 : index
    %c256_14 = arith.constant 256 : index
    %18 = vector.load %arg4[%c0_13, %c256_14] : memref<64x512xbf16, #tpu.memory_space<vmem>>, vector<64x256xbf16>
    %cst_15 = arith.constant 0.000000e+00 : f32
    %19 = vector.broadcast %cst_15 : f32 to vector<2x32xf32>
    %cst_16 = arith.constant 0.000000e+00 : f32
    %20 = vector.broadcast %cst_16 : f32 to vector<2x32xf32>
    %cst_17 = arith.constant 0.000000e+00 : f32
    %21 = vector.broadcast %cst_17 : f32 to vector<2x32xf32>
    %22 = vector.extract_strided_slice %12 {offsets = [0, 0], sizes = [2, 128], strides = [1, 1]} : vector<32x128xf32> to vector<2x128xf32>
    %23 = arith.truncf %19 : vector<2x32xf32> to vector<2x32xbf16>
    %cst_18 = arith.constant dense<0.000000e+00> : vector<2x128xf32>
    %24 = tpu.matmul %23, %16, %cst_18 {dimension_numbers = #tpu.dot_dimension_numbers<[1], [0], [0], [1], [0, 0, 1, 1], [], []>} : vector<2x32xbf16>, vector<32x128xbf16>, vector<2x128xf32> -> vector<2x128xf32>
    %25 = arith.addf %22, %24 : vector<2x128xf32>
    %26 = vector.extract_strided_slice %25 {offsets = [0, 0], sizes = [2, 32], strides = [1, 1]} : vector<2x128xf32> to vector<2x32xf32>
    %27 = arith.negf %26 : vector<2x32xf32>
    %28 = math.exp %27 : vector<2x32xf32>
    %cst_19 = arith.constant 1.000000e+00 : f32
    %29 = vector.broadcast %cst_19 : f32 to vector<2x32xf32>
    %30 = arith.addf %29, %28 : vector<2x32xf32>
    %31 = arith.divf %29, %30 : vector<2x32xf32>
    %32 = vector.extract_strided_slice %25 {offsets = [0, 32], sizes = [2, 32], strides = [1, 1]} : vector<2x128xf32> to vector<2x32xf32>
    %33 = arith.negf %32 : vector<2x32xf32>
    %34 = math.exp %33 : vector<2x32xf32>
    %cst_20 = arith.constant 1.000000e+00 : f32
    %35 = vector.broadcast %cst_20 : f32 to vector<2x32xf32>
    %36 = arith.addf %35, %34 : vector<2x32xf32>
    %37 = arith.divf %35, %36 : vector<2x32xf32>
    %38 = vector.extract_strided_slice %25 {offsets = [0, 64], sizes = [2, 32], strides = [1, 1]} : vector<2x128xf32> to vector<2x32xf32>
    %39 = math.tanh %38 : vector<2x32xf32>
    %40 = vector.extract_strided_slice %25 {offsets = [0, 96], sizes = [2, 32], strides = [1, 1]} : vector<2x128xf32> to vector<2x32xf32>
    %41 = arith.negf %40 : vector<2x32xf32>
    %42 = math.exp %41 : vector<2x32xf32>
    %cst_21 = arith.constant 1.000000e+00 : f32
    %43 = vector.broadcast %cst_21 : f32 to vector<2x32xf32>
    %44 = arith.addf %43, %42 : vector<2x32xf32>
    %45 = arith.divf %43, %44 : vector<2x32xf32>
    %46 = arith.mulf %37, %20 : vector<2x32xf32>
    %47 = arith.mulf %31, %39 : vector<2x32xf32>
    %48 = arith.addf %46, %47 : vector<2x32xf32>
    %49 = math.tanh %48 : vector<2x32xf32>
    %50 = arith.mulf %45, %49 : vector<2x32xf32>
    %c0_22 = arith.constant 0 : index
    %c0_23 = arith.constant 0 : index
    %51 = vector.load %arg2[%c0_22, %c0_23] : memref<96x64xf32, #tpu.memory_space<vmem>>, vector<2x32xf32>
    %52 = arith.subf %48, %20 : vector<2x32xf32>
    %53 = arith.mulf %51, %52 : vector<2x32xf32>
    %54 = arith.addf %20, %53 : vector<2x32xf32>
    %55 = arith.subf %50, %19 : vector<2x32xf32>
    %56 = arith.mulf %51, %55 : vector<2x32xf32>
    %57 = arith.addf %19, %56 : vector<2x32xf32>
    %58 = arith.mulf %51, %50 : vector<2x32xf32>
    %59 = arith.addf %21, %58 : vector<2x32xf32>
    %60 = vector.extract_strided_slice %12 {offsets = [2, 0], sizes = [2, 128], strides = [1, 1]} : vector<32x128xf32> to vector<2x128xf32>
    %61 = arith.truncf %57 : vector<2x32xf32> to vector<2x32xbf16>
    %cst_24 = arith.constant dense<0.000000e+00> : vector<2x128xf32>
    %62 = tpu.matmul %61, %16, %cst_24 {dimension_numbers = #tpu.dot_dimension_numbers<[1], [0], [0], [1], [0, 0, 1, 1], [], []>} : vector<2x32xbf16>, vector<32x128xbf16>, vector<2x128xf32> -> vector<2x128xf32>
    %63 = arith.addf %60, %62 : vector<2x128xf32>
    %64 = vector.extract_strided_slice %63 {offsets = [0, 0], sizes = [2, 32], strides = [1, 1]} : vector<2x128xf32> to vector<2x32xf32>
    %65 = arith.negf %64 : vector<2x32xf32>
    %66 = math.exp %65 : vector<2x32xf32>
    %cst_25 = arith.constant 1.000000e+00 : f32
    %67 = vector.broadcast %cst_25 : f32 to vector<2x32xf32>
    %68 = arith.addf %67, %66 : vector<2x32xf32>
    %69 = arith.divf %67, %68 : vector<2x32xf32>
    %70 = vector.extract_strided_slice %63 {offsets = [0, 32], sizes = [2, 32], strides = [1, 1]} : vector<2x128xf32> to vector<2x32xf32>
    %71 = arith.negf %70 : vector<2x32xf32>
    %72 = math.exp %71 : vector<2x32xf32>
    %cst_26 = arith.constant 1.000000e+00 : f32
    %73 = vector.broadcast %cst_26 : f32 to vector<2x32xf32>
    %74 = arith.addf %73, %72 : vector<2x32xf32>
    %75 = arith.divf %73, %74 : vector<2x32xf32>
    %76 = vector.extract_strided_slice %63 {offsets = [0, 64], sizes = [2, 32], strides = [1, 1]} : vector<2x128xf32> to vector<2x32xf32>
    %77 = math.tanh %76 : vector<2x32xf32>
    %78 = vector.extract_strided_slice %63 {offsets = [0, 96], sizes = [2, 32], strides = [1, 1]} : vector<2x128xf32> to vector<2x32xf32>
    %79 = arith.negf %78 : vector<2x32xf32>
    %80 = math.exp %79 : vector<2x32xf32>
    %cst_27 = arith.constant 1.000000e+00 : f32
    %81 = vector.broadcast %cst_27 : f32 to vector<2x32xf32>
    %82 = arith.addf %81, %80 : vector<2x32xf32>
    %83 = arith.divf %81, %82 : vector<2x32xf32>
    %84 = arith.mulf %75, %54 : vector<2x32xf32>
    %85 = arith.mulf %69, %77 : vector<2x32xf32>
    %86 = arith.addf %84, %85 : vector<2x32xf32>
    %87 = math.tanh %86 : vector<2x32xf32>
    %88 = arith.mulf %83, %87 : vector<2x32xf32>
    %c2 = arith.constant 2 : index
    %c0_28 = arith.constant 0 : index
    %89 = vector.load %arg2[%c2, %c0_28] : memref<96x64xf32, #tpu.memory_space<vmem>>, vector<2x32xf32>
    %90 = arith.subf %86, %54 : vector<2x32xf32>
    %91 = arith.mulf %89, %90 : vector<2x32xf32>
    %92 = arith.addf %54, %91 : vector<2x32xf32>
    %93 = arith.subf %88, %57 : vector<2x32xf32>
    %94 = arith.mulf %89, %93 : vector<2x32xf32>
    %95 = arith.addf %57, %94 : vector<2x32xf32>
    %96 = arith.mulf %89, %88 : vector<2x32xf32>
    %97 = arith.addf %59, %96 : vector<2x32xf32>
    %98 = vector.extract_strided_slice %12 {offsets = [4, 0], sizes = [2, 128], strides = [1, 1]} : vector<32x128xf32> to vector<2x128xf32>
    %99 = arith.truncf %95 : vector<2x32xf32> to vector<2x32xbf16>
    %cst_29 = arith.constant dense<0.000000e+00> : vector<2x128xf32>
    %100 = tpu.matmul %99, %16, %cst_29 {dimension_numbers = #tpu.dot_dimension_numbers<[1], [0], [0], [1], [0, 0, 1, 1], [], []>} : vector<2x32xbf16>, vector<32x128xbf16>, vector<2x128xf32> -> vector<2x128xf32>
    %101 = arith.addf %98, %100 : vector<2x128xf32>
    %102 = vector.extract_strided_slice %101 {offsets = [0, 0], sizes = [2, 32], strides = [1, 1]} : vector<2x128xf32> to vector<2x32xf32>
    %103 = arith.negf %102 : vector<2x32xf32>
    %104 = math.exp %103 : vector<2x32xf32>
    %cst_30 = arith.constant 1.000000e+00 : f32
    %105 = vector.broadcast %cst_30 : f32 to vector<2x32xf32>
    %106 = arith.addf %105, %104 : vector<2x32xf32>
    %107 = arith.divf %105, %106 : vector<2x32xf32>
    %108 = vector.extract_strided_slice %101 {offsets = [0, 32], sizes = [2, 32], strides = [1, 1]} : vector<2x128xf32> to vector<2x32xf32>
    %109 = arith.negf %108 : vector<2x32xf32>
    %110 = math.exp %109 : vector<2x32xf32>
    %cst_31 = arith.constant 1.000000e+00 : f32
    %111 = vector.broadcast %cst_31 : f32 to vector<2x32xf32>
    %112 = arith.addf %111, %110 : vector<2x32xf32>
    %113 = arith.divf %111, %112 : vector<2x32xf32>
    %114 = vector.extract_strided_slice %101 {offsets = [0, 64], sizes = [2, 32], strides = [1, 1]} : vector<2x128xf32> to vector<2x32xf32>
    %115 = math.tanh %114 : vector<2x32xf32>
    %116 = vector.extract_strided_slice %101 {offsets = [0, 96], sizes = [2, 32], strides = [1, 1]} : vector<2x128xf32> to vector<2x32xf32>
    %117 = arith.negf %116 : vector<2x32xf32>
    %118 = math.exp %117 : vector<2x32xf32>
    %cst_32 = arith.constant 1.000000e+00 : f32
    %119 = vector.broadcast %cst_32 : f32 to vector<2x32xf32>
    %120 = arith.addf %119, %118 : vector<2x32xf32>
    %121 = arith.divf %119, %120 : vector<2x32xf32>
    %122 = arith.mulf %113, %92 : vector<2x32xf32>
    %123 = arith.mulf %107, %115 : vector<2x32xf32>
    %124 = arith.addf %122, %123 : vector<2x32xf32>
    %125 = math.tanh %124 : vector<2x32xf32>
    %126 = arith.mulf %121, %125 : vector<2x32xf32>
    %c4 = arith.constant 4 : index
    %c0_33 = arith.constant 0 : index
    %127 = vector.load %arg2[%c4, %c0_33] : memref<96x64xf32, #tpu.memory_space<vmem>>, vector<2x32xf32>
    %128 = arith.subf %124, %92 : vector<2x32xf32>
    %129 = arith.mulf %127, %128 : vector<2x32xf32>
    %130 = arith.addf %92, %129 : vector<2x32xf32>
    %131 = arith.subf %126, %95 : vector<2x32xf32>
    %132 = arith.mulf %127, %131 : vector<2x32xf32>
    %133 = arith.addf %95, %132 : vector<2x32xf32>
    %134 = arith.mulf %127, %126 : vector<2x32xf32>
    %135 = arith.addf %97, %134 : vector<2x32xf32>
    %136 = vector.extract_strided_slice %12 {offsets = [6, 0], sizes = [2, 128], strides = [1, 1]} : vector<32x128xf32> to vector<2x128xf32>
    %137 = arith.truncf %133 : vector<2x32xf32> to vector<2x32xbf16>
    %cst_34 = arith.constant dense<0.000000e+00> : vector<2x128xf32>
    %138 = tpu.matmul %137, %16, %cst_34 {dimension_numbers = #tpu.dot_dimension_numbers<[1], [0], [0], [1], [0, 0, 1, 1], [], []>} : vector<2x32xbf16>, vector<32x128xbf16>, vector<2x128xf32> -> vector<2x128xf32>
    %139 = arith.addf %136, %138 : vector<2x128xf32>
    %140 = vector.extract_strided_slice %139 {offsets = [0, 0], sizes = [2, 32], strides = [1, 1]} : vector<2x128xf32> to vector<2x32xf32>
    %141 = arith.negf %140 : vector<2x32xf32>
    %142 = math.exp %141 : vector<2x32xf32>
    %cst_35 = arith.constant 1.000000e+00 : f32
    %143 = vector.broadcast %cst_35 : f32 to vector<2x32xf32>
    %144 = arith.addf %143, %142 : vector<2x32xf32>
    %145 = arith.divf %143, %144 : vector<2x32xf32>
    %146 = vector.extract_strided_slice %139 {offsets = [0, 32], sizes = [2, 32], strides = [1, 1]} : vector<2x128xf32> to vector<2x32xf32>
    %147 = arith.negf %146 : vector<2x32xf32>
    %148 = math.exp %147 : vector<2x32xf32>
    %cst_36 = arith.constant 1.000000e+00 : f32
    %149 = vector.broadcast %cst_36 : f32 to vector<2x32xf32>
    %150 = arith.addf %149, %148 : vector<2x32xf32>
    %151 = arith.divf %149, %150 : vector<2x32xf32>
    %152 = vector.extract_strided_slice %139 {offsets = [0, 64], sizes = [2, 32], strides = [1, 1]} : vector<2x128xf32> to vector<2x32xf32>
    %153 = math.tanh %152 : vector<2x32xf32>
    %154 = vector.extract_strided_slice %139 {offsets = [0, 96], sizes = [2, 32], strides = [1, 1]} : vector<2x128xf32> to vector<2x32xf32>
    %155 = arith.negf %154 : vector<2x32xf32>
    %156 = math.exp %155 : vector<2x32xf32>
    %cst_37 = arith.constant 1.000000e+00 : f32
    %157 = vector.broadcast %cst_37 : f32 to vector<2x32xf32>
    %158 = arith.addf %157, %156 : vector<2x32xf32>
    %159 = arith.divf %157, %158 : vector<2x32xf32>
    %160 = arith.mulf %151, %130 : vector<2x32xf32>
    %161 = arith.mulf %145, %153 : vector<2x32xf32>
    %162 = arith.addf %160, %161 : vector<2x32xf32>
    %163 = math.tanh %162 : vector<2x32xf32>
    %164 = arith.mulf %159, %163 : vector<2x32xf32>
    %c6 = arith.constant 6 : index
    %c0_38 = arith.constant 0 : index
    %165 = vector.load %arg2[%c6, %c0_38] : memref<96x64xf32, #tpu.memory_space<vmem>>, vector<2x32xf32>
    %166 = arith.subf %162, %130 : vector<2x32xf32>
    %167 = arith.mulf %165, %166 : vector<2x32xf32>
    %168 = arith.addf %130, %167 : vector<2x32xf32>
    %169 = arith.subf %164, %133 : vector<2x32xf32>
    %170 = arith.mulf %165, %169 : vector<2x32xf32>
    %171 = arith.addf %133, %170 : vector<2x32xf32>
    %172 = arith.mulf %165, %164 : vector<2x32xf32>
    %173 = arith.addf %135, %172 : vector<2x32xf32>
    %174 = vector.extract_strided_slice %12 {offsets = [8, 0], sizes = [2, 128], strides = [1, 1]} : vector<32x128xf32> to vector<2x128xf32>
    %175 = arith.truncf %171 : vector<2x32xf32> to vector<2x32xbf16>
    %cst_39 = arith.constant dense<0.000000e+00> : vector<2x128xf32>
    %176 = tpu.matmul %175, %16, %cst_39 {dimension_numbers = #tpu.dot_dimension_numbers<[1], [0], [0], [1], [0, 0, 1, 1], [], []>} : vector<2x32xbf16>, vector<32x128xbf16>, vector<2x128xf32> -> vector<2x128xf32>
    %177 = arith.addf %174, %176 : vector<2x128xf32>
    %178 = vector.extract_strided_slice %177 {offsets = [0, 0], sizes = [2, 32], strides = [1, 1]} : vector<2x128xf32> to vector<2x32xf32>
    %179 = arith.negf %178 : vector<2x32xf32>
    %180 = math.exp %179 : vector<2x32xf32>
    %cst_40 = arith.constant 1.000000e+00 : f32
    %181 = vector.broadcast %cst_40 : f32 to vector<2x32xf32>
    %182 = arith.addf %181, %180 : vector<2x32xf32>
    %183 = arith.divf %181, %182 : vector<2x32xf32>
    %184 = vector.extract_strided_slice %177 {offsets = [0, 32], sizes = [2, 32], strides = [1, 1]} : vector<2x128xf32> to vector<2x32xf32>
    %185 = arith.negf %184 : vector<2x32xf32>
    %186 = math.exp %185 : vector<2x32xf32>
    %cst_41 = arith.constant 1.000000e+00 : f32
    %187 = vector.broadcast %cst_41 : f32 to vector<2x32xf32>
    %188 = arith.addf %187, %186 : vector<2x32xf32>
    %189 = arith.divf %187, %188 : vector<2x32xf32>
    %190 = vector.extract_strided_slice %177 {offsets = [0, 64], sizes = [2, 32], strides = [1, 1]} : vector<2x128xf32> to vector<2x32xf32>
    %191 = math.tanh %190 : vector<2x32xf32>
    %192 = vector.extract_strided_slice %177 {offsets = [0, 96], sizes = [2, 32], strides = [1, 1]} : vector<2x128xf32> to vector<2x32xf32>
    %193 = arith.negf %192 : vector<2x32xf32>
    %194 = math.exp %193 : vector<2x32xf32>
    %cst_42 = arith.constant 1.000000e+00 : f32
    %195 = vector.broadcast %cst_42 : f32 to vector<2x32xf32>
    %196 = arith.addf %195, %194 : vector<2x32xf32>
    %197 = arith.divf %195, %196 : vector<2x32xf32>
    %198 = arith.mulf %189, %168 : vector<2x32xf32>
    %199 = arith.mulf %183, %191 : vector<2x32xf32>
    %200 = arith.addf %198, %199 : vector<2x32xf32>
    %201 = math.tanh %200 : vector<2x32xf32>
    %202 = arith.mulf %197, %201 : vector<2x32xf32>
    %c8 = arith.constant 8 : index
    %c0_43 = arith.constant 0 : index
    %203 = vector.load %arg2[%c8, %c0_43] : memref<96x64xf32, #tpu.memory_space<vmem>>, vector<2x32xf32>
    %204 = arith.subf %200, %168 : vector<2x32xf32>
    %205 = arith.mulf %203, %204 : vector<2x32xf32>
    %206 = arith.addf %168, %205 : vector<2x32xf32>
    %207 = arith.subf %202, %171 : vector<2x32xf32>
    %208 = arith.mulf %203, %207 : vector<2x32xf32>
    %209 = arith.addf %171, %208 : vector<2x32xf32>
    %210 = arith.mulf %203, %202 : vector<2x32xf32>
    %211 = arith.addf %173, %210 : vector<2x32xf32>
    %212 = vector.extract_strided_slice %12 {offsets = [10, 0], sizes = [2, 128], strides = [1, 1]} : vector<32x128xf32> to vector<2x128xf32>
    %213 = arith.truncf %209 : vector<2x32xf32> to vector<2x32xbf16>
    %cst_44 = arith.constant dense<0.000000e+00> : vector<2x128xf32>
    %214 = tpu.matmul %213, %16, %cst_44 {dimension_numbers = #tpu.dot_dimension_numbers<[1], [0], [0], [1], [0, 0, 1, 1], [], []>} : vector<2x32xbf16>, vector<32x128xbf16>, vector<2x128xf32> -> vector<2x128xf32>
    %215 = arith.addf %212, %214 : vector<2x128xf32>
    %216 = vector.extract_strided_slice %215 {offsets = [0, 0], sizes = [2, 32], strides = [1, 1]} : vector<2x128xf32> to vector<2x32xf32>
    %217 = arith.negf %216 : vector<2x32xf32>
    %218 = math.exp %217 : vector<2x32xf32>
    %cst_45 = arith.constant 1.000000e+00 : f32
    %219 = vector.broadcast %cst_45 : f32 to vector<2x32xf32>
    %220 = arith.addf %219, %218 : vector<2x32xf32>
    %221 = arith.divf %219, %220 : vector<2x32xf32>
    %222 = vector.extract_strided_slice %215 {offsets = [0, 32], sizes = [2, 32], strides = [1, 1]} : vector<2x128xf32> to vector<2x32xf32>
    %223 = arith.negf %222 : vector<2x32xf32>
    %224 = math.exp %223 : vector<2x32xf32>
    %cst_46 = arith.constant 1.000000e+00 : f32
    %225 = vector.broadcast %cst_46 : f32 to vector<2x32xf32>
    %226 = arith.addf %225, %224 : vector<2x32xf32>
    %227 = arith.divf %225, %226 : vector<2x32xf32>
    %228 = vector.extract_strided_slice %215 {offsets = [0, 64], sizes = [2, 32], strides = [1, 1]} : vector<2x128xf32> to vector<2x32xf32>
    %229 = math.tanh %228 : vector<2x32xf32>
    %230 = vector.extract_strided_slice %215 {offsets = [0, 96], sizes = [2, 32], strides = [1, 1]} : vector<2x128xf32> to vector<2x32xf32>
    %231 = arith.negf %230 : vector<2x32xf32>
    %232 = math.exp %231 : vector<2x32xf32>
    %cst_47 = arith.constant 1.000000e+00 : f32
    %233 = vector.broadcast %cst_47 : f32 to vector<2x32xf32>
    %234 = arith.addf %233, %232 : vector<2x32xf32>
    %235 = arith.divf %233, %234 : vector<2x32xf32>
    %236 = arith.mulf %227, %206 : vector<2x32xf32>
    %237 = arith.mulf %221, %229 : vector<2x32xf32>
    %238 = arith.addf %236, %237 : vector<2x32xf32>
    %239 = math.tanh %238 : vector<2x32xf32>
    %240 = arith.mulf %235, %239 : vector<2x32xf32>
    %c10 = arith.constant 10 : index
    %c0_48 = arith.constant 0 : index
    %241 = vector.load %arg2[%c10, %c0_48] : memref<96x64xf32, #tpu.memory_space<vmem>>, vector<2x32xf32>
    %242 = arith.subf %238, %206 : vector<2x32xf32>
    %243 = arith.mulf %241, %242 : vector<2x32xf32>
    %244 = arith.addf %206, %243 : vector<2x32xf32>
    %245 = arith.subf %240, %209 : vector<2x32xf32>
    %246 = arith.mulf %241, %245 : vector<2x32xf32>
    %247 = arith.addf %209, %246 : vector<2x32xf32>
    %248 = arith.mulf %241, %240 : vector<2x32xf32>
    %249 = arith.addf %211, %248 : vector<2x32xf32>
    %250 = vector.extract_strided_slice %12 {offsets = [12, 0], sizes = [2, 128], strides = [1, 1]} : vector<32x128xf32> to vector<2x128xf32>
    %251 = arith.truncf %247 : vector<2x32xf32> to vector<2x32xbf16>
    %cst_49 = arith.constant dense<0.000000e+00> : vector<2x128xf32>
    %252 = tpu.matmul %251, %16, %cst_49 {dimension_numbers = #tpu.dot_dimension_numbers<[1], [0], [0], [1], [0, 0, 1, 1], [], []>} : vector<2x32xbf16>, vector<32x128xbf16>, vector<2x128xf32> -> vector<2x128xf32>
    %253 = arith.addf %250, %252 : vector<2x128xf32>
    %254 = vector.extract_strided_slice %253 {offsets = [0, 0], sizes = [2, 32], strides = [1, 1]} : vector<2x128xf32> to vector<2x32xf32>
    %255 = arith.negf %254 : vector<2x32xf32>
    %256 = math.exp %255 : vector<2x32xf32>
    %cst_50 = arith.constant 1.000000e+00 : f32
    %257 = vector.broadcast %cst_50 : f32 to vector<2x32xf32>
    %258 = arith.addf %257, %256 : vector<2x32xf32>
    %259 = arith.divf %257, %258 : vector<2x32xf32>
    %260 = vector.extract_strided_slice %253 {offsets = [0, 32], sizes = [2, 32], strides = [1, 1]} : vector<2x128xf32> to vector<2x32xf32>
    %261 = arith.negf %260 : vector<2x32xf32>
    %262 = math.exp %261 : vector<2x32xf32>
    %cst_51 = arith.constant 1.000000e+00 : f32
    %263 = vector.broadcast %cst_51 : f32 to vector<2x32xf32>
    %264 = arith.addf %263, %262 : vector<2x32xf32>
    %265 = arith.divf %263, %264 : vector<2x32xf32>
    %266 = vector.extract_strided_slice %253 {offsets = [0, 64], sizes = [2, 32], strides = [1, 1]} : vector<2x128xf32> to vector<2x32xf32>
    %267 = math.tanh %266 : vector<2x32xf32>
    %268 = vector.extract_strided_slice %253 {offsets = [0, 96], sizes = [2, 32], strides = [1, 1]} : vector<2x128xf32> to vector<2x32xf32>
    %269 = arith.negf %268 : vector<2x32xf32>
    %270 = math.exp %269 : vector<2x32xf32>
    %cst_52 = arith.constant 1.000000e+00 : f32
    %271 = vector.broadcast %cst_52 : f32 to vector<2x32xf32>
    %272 = arith.addf %271, %270 : vector<2x32xf32>
    %273 = arith.divf %271, %272 : vector<2x32xf32>
    %274 = arith.mulf %265, %244 : vector<2x32xf32>
    %275 = arith.mulf %259, %267 : vector<2x32xf32>
    %276 = arith.addf %274, %275 : vector<2x32xf32>
    %277 = math.tanh %276 : vector<2x32xf32>
    %278 = arith.mulf %273, %277 : vector<2x32xf32>
    %c12 = arith.constant 12 : index
    %c0_53 = arith.constant 0 : index
    %279 = vector.load %arg2[%c12, %c0_53] : memref<96x64xf32, #tpu.memory_space<vmem>>, vector<2x32xf32>
    %280 = arith.subf %276, %244 : vector<2x32xf32>
    %281 = arith.mulf %279, %280 : vector<2x32xf32>
    %282 = arith.addf %244, %281 : vector<2x32xf32>
    %283 = arith.subf %278, %247 : vector<2x32xf32>
    %284 = arith.mulf %279, %283 : vector<2x32xf32>
    %285 = arith.addf %247, %284 : vector<2x32xf32>
    %286 = arith.mulf %279, %278 : vector<2x32xf32>
    %287 = arith.addf %249, %286 : vector<2x32xf32>
    %288 = vector.extract_strided_slice %12 {offsets = [14, 0], sizes = [2, 128], strides = [1, 1]} : vector<32x128xf32> to vector<2x128xf32>
    %289 = arith.truncf %285 : vector<2x32xf32> to vector<2x32xbf16>
    %cst_54 = arith.constant dense<0.000000e+00> : vector<2x128xf32>
    %290 = tpu.matmul %289, %16, %cst_54 {dimension_numbers = #tpu.dot_dimension_numbers<[1], [0], [0], [1], [0, 0, 1, 1], [], []>} : vector<2x32xbf16>, vector<32x128xbf16>, vector<2x128xf32> -> vector<2x128xf32>
    %291 = arith.addf %288, %290 : vector<2x128xf32>
    %292 = vector.extract_strided_slice %291 {offsets = [0, 0], sizes = [2, 32], strides = [1, 1]} : vector<2x128xf32> to vector<2x32xf32>
    %293 = arith.negf %292 : vector<2x32xf32>
    %294 = math.exp %293 : vector<2x32xf32>
    %cst_55 = arith.constant 1.000000e+00 : f32
    %295 = vector.broadcast %cst_55 : f32 to vector<2x32xf32>
    %296 = arith.addf %295, %294 : vector<2x32xf32>
    %297 = arith.divf %295, %296 : vector<2x32xf32>
    %298 = vector.extract_strided_slice %291 {offsets = [0, 32], sizes = [2, 32], strides = [1, 1]} : vector<2x128xf32> to vector<2x32xf32>
    %299 = arith.negf %298 : vector<2x32xf32>
    %300 = math.exp %299 : vector<2x32xf32>
    %cst_56 = arith.constant 1.000000e+00 : f32
    %301 = vector.broadcast %cst_56 : f32 to vector<2x32xf32>
    %302 = arith.addf %301, %300 : vector<2x32xf32>
    %303 = arith.divf %301, %302 : vector<2x32xf32>
    %304 = vector.extract_strided_slice %291 {offsets = [0, 64], sizes = [2, 32], strides = [1, 1]} : vector<2x128xf32> to vector<2x32xf32>
    %305 = math.tanh %304 : vector<2x32xf32>
    %306 = vector.extract_strided_slice %291 {offsets = [0, 96], sizes = [2, 32], strides = [1, 1]} : vector<2x128xf32> to vector<2x32xf32>
    %307 = arith.negf %306 : vector<2x32xf32>
    %308 = math.exp %307 : vector<2x32xf32>
    %cst_57 = arith.constant 1.000000e+00 : f32
    %309 = vector.broadcast %cst_57 : f32 to vector<2x32xf32>
    %310 = arith.addf %309, %308 : vector<2x32xf32>
    %311 = arith.divf %309, %310 : vector<2x32xf32>
    %312 = arith.mulf %303, %282 : vector<2x32xf32>
    %313 = arith.mulf %297, %305 : vector<2x32xf32>
    %314 = arith.addf %312, %313 : vector<2x32xf32>
    %315 = math.tanh %314 : vector<2x32xf32>
    %316 = arith.mulf %311, %315 : vector<2x32xf32>
    %c14 = arith.constant 14 : index
    %c0_58 = arith.constant 0 : index
    %317 = vector.load %arg2[%c14, %c0_58] : memref<96x64xf32, #tpu.memory_space<vmem>>, vector<2x32xf32>
    %318 = arith.subf %314, %282 : vector<2x32xf32>
    %319 = arith.mulf %317, %318 : vector<2x32xf32>
    %320 = arith.addf %282, %319 : vector<2x32xf32>
    %321 = arith.subf %316, %285 : vector<2x32xf32>
    %322 = arith.mulf %317, %321 : vector<2x32xf32>
    %323 = arith.addf %285, %322 : vector<2x32xf32>
    %324 = arith.mulf %317, %316 : vector<2x32xf32>
    %325 = arith.addf %287, %324 : vector<2x32xf32>
    %326 = vector.extract_strided_slice %12 {offsets = [16, 0], sizes = [2, 128], strides = [1, 1]} : vector<32x128xf32> to vector<2x128xf32>
    %327 = arith.truncf %323 : vector<2x32xf32> to vector<2x32xbf16>
    %cst_59 = arith.constant dense<0.000000e+00> : vector<2x128xf32>
    %328 = tpu.matmul %327, %16, %cst_59 {dimension_numbers = #tpu.dot_dimension_numbers<[1], [0], [0], [1], [0, 0, 1, 1], [], []>} : vector<2x32xbf16>, vector<32x128xbf16>, vector<2x128xf32> -> vector<2x128xf32>
    %329 = arith.addf %326, %328 : vector<2x128xf32>
    %330 = vector.extract_strided_slice %329 {offsets = [0, 0], sizes = [2, 32], strides = [1, 1]} : vector<2x128xf32> to vector<2x32xf32>
    %331 = arith.negf %330 : vector<2x32xf32>
    %332 = math.exp %331 : vector<2x32xf32>
    %cst_60 = arith.constant 1.000000e+00 : f32
    %333 = vector.broadcast %cst_60 : f32 to vector<2x32xf32>
    %334 = arith.addf %333, %332 : vector<2x32xf32>
    %335 = arith.divf %333, %334 : vector<2x32xf32>
    %336 = vector.extract_strided_slice %329 {offsets = [0, 32], sizes = [2, 32], strides = [1, 1]} : vector<2x128xf32> to vector<2x32xf32>
    %337 = arith.negf %336 : vector<2x32xf32>
    %338 = math.exp %337 : vector<2x32xf32>
    %cst_61 = arith.constant 1.000000e+00 : f32
    %339 = vector.broadcast %cst_61 : f32 to vector<2x32xf32>
    %340 = arith.addf %339, %338 : vector<2x32xf32>
    %341 = arith.divf %339, %340 : vector<2x32xf32>
    %342 = vector.extract_strided_slice %329 {offsets = [0, 64], sizes = [2, 32], strides = [1, 1]} : vector<2x128xf32> to vector<2x32xf32>
    %343 = math.tanh %342 : vector<2x32xf32>
    %344 = vector.extract_strided_slice %329 {offsets = [0, 96], sizes = [2, 32], strides = [1, 1]} : vector<2x128xf32> to vector<2x32xf32>
    %345 = arith.negf %344 : vector<2x32xf32>
    %346 = math.exp %345 : vector<2x32xf32>
    %cst_62 = arith.constant 1.000000e+00 : f32
    %347 = vector.broadcast %cst_62 : f32 to vector<2x32xf32>
    %348 = arith.addf %347, %346 : vector<2x32xf32>
    %349 = arith.divf %347, %348 : vector<2x32xf32>
    %350 = arith.mulf %341, %320 : vector<2x32xf32>
    %351 = arith.mulf %335, %343 : vector<2x32xf32>
    %352 = arith.addf %350, %351 : vector<2x32xf32>
    %353 = math.tanh %352 : vector<2x32xf32>
    %354 = arith.mulf %349, %353 : vector<2x32xf32>
    %c16 = arith.constant 16 : index
    %c0_63 = arith.constant 0 : index
    %355 = vector.load %arg2[%c16, %c0_63] : memref<96x64xf32, #tpu.memory_space<vmem>>, vector<2x32xf32>
    %356 = arith.subf %352, %320 : vector<2x32xf32>
    %357 = arith.mulf %355, %356 : vector<2x32xf32>
    %358 = arith.addf %320, %357 : vector<2x32xf32>
    %359 = arith.subf %354, %323 : vector<2x32xf32>
    %360 = arith.mulf %355, %359 : vector<2x32xf32>
    %361 = arith.addf %323, %360 : vector<2x32xf32>
    %362 = arith.mulf %355, %354 : vector<2x32xf32>
    %363 = arith.addf %325, %362 : vector<2x32xf32>
    %364 = vector.extract_strided_slice %12 {offsets = [18, 0], sizes = [2, 128], strides = [1, 1]} : vector<32x128xf32> to vector<2x128xf32>
    %365 = arith.truncf %361 : vector<2x32xf32> to vector<2x32xbf16>
    %cst_64 = arith.constant dense<0.000000e+00> : vector<2x128xf32>
    %366 = tpu.matmul %365, %16, %cst_64 {dimension_numbers = #tpu.dot_dimension_numbers<[1], [0], [0], [1], [0, 0, 1, 1], [], []>} : vector<2x32xbf16>, vector<32x128xbf16>, vector<2x128xf32> -> vector<2x128xf32>
    %367 = arith.addf %364, %366 : vector<2x128xf32>
    %368 = vector.extract_strided_slice %367 {offsets = [0, 0], sizes = [2, 32], strides = [1, 1]} : vector<2x128xf32> to vector<2x32xf32>
    %369 = arith.negf %368 : vector<2x32xf32>
    %370 = math.exp %369 : vector<2x32xf32>
    %cst_65 = arith.constant 1.000000e+00 : f32
    %371 = vector.broadcast %cst_65 : f32 to vector<2x32xf32>
    %372 = arith.addf %371, %370 : vector<2x32xf32>
    %373 = arith.divf %371, %372 : vector<2x32xf32>
    %374 = vector.extract_strided_slice %367 {offsets = [0, 32], sizes = [2, 32], strides = [1, 1]} : vector<2x128xf32> to vector<2x32xf32>
    %375 = arith.negf %374 : vector<2x32xf32>
    %376 = math.exp %375 : vector<2x32xf32>
    %cst_66 = arith.constant 1.000000e+00 : f32
    %377 = vector.broadcast %cst_66 : f32 to vector<2x32xf32>
    %378 = arith.addf %377, %376 : vector<2x32xf32>
    %379 = arith.divf %377, %378 : vector<2x32xf32>
    %380 = vector.extract_strided_slice %367 {offsets = [0, 64], sizes = [2, 32], strides = [1, 1]} : vector<2x128xf32> to vector<2x32xf32>
    %381 = math.tanh %380 : vector<2x32xf32>
    %382 = vector.extract_strided_slice %367 {offsets = [0, 96], sizes = [2, 32], strides = [1, 1]} : vector<2x128xf32> to vector<2x32xf32>
    %383 = arith.negf %382 : vector<2x32xf32>
    %384 = math.exp %383 : vector<2x32xf32>
    %cst_67 = arith.constant 1.000000e+00 : f32
    %385 = vector.broadcast %cst_67 : f32 to vector<2x32xf32>
    %386 = arith.addf %385, %384 : vector<2x32xf32>
    %387 = arith.divf %385, %386 : vector<2x32xf32>
    %388 = arith.mulf %379, %358 : vector<2x32xf32>
    %389 = arith.mulf %373, %381 : vector<2x32xf32>
    %390 = arith.addf %388, %389 : vector<2x32xf32>
    %391 = math.tanh %390 : vector<2x32xf32>
    %392 = arith.mulf %387, %391 : vector<2x32xf32>
    %c18 = arith.constant 18 : index
    %c0_68 = arith.constant 0 : index
    %393 = vector.load %arg2[%c18, %c0_68] : memref<96x64xf32, #tpu.memory_space<vmem>>, vector<2x32xf32>
    %394 = arith.subf %390, %358 : vector<2x32xf32>
    %395 = arith.mulf %393, %394 : vector<2x32xf32>
    %396 = arith.addf %358, %395 : vector<2x32xf32>
    %397 = arith.subf %392, %361 : vector<2x32xf32>
    %398 = arith.mulf %393, %397 : vector<2x32xf32>
    %399 = arith.addf %361, %398 : vector<2x32xf32>
    %400 = arith.mulf %393, %392 : vector<2x32xf32>
    %401 = arith.addf %363, %400 : vector<2x32xf32>
    %402 = vector.extract_strided_slice %12 {offsets = [20, 0], sizes = [2, 128], strides = [1, 1]} : vector<32x128xf32> to vector<2x128xf32>
    %403 = arith.truncf %399 : vector<2x32xf32> to vector<2x32xbf16>
    %cst_69 = arith.constant dense<0.000000e+00> : vector<2x128xf32>
    %404 = tpu.matmul %403, %16, %cst_69 {dimension_numbers = #tpu.dot_dimension_numbers<[1], [0], [0], [1], [0, 0, 1, 1], [], []>} : vector<2x32xbf16>, vector<32x128xbf16>, vector<2x128xf32> -> vector<2x128xf32>
    %405 = arith.addf %402, %404 : vector<2x128xf32>
    %406 = vector.extract_strided_slice %405 {offsets = [0, 0], sizes = [2, 32], strides = [1, 1]} : vector<2x128xf32> to vector<2x32xf32>
    %407 = arith.negf %406 : vector<2x32xf32>
    %408 = math.exp %407 : vector<2x32xf32>
    %cst_70 = arith.constant 1.000000e+00 : f32
    %409 = vector.broadcast %cst_70 : f32 to vector<2x32xf32>
    %410 = arith.addf %409, %408 : vector<2x32xf32>
    %411 = arith.divf %409, %410 : vector<2x32xf32>
    %412 = vector.extract_strided_slice %405 {offsets = [0, 32], sizes = [2, 32], strides = [1, 1]} : vector<2x128xf32> to vector<2x32xf32>
    %413 = arith.negf %412 : vector<2x32xf32>
    %414 = math.exp %413 : vector<2x32xf32>
    %cst_71 = arith.constant 1.000000e+00 : f32
    %415 = vector.broadcast %cst_71 : f32 to vector<2x32xf32>
    %416 = arith.addf %415, %414 : vector<2x32xf32>
    %417 = arith.divf %415, %416 : vector<2x32xf32>
    %418 = vector.extract_strided_slice %405 {offsets = [0, 64], sizes = [2, 32], strides = [1, 1]} : vector<2x128xf32> to vector<2x32xf32>
    %419 = math.tanh %418 : vector<2x32xf32>
    %420 = vector.extract_strided_slice %405 {offsets = [0, 96], sizes = [2, 32], strides = [1, 1]} : vector<2x128xf32> to vector<2x32xf32>
    %421 = arith.negf %420 : vector<2x32xf32>
    %422 = math.exp %421 : vector<2x32xf32>
    %cst_72 = arith.constant 1.000000e+00 : f32
    %423 = vector.broadcast %cst_72 : f32 to vector<2x32xf32>
    %424 = arith.addf %423, %422 : vector<2x32xf32>
    %425 = arith.divf %423, %424 : vector<2x32xf32>
    %426 = arith.mulf %417, %396 : vector<2x32xf32>
    %427 = arith.mulf %411, %419 : vector<2x32xf32>
    %428 = arith.addf %426, %427 : vector<2x32xf32>
    %429 = math.tanh %428 : vector<2x32xf32>
    %430 = arith.mulf %425, %429 : vector<2x32xf32>
    %c20 = arith.constant 20 : index
    %c0_73 = arith.constant 0 : index
    %431 = vector.load %arg2[%c20, %c0_73] : memref<96x64xf32, #tpu.memory_space<vmem>>, vector<2x32xf32>
    %432 = arith.subf %428, %396 : vector<2x32xf32>
    %433 = arith.mulf %431, %432 : vector<2x32xf32>
    %434 = arith.addf %396, %433 : vector<2x32xf32>
    %435 = arith.subf %430, %399 : vector<2x32xf32>
    %436 = arith.mulf %431, %435 : vector<2x32xf32>
    %437 = arith.addf %399, %436 : vector<2x32xf32>
    %438 = arith.mulf %431, %430 : vector<2x32xf32>
    %439 = arith.addf %401, %438 : vector<2x32xf32>
    %440 = vector.extract_strided_slice %12 {offsets = [22, 0], sizes = [2, 128], strides = [1, 1]} : vector<32x128xf32> to vector<2x128xf32>
    %441 = arith.truncf %437 : vector<2x32xf32> to vector<2x32xbf16>
    %cst_74 = arith.constant dense<0.000000e+00> : vector<2x128xf32>
    %442 = tpu.matmul %441, %16, %cst_74 {dimension_numbers = #tpu.dot_dimension_numbers<[1], [0], [0], [1], [0, 0, 1, 1], [], []>} : vector<2x32xbf16>, vector<32x128xbf16>, vector<2x128xf32> -> vector<2x128xf32>
    %443 = arith.addf %440, %442 : vector<2x128xf32>
    %444 = vector.extract_strided_slice %443 {offsets = [0, 0], sizes = [2, 32], strides = [1, 1]} : vector<2x128xf32> to vector<2x32xf32>
    %445 = arith.negf %444 : vector<2x32xf32>
    %446 = math.exp %445 : vector<2x32xf32>
    %cst_75 = arith.constant 1.000000e+00 : f32
    %447 = vector.broadcast %cst_75 : f32 to vector<2x32xf32>
    %448 = arith.addf %447, %446 : vector<2x32xf32>
    %449 = arith.divf %447, %448 : vector<2x32xf32>
    %450 = vector.extract_strided_slice %443 {offsets = [0, 32], sizes = [2, 32], strides = [1, 1]} : vector<2x128xf32> to vector<2x32xf32>
    %451 = arith.negf %450 : vector<2x32xf32>
    %452 = math.exp %451 : vector<2x32xf32>
    %cst_76 = arith.constant 1.000000e+00 : f32
    %453 = vector.broadcast %cst_76 : f32 to vector<2x32xf32>
    %454 = arith.addf %453, %452 : vector<2x32xf32>
    %455 = arith.divf %453, %454 : vector<2x32xf32>
    %456 = vector.extract_strided_slice %443 {offsets = [0, 64], sizes = [2, 32], strides = [1, 1]} : vector<2x128xf32> to vector<2x32xf32>
    %457 = math.tanh %456 : vector<2x32xf32>
    %458 = vector.extract_strided_slice %443 {offsets = [0, 96], sizes = [2, 32], strides = [1, 1]} : vector<2x128xf32> to vector<2x32xf32>
    %459 = arith.negf %458 : vector<2x32xf32>
    %460 = math.exp %459 : vector<2x32xf32>
    %cst_77 = arith.constant 1.000000e+00 : f32
    %461 = vector.broadcast %cst_77 : f32 to vector<2x32xf32>
    %462 = arith.addf %461, %460 : vector<2x32xf32>
    %463 = arith.divf %461, %462 : vector<2x32xf32>
    %464 = arith.mulf %455, %434 : vector<2x32xf32>
    %465 = arith.mulf %449, %457 : vector<2x32xf32>
    %466 = arith.addf %464, %465 : vector<2x32xf32>
    %467 = math.tanh %466 : vector<2x32xf32>
    %468 = arith.mulf %463, %467 : vector<2x32xf32>
    %c22 = arith.constant 22 : index
    %c0_78 = arith.constant 0 : index
    %469 = vector.load %arg2[%c22, %c0_78] : memref<96x64xf32, #tpu.memory_space<vmem>>, vector<2x32xf32>
    %470 = arith.subf %466, %434 : vector<2x32xf32>
    %471 = arith.mulf %469, %470 : vector<2x32xf32>
    %472 = arith.addf %434, %471 : vector<2x32xf32>
    %473 = arith.subf %468, %437 : vector<2x32xf32>
    %474 = arith.mulf %469, %473 : vector<2x32xf32>
    %475 = arith.addf %437, %474 : vector<2x32xf32>
    %476 = arith.mulf %469, %468 : vector<2x32xf32>
    %477 = arith.addf %439, %476 : vector<2x32xf32>
    %478 = vector.extract_strided_slice %12 {offsets = [24, 0], sizes = [2, 128], strides = [1, 1]} : vector<32x128xf32> to vector<2x128xf32>
    %479 = arith.truncf %475 : vector<2x32xf32> to vector<2x32xbf16>
    %cst_79 = arith.constant dense<0.000000e+00> : vector<2x128xf32>
    %480 = tpu.matmul %479, %16, %cst_79 {dimension_numbers = #tpu.dot_dimension_numbers<[1], [0], [0], [1], [0, 0, 1, 1], [], []>} : vector<2x32xbf16>, vector<32x128xbf16>, vector<2x128xf32> -> vector<2x128xf32>
    %481 = arith.addf %478, %480 : vector<2x128xf32>
    %482 = vector.extract_strided_slice %481 {offsets = [0, 0], sizes = [2, 32], strides = [1, 1]} : vector<2x128xf32> to vector<2x32xf32>
    %483 = arith.negf %482 : vector<2x32xf32>
    %484 = math.exp %483 : vector<2x32xf32>
    %cst_80 = arith.constant 1.000000e+00 : f32
    %485 = vector.broadcast %cst_80 : f32 to vector<2x32xf32>
    %486 = arith.addf %485, %484 : vector<2x32xf32>
    %487 = arith.divf %485, %486 : vector<2x32xf32>
    %488 = vector.extract_strided_slice %481 {offsets = [0, 32], sizes = [2, 32], strides = [1, 1]} : vector<2x128xf32> to vector<2x32xf32>
    %489 = arith.negf %488 : vector<2x32xf32>
    %490 = math.exp %489 : vector<2x32xf32>
    %cst_81 = arith.constant 1.000000e+00 : f32
    %491 = vector.broadcast %cst_81 : f32 to vector<2x32xf32>
    %492 = arith.addf %491, %490 : vector<2x32xf32>
    %493 = arith.divf %491, %492 : vector<2x32xf32>
    %494 = vector.extract_strided_slice %481 {offsets = [0, 64], sizes = [2, 32], strides = [1, 1]} : vector<2x128xf32> to vector<2x32xf32>
    %495 = math.tanh %494 : vector<2x32xf32>
    %496 = vector.extract_strided_slice %481 {offsets = [0, 96], sizes = [2, 32], strides = [1, 1]} : vector<2x128xf32> to vector<2x32xf32>
    %497 = arith.negf %496 : vector<2x32xf32>
    %498 = math.exp %497 : vector<2x32xf32>
    %cst_82 = arith.constant 1.000000e+00 : f32
    %499 = vector.broadcast %cst_82 : f32 to vector<2x32xf32>
    %500 = arith.addf %499, %498 : vector<2x32xf32>
    %501 = arith.divf %499, %500 : vector<2x32xf32>
    %502 = arith.mulf %493, %472 : vector<2x32xf32>
    %503 = arith.mulf %487, %495 : vector<2x32xf32>
    %504 = arith.addf %502, %503 : vector<2x32xf32>
    %505 = math.tanh %504 : vector<2x32xf32>
    %506 = arith.mulf %501, %505 : vector<2x32xf32>
    %c24 = arith.constant 24 : index
    %c0_83 = arith.constant 0 : index
    %507 = vector.load %arg2[%c24, %c0_83] : memref<96x64xf32, #tpu.memory_space<vmem>>, vector<2x32xf32>
    %508 = arith.subf %504, %472 : vector<2x32xf32>
    %509 = arith.mulf %507, %508 : vector<2x32xf32>
    %510 = arith.addf %472, %509 : vector<2x32xf32>
    %511 = arith.subf %506, %475 : vector<2x32xf32>
    %512 = arith.mulf %507, %511 : vector<2x32xf32>
    %513 = arith.addf %475, %512 : vector<2x32xf32>
    %514 = arith.mulf %507, %506 : vector<2x32xf32>
    %515 = arith.addf %477, %514 : vector<2x32xf32>
    %516 = vector.extract_strided_slice %12 {offsets = [26, 0], sizes = [2, 128], strides = [1, 1]} : vector<32x128xf32> to vector<2x128xf32>
    %517 = arith.truncf %513 : vector<2x32xf32> to vector<2x32xbf16>
    %cst_84 = arith.constant dense<0.000000e+00> : vector<2x128xf32>
    %518 = tpu.matmul %517, %16, %cst_84 {dimension_numbers = #tpu.dot_dimension_numbers<[1], [0], [0], [1], [0, 0, 1, 1], [], []>} : vector<2x32xbf16>, vector<32x128xbf16>, vector<2x128xf32> -> vector<2x128xf32>
    %519 = arith.addf %516, %518 : vector<2x128xf32>
    %520 = vector.extract_strided_slice %519 {offsets = [0, 0], sizes = [2, 32], strides = [1, 1]} : vector<2x128xf32> to vector<2x32xf32>
    %521 = arith.negf %520 : vector<2x32xf32>
    %522 = math.exp %521 : vector<2x32xf32>
    %cst_85 = arith.constant 1.000000e+00 : f32
    %523 = vector.broadcast %cst_85 : f32 to vector<2x32xf32>
    %524 = arith.addf %523, %522 : vector<2x32xf32>
    %525 = arith.divf %523, %524 : vector<2x32xf32>
    %526 = vector.extract_strided_slice %519 {offsets = [0, 32], sizes = [2, 32], strides = [1, 1]} : vector<2x128xf32> to vector<2x32xf32>
    %527 = arith.negf %526 : vector<2x32xf32>
    %528 = math.exp %527 : vector<2x32xf32>
    %cst_86 = arith.constant 1.000000e+00 : f32
    %529 = vector.broadcast %cst_86 : f32 to vector<2x32xf32>
    %530 = arith.addf %529, %528 : vector<2x32xf32>
    %531 = arith.divf %529, %530 : vector<2x32xf32>
    %532 = vector.extract_strided_slice %519 {offsets = [0, 64], sizes = [2, 32], strides = [1, 1]} : vector<2x128xf32> to vector<2x32xf32>
    %533 = math.tanh %532 : vector<2x32xf32>
    %534 = vector.extract_strided_slice %519 {offsets = [0, 96], sizes = [2, 32], strides = [1, 1]} : vector<2x128xf32> to vector<2x32xf32>
    %535 = arith.negf %534 : vector<2x32xf32>
    %536 = math.exp %535 : vector<2x32xf32>
    %cst_87 = arith.constant 1.000000e+00 : f32
    %537 = vector.broadcast %cst_87 : f32 to vector<2x32xf32>
    %538 = arith.addf %537, %536 : vector<2x32xf32>
    %539 = arith.divf %537, %538 : vector<2x32xf32>
    %540 = arith.mulf %531, %510 : vector<2x32xf32>
    %541 = arith.mulf %525, %533 : vector<2x32xf32>
    %542 = arith.addf %540, %541 : vector<2x32xf32>
    %543 = math.tanh %542 : vector<2x32xf32>
    %544 = arith.mulf %539, %543 : vector<2x32xf32>
    %c26 = arith.constant 26 : index
    %c0_88 = arith.constant 0 : index
    %545 = vector.load %arg2[%c26, %c0_88] : memref<96x64xf32, #tpu.memory_space<vmem>>, vector<2x32xf32>
    %546 = arith.subf %542, %510 : vector<2x32xf32>
    %547 = arith.mulf %545, %546 : vector<2x32xf32>
    %548 = arith.addf %510, %547 : vector<2x32xf32>
    %549 = arith.subf %544, %513 : vector<2x32xf32>
    %550 = arith.mulf %545, %549 : vector<2x32xf32>
    %551 = arith.addf %513, %550 : vector<2x32xf32>
    %552 = arith.mulf %545, %544 : vector<2x32xf32>
    %553 = arith.addf %515, %552 : vector<2x32xf32>
    %554 = vector.extract_strided_slice %12 {offsets = [28, 0], sizes = [2, 128], strides = [1, 1]} : vector<32x128xf32> to vector<2x128xf32>
    %555 = arith.truncf %551 : vector<2x32xf32> to vector<2x32xbf16>
    %cst_89 = arith.constant dense<0.000000e+00> : vector<2x128xf32>
    %556 = tpu.matmul %555, %16, %cst_89 {dimension_numbers = #tpu.dot_dimension_numbers<[1], [0], [0], [1], [0, 0, 1, 1], [], []>} : vector<2x32xbf16>, vector<32x128xbf16>, vector<2x128xf32> -> vector<2x128xf32>
    %557 = arith.addf %554, %556 : vector<2x128xf32>
    %558 = vector.extract_strided_slice %557 {offsets = [0, 0], sizes = [2, 32], strides = [1, 1]} : vector<2x128xf32> to vector<2x32xf32>
    %559 = arith.negf %558 : vector<2x32xf32>
    %560 = math.exp %559 : vector<2x32xf32>
    %cst_90 = arith.constant 1.000000e+00 : f32
    %561 = vector.broadcast %cst_90 : f32 to vector<2x32xf32>
    %562 = arith.addf %561, %560 : vector<2x32xf32>
    %563 = arith.divf %561, %562 : vector<2x32xf32>
    %564 = vector.extract_strided_slice %557 {offsets = [0, 32], sizes = [2, 32], strides = [1, 1]} : vector<2x128xf32> to vector<2x32xf32>
    %565 = arith.negf %564 : vector<2x32xf32>
    %566 = math.exp %565 : vector<2x32xf32>
    %cst_91 = arith.constant 1.000000e+00 : f32
    %567 = vector.broadcast %cst_91 : f32 to vector<2x32xf32>
    %568 = arith.addf %567, %566 : vector<2x32xf32>
    %569 = arith.divf %567, %568 : vector<2x32xf32>
    %570 = vector.extract_strided_slice %557 {offsets = [0, 64], sizes = [2, 32], strides = [1, 1]} : vector<2x128xf32> to vector<2x32xf32>
    %571 = math.tanh %570 : vector<2x32xf32>
    %572 = vector.extract_strided_slice %557 {offsets = [0, 96], sizes = [2, 32], strides = [1, 1]} : vector<2x128xf32> to vector<2x32xf32>
    %573 = arith.negf %572 : vector<2x32xf32>
    %574 = math.exp %573 : vector<2x32xf32>
    %cst_92 = arith.constant 1.000000e+00 : f32
    %575 = vector.broadcast %cst_92 : f32 to vector<2x32xf32>
    %576 = arith.addf %575, %574 : vector<2x32xf32>
    %577 = arith.divf %575, %576 : vector<2x32xf32>
    %578 = arith.mulf %569, %548 : vector<2x32xf32>
    %579 = arith.mulf %563, %571 : vector<2x32xf32>
    %580 = arith.addf %578, %579 : vector<2x32xf32>
    %581 = math.tanh %580 : vector<2x32xf32>
    %582 = arith.mulf %577, %581 : vector<2x32xf32>
    %c28 = arith.constant 28 : index
    %c0_93 = arith.constant 0 : index
    %583 = vector.load %arg2[%c28, %c0_93] : memref<96x64xf32, #tpu.memory_space<vmem>>, vector<2x32xf32>
    %584 = arith.subf %580, %548 : vector<2x32xf32>
    %585 = arith.mulf %583, %584 : vector<2x32xf32>
    %586 = arith.addf %548, %585 : vector<2x32xf32>
    %587 = arith.subf %582, %551 : vector<2x32xf32>
    %588 = arith.mulf %583, %587 : vector<2x32xf32>
    %589 = arith.addf %551, %588 : vector<2x32xf32>
    %590 = arith.mulf %583, %582 : vector<2x32xf32>
    %591 = arith.addf %553, %590 : vector<2x32xf32>
    %592 = vector.extract_strided_slice %12 {offsets = [30, 0], sizes = [2, 128], strides = [1, 1]} : vector<32x128xf32> to vector<2x128xf32>
    %593 = arith.truncf %589 : vector<2x32xf32> to vector<2x32xbf16>
    %cst_94 = arith.constant dense<0.000000e+00> : vector<2x128xf32>
    %594 = tpu.matmul %593, %16, %cst_94 {dimension_numbers = #tpu.dot_dimension_numbers<[1], [0], [0], [1], [0, 0, 1, 1], [], []>} : vector<2x32xbf16>, vector<32x128xbf16>, vector<2x128xf32> -> vector<2x128xf32>
    %595 = arith.addf %592, %594 : vector<2x128xf32>
    %596 = vector.extract_strided_slice %595 {offsets = [0, 0], sizes = [2, 32], strides = [1, 1]} : vector<2x128xf32> to vector<2x32xf32>
    %597 = arith.negf %596 : vector<2x32xf32>
    %598 = math.exp %597 : vector<2x32xf32>
    %cst_95 = arith.constant 1.000000e+00 : f32
    %599 = vector.broadcast %cst_95 : f32 to vector<2x32xf32>
    %600 = arith.addf %599, %598 : vector<2x32xf32>
    %601 = arith.divf %599, %600 : vector<2x32xf32>
    %602 = vector.extract_strided_slice %595 {offsets = [0, 32], sizes = [2, 32], strides = [1, 1]} : vector<2x128xf32> to vector<2x32xf32>
    %603 = arith.negf %602 : vector<2x32xf32>
    %604 = math.exp %603 : vector<2x32xf32>
    %cst_96 = arith.constant 1.000000e+00 : f32
    %605 = vector.broadcast %cst_96 : f32 to vector<2x32xf32>
    %606 = arith.addf %605, %604 : vector<2x32xf32>
    %607 = arith.divf %605, %606 : vector<2x32xf32>
    %608 = vector.extract_strided_slice %595 {offsets = [0, 64], sizes = [2, 32], strides = [1, 1]} : vector<2x128xf32> to vector<2x32xf32>
    %609 = math.tanh %608 : vector<2x32xf32>
    %610 = vector.extract_strided_slice %595 {offsets = [0, 96], sizes = [2, 32], strides = [1, 1]} : vector<2x128xf32> to vector<2x32xf32>
    %611 = arith.negf %610 : vector<2x32xf32>
    %612 = math.exp %611 : vector<2x32xf32>
    %cst_97 = arith.constant 1.000000e+00 : f32
    %613 = vector.broadcast %cst_97 : f32 to vector<2x32xf32>
    %614 = arith.addf %613, %612 : vector<2x32xf32>
    %615 = arith.divf %613, %614 : vector<2x32xf32>
    %616 = arith.mulf %607, %586 : vector<2x32xf32>
    %617 = arith.mulf %601, %609 : vector<2x32xf32>
    %618 = arith.addf %616, %617 : vector<2x32xf32>
    %619 = math.tanh %618 : vector<2x32xf32>
    %620 = arith.mulf %615, %619 : vector<2x32xf32>
    %c30 = arith.constant 30 : index
    %c0_98 = arith.constant 0 : index
    %621 = vector.load %arg2[%c30, %c0_98] : memref<96x64xf32, #tpu.memory_space<vmem>>, vector<2x32xf32>
    %622 = arith.mulf %621, %620 : vector<2x32xf32>
    %623 = arith.addf %591, %622 : vector<2x32xf32>
    %cst_99 = arith.constant 0.000000e+00 : f32
    %624 = vector.broadcast %cst_99 : f32 to vector<2x32xf32>
    %cst_100 = arith.constant 0.000000e+00 : f32
    %625 = vector.broadcast %cst_100 : f32 to vector<2x32xf32>
    %cst_101 = arith.constant 0.000000e+00 : f32
    %626 = vector.broadcast %cst_101 : f32 to vector<2x32xf32>
    %627 = vector.extract_strided_slice %13 {offsets = [0, 0], sizes = [2, 128], strides = [1, 1]} : vector<16x128xf32> to vector<2x128xf32>
    %628 = arith.truncf %624 : vector<2x32xf32> to vector<2x32xbf16>
    %cst_102 = arith.constant dense<0.000000e+00> : vector<2x128xf32>
    %629 = tpu.matmul %628, %17, %cst_102 {dimension_numbers = #tpu.dot_dimension_numbers<[1], [0], [0], [1], [0, 0, 1, 1], [], []>} : vector<2x32xbf16>, vector<32x128xbf16>, vector<2x128xf32> -> vector<2x128xf32>
    %630 = arith.addf %627, %629 : vector<2x128xf32>
    %631 = vector.extract_strided_slice %630 {offsets = [0, 0], sizes = [2, 32], strides = [1, 1]} : vector<2x128xf32> to vector<2x32xf32>
    %632 = arith.negf %631 : vector<2x32xf32>
    %633 = math.exp %632 : vector<2x32xf32>
    %cst_103 = arith.constant 1.000000e+00 : f32
    %634 = vector.broadcast %cst_103 : f32 to vector<2x32xf32>
    %635 = arith.addf %634, %633 : vector<2x32xf32>
    %636 = arith.divf %634, %635 : vector<2x32xf32>
    %637 = vector.extract_strided_slice %630 {offsets = [0, 32], sizes = [2, 32], strides = [1, 1]} : vector<2x128xf32> to vector<2x32xf32>
    %638 = arith.negf %637 : vector<2x32xf32>
    %639 = math.exp %638 : vector<2x32xf32>
    %cst_104 = arith.constant 1.000000e+00 : f32
    %640 = vector.broadcast %cst_104 : f32 to vector<2x32xf32>
    %641 = arith.addf %640, %639 : vector<2x32xf32>
    %642 = arith.divf %640, %641 : vector<2x32xf32>
    %643 = vector.extract_strided_slice %630 {offsets = [0, 64], sizes = [2, 32], strides = [1, 1]} : vector<2x128xf32> to vector<2x32xf32>
    %644 = math.tanh %643 : vector<2x32xf32>
    %645 = vector.extract_strided_slice %630 {offsets = [0, 96], sizes = [2, 32], strides = [1, 1]} : vector<2x128xf32> to vector<2x32xf32>
    %646 = arith.negf %645 : vector<2x32xf32>
    %647 = math.exp %646 : vector<2x32xf32>
    %cst_105 = arith.constant 1.000000e+00 : f32
    %648 = vector.broadcast %cst_105 : f32 to vector<2x32xf32>
    %649 = arith.addf %648, %647 : vector<2x32xf32>
    %650 = arith.divf %648, %649 : vector<2x32xf32>
    %651 = arith.mulf %642, %625 : vector<2x32xf32>
    %652 = arith.mulf %636, %644 : vector<2x32xf32>
    %653 = arith.addf %651, %652 : vector<2x32xf32>
    %654 = math.tanh %653 : vector<2x32xf32>
    %655 = arith.mulf %650, %654 : vector<2x32xf32>
    %c32_106 = arith.constant 32 : index
    %c0_107 = arith.constant 0 : index
    %656 = vector.load %arg2[%c32_106, %c0_107] : memref<96x64xf32, #tpu.memory_space<vmem>>, vector<2x32xf32>
    %657 = arith.subf %653, %625 : vector<2x32xf32>
    %658 = arith.mulf %656, %657 : vector<2x32xf32>
    %659 = arith.addf %625, %658 : vector<2x32xf32>
    %660 = arith.subf %655, %624 : vector<2x32xf32>
    %661 = arith.mulf %656, %660 : vector<2x32xf32>
    %662 = arith.addf %624, %661 : vector<2x32xf32>
    %663 = arith.mulf %656, %655 : vector<2x32xf32>
    %664 = arith.addf %626, %663 : vector<2x32xf32>
    %665 = vector.extract_strided_slice %13 {offsets = [2, 0], sizes = [2, 128], strides = [1, 1]} : vector<16x128xf32> to vector<2x128xf32>
    %666 = arith.truncf %662 : vector<2x32xf32> to vector<2x32xbf16>
    %cst_108 = arith.constant dense<0.000000e+00> : vector<2x128xf32>
    %667 = tpu.matmul %666, %17, %cst_108 {dimension_numbers = #tpu.dot_dimension_numbers<[1], [0], [0], [1], [0, 0, 1, 1], [], []>} : vector<2x32xbf16>, vector<32x128xbf16>, vector<2x128xf32> -> vector<2x128xf32>
    %668 = arith.addf %665, %667 : vector<2x128xf32>
    %669 = vector.extract_strided_slice %668 {offsets = [0, 0], sizes = [2, 32], strides = [1, 1]} : vector<2x128xf32> to vector<2x32xf32>
    %670 = arith.negf %669 : vector<2x32xf32>
    %671 = math.exp %670 : vector<2x32xf32>
    %cst_109 = arith.constant 1.000000e+00 : f32
    %672 = vector.broadcast %cst_109 : f32 to vector<2x32xf32>
    %673 = arith.addf %672, %671 : vector<2x32xf32>
    %674 = arith.divf %672, %673 : vector<2x32xf32>
    %675 = vector.extract_strided_slice %668 {offsets = [0, 32], sizes = [2, 32], strides = [1, 1]} : vector<2x128xf32> to vector<2x32xf32>
    %676 = arith.negf %675 : vector<2x32xf32>
    %677 = math.exp %676 : vector<2x32xf32>
    %cst_110 = arith.constant 1.000000e+00 : f32
    %678 = vector.broadcast %cst_110 : f32 to vector<2x32xf32>
    %679 = arith.addf %678, %677 : vector<2x32xf32>
    %680 = arith.divf %678, %679 : vector<2x32xf32>
    %681 = vector.extract_strided_slice %668 {offsets = [0, 64], sizes = [2, 32], strides = [1, 1]} : vector<2x128xf32> to vector<2x32xf32>
    %682 = math.tanh %681 : vector<2x32xf32>
    %683 = vector.extract_strided_slice %668 {offsets = [0, 96], sizes = [2, 32], strides = [1, 1]} : vector<2x128xf32> to vector<2x32xf32>
    %684 = arith.negf %683 : vector<2x32xf32>
    %685 = math.exp %684 : vector<2x32xf32>
    %cst_111 = arith.constant 1.000000e+00 : f32
    %686 = vector.broadcast %cst_111 : f32 to vector<2x32xf32>
    %687 = arith.addf %686, %685 : vector<2x32xf32>
    %688 = arith.divf %686, %687 : vector<2x32xf32>
    %689 = arith.mulf %680, %659 : vector<2x32xf32>
    %690 = arith.mulf %674, %682 : vector<2x32xf32>
    %691 = arith.addf %689, %690 : vector<2x32xf32>
    %692 = math.tanh %691 : vector<2x32xf32>
    %693 = arith.mulf %688, %692 : vector<2x32xf32>
    %c34 = arith.constant 34 : index
    %c0_112 = arith.constant 0 : index
    %694 = vector.load %arg2[%c34, %c0_112] : memref<96x64xf32, #tpu.memory_space<vmem>>, vector<2x32xf32>
    %695 = arith.subf %691, %659 : vector<2x32xf32>
    %696 = arith.mulf %694, %695 : vector<2x32xf32>
    %697 = arith.addf %659, %696 : vector<2x32xf32>
    %698 = arith.subf %693, %662 : vector<2x32xf32>
    %699 = arith.mulf %694, %698 : vector<2x32xf32>
    %700 = arith.addf %662, %699 : vector<2x32xf32>
    %701 = arith.mulf %694, %693 : vector<2x32xf32>
    %702 = arith.addf %664, %701 : vector<2x32xf32>
    %703 = vector.extract_strided_slice %13 {offsets = [4, 0], sizes = [2, 128], strides = [1, 1]} : vector<16x128xf32> to vector<2x128xf32>
    %704 = arith.truncf %700 : vector<2x32xf32> to vector<2x32xbf16>
    %cst_113 = arith.constant dense<0.000000e+00> : vector<2x128xf32>
    %705 = tpu.matmul %704, %17, %cst_113 {dimension_numbers = #tpu.dot_dimension_numbers<[1], [0], [0], [1], [0, 0, 1, 1], [], []>} : vector<2x32xbf16>, vector<32x128xbf16>, vector<2x128xf32> -> vector<2x128xf32>
    %706 = arith.addf %703, %705 : vector<2x128xf32>
    %707 = vector.extract_strided_slice %706 {offsets = [0, 0], sizes = [2, 32], strides = [1, 1]} : vector<2x128xf32> to vector<2x32xf32>
    %708 = arith.negf %707 : vector<2x32xf32>
    %709 = math.exp %708 : vector<2x32xf32>
    %cst_114 = arith.constant 1.000000e+00 : f32
    %710 = vector.broadcast %cst_114 : f32 to vector<2x32xf32>
    %711 = arith.addf %710, %709 : vector<2x32xf32>
    %712 = arith.divf %710, %711 : vector<2x32xf32>
    %713 = vector.extract_strided_slice %706 {offsets = [0, 32], sizes = [2, 32], strides = [1, 1]} : vector<2x128xf32> to vector<2x32xf32>
    %714 = arith.negf %713 : vector<2x32xf32>
    %715 = math.exp %714 : vector<2x32xf32>
    %cst_115 = arith.constant 1.000000e+00 : f32
    %716 = vector.broadcast %cst_115 : f32 to vector<2x32xf32>
    %717 = arith.addf %716, %715 : vector<2x32xf32>
    %718 = arith.divf %716, %717 : vector<2x32xf32>
    %719 = vector.extract_strided_slice %706 {offsets = [0, 64], sizes = [2, 32], strides = [1, 1]} : vector<2x128xf32> to vector<2x32xf32>
    %720 = math.tanh %719 : vector<2x32xf32>
    %721 = vector.extract_strided_slice %706 {offsets = [0, 96], sizes = [2, 32], strides = [1, 1]} : vector<2x128xf32> to vector<2x32xf32>
    %722 = arith.negf %721 : vector<2x32xf32>
    %723 = math.exp %722 : vector<2x32xf32>
    %cst_116 = arith.constant 1.000000e+00 : f32
    %724 = vector.broadcast %cst_116 : f32 to vector<2x32xf32>
    %725 = arith.addf %724, %723 : vector<2x32xf32>
    %726 = arith.divf %724, %725 : vector<2x32xf32>
    %727 = arith.mulf %718, %697 : vector<2x32xf32>
    %728 = arith.mulf %712, %720 : vector<2x32xf32>
    %729 = arith.addf %727, %728 : vector<2x32xf32>
    %730 = math.tanh %729 : vector<2x32xf32>
    %731 = arith.mulf %726, %730 : vector<2x32xf32>
    %c36 = arith.constant 36 : index
    %c0_117 = arith.constant 0 : index
    %732 = vector.load %arg2[%c36, %c0_117] : memref<96x64xf32, #tpu.memory_space<vmem>>, vector<2x32xf32>
    %733 = arith.subf %729, %697 : vector<2x32xf32>
    %734 = arith.mulf %732, %733 : vector<2x32xf32>
    %735 = arith.addf %697, %734 : vector<2x32xf32>
    %736 = arith.subf %731, %700 : vector<2x32xf32>
    %737 = arith.mulf %732, %736 : vector<2x32xf32>
    %738 = arith.addf %700, %737 : vector<2x32xf32>
    %739 = arith.mulf %732, %731 : vector<2x32xf32>
    %740 = arith.addf %702, %739 : vector<2x32xf32>
    %741 = vector.extract_strided_slice %13 {offsets = [6, 0], sizes = [2, 128], strides = [1, 1]} : vector<16x128xf32> to vector<2x128xf32>
    %742 = arith.truncf %738 : vector<2x32xf32> to vector<2x32xbf16>
    %cst_118 = arith.constant dense<0.000000e+00> : vector<2x128xf32>
    %743 = tpu.matmul %742, %17, %cst_118 {dimension_numbers = #tpu.dot_dimension_numbers<[1], [0], [0], [1], [0, 0, 1, 1], [], []>} : vector<2x32xbf16>, vector<32x128xbf16>, vector<2x128xf32> -> vector<2x128xf32>
    %744 = arith.addf %741, %743 : vector<2x128xf32>
    %745 = vector.extract_strided_slice %744 {offsets = [0, 0], sizes = [2, 32], strides = [1, 1]} : vector<2x128xf32> to vector<2x32xf32>
    %746 = arith.negf %745 : vector<2x32xf32>
    %747 = math.exp %746 : vector<2x32xf32>
    %cst_119 = arith.constant 1.000000e+00 : f32
    %748 = vector.broadcast %cst_119 : f32 to vector<2x32xf32>
    %749 = arith.addf %748, %747 : vector<2x32xf32>
    %750 = arith.divf %748, %749 : vector<2x32xf32>
    %751 = vector.extract_strided_slice %744 {offsets = [0, 32], sizes = [2, 32], strides = [1, 1]} : vector<2x128xf32> to vector<2x32xf32>
    %752 = arith.negf %751 : vector<2x32xf32>
    %753 = math.exp %752 : vector<2x32xf32>
    %cst_120 = arith.constant 1.000000e+00 : f32
    %754 = vector.broadcast %cst_120 : f32 to vector<2x32xf32>
    %755 = arith.addf %754, %753 : vector<2x32xf32>
    %756 = arith.divf %754, %755 : vector<2x32xf32>
    %757 = vector.extract_strided_slice %744 {offsets = [0, 64], sizes = [2, 32], strides = [1, 1]} : vector<2x128xf32> to vector<2x32xf32>
    %758 = math.tanh %757 : vector<2x32xf32>
    %759 = vector.extract_strided_slice %744 {offsets = [0, 96], sizes = [2, 32], strides = [1, 1]} : vector<2x128xf32> to vector<2x32xf32>
    %760 = arith.negf %759 : vector<2x32xf32>
    %761 = math.exp %760 : vector<2x32xf32>
    %cst_121 = arith.constant 1.000000e+00 : f32
    %762 = vector.broadcast %cst_121 : f32 to vector<2x32xf32>
    %763 = arith.addf %762, %761 : vector<2x32xf32>
    %764 = arith.divf %762, %763 : vector<2x32xf32>
    %765 = arith.mulf %756, %735 : vector<2x32xf32>
    %766 = arith.mulf %750, %758 : vector<2x32xf32>
    %767 = arith.addf %765, %766 : vector<2x32xf32>
    %768 = math.tanh %767 : vector<2x32xf32>
    %769 = arith.mulf %764, %768 : vector<2x32xf32>
    %c38 = arith.constant 38 : index
    %c0_122 = arith.constant 0 : index
    %770 = vector.load %arg2[%c38, %c0_122] : memref<96x64xf32, #tpu.memory_space<vmem>>, vector<2x32xf32>
    %771 = arith.subf %767, %735 : vector<2x32xf32>
    %772 = arith.mulf %770, %771 : vector<2x32xf32>
    %773 = arith.addf %735, %772 : vector<2x32xf32>
    %774 = arith.subf %769, %738 : vector<2x32xf32>
    %775 = arith.mulf %770, %774 : vector<2x32xf32>
    %776 = arith.addf %738, %775 : vector<2x32xf32>
    %777 = arith.mulf %770, %769 : vector<2x32xf32>
    %778 = arith.addf %740, %777 : vector<2x32xf32>
    %779 = vector.extract_strided_slice %13 {offsets = [8, 0], sizes = [2, 128], strides = [1, 1]} : vector<16x128xf32> to vector<2x128xf32>
    %780 = arith.truncf %776 : vector<2x32xf32> to vector<2x32xbf16>
    %cst_123 = arith.constant dense<0.000000e+00> : vector<2x128xf32>
    %781 = tpu.matmul %780, %17, %cst_123 {dimension_numbers = #tpu.dot_dimension_numbers<[1], [0], [0], [1], [0, 0, 1, 1], [], []>} : vector<2x32xbf16>, vector<32x128xbf16>, vector<2x128xf32> -> vector<2x128xf32>
    %782 = arith.addf %779, %781 : vector<2x128xf32>
    %783 = vector.extract_strided_slice %782 {offsets = [0, 0], sizes = [2, 32], strides = [1, 1]} : vector<2x128xf32> to vector<2x32xf32>
    %784 = arith.negf %783 : vector<2x32xf32>
    %785 = math.exp %784 : vector<2x32xf32>
    %cst_124 = arith.constant 1.000000e+00 : f32
    %786 = vector.broadcast %cst_124 : f32 to vector<2x32xf32>
    %787 = arith.addf %786, %785 : vector<2x32xf32>
    %788 = arith.divf %786, %787 : vector<2x32xf32>
    %789 = vector.extract_strided_slice %782 {offsets = [0, 32], sizes = [2, 32], strides = [1, 1]} : vector<2x128xf32> to vector<2x32xf32>
    %790 = arith.negf %789 : vector<2x32xf32>
    %791 = math.exp %790 : vector<2x32xf32>
    %cst_125 = arith.constant 1.000000e+00 : f32
    %792 = vector.broadcast %cst_125 : f32 to vector<2x32xf32>
    %793 = arith.addf %792, %791 : vector<2x32xf32>
    %794 = arith.divf %792, %793 : vector<2x32xf32>
    %795 = vector.extract_strided_slice %782 {offsets = [0, 64], sizes = [2, 32], strides = [1, 1]} : vector<2x128xf32> to vector<2x32xf32>
    %796 = math.tanh %795 : vector<2x32xf32>
    %797 = vector.extract_strided_slice %782 {offsets = [0, 96], sizes = [2, 32], strides = [1, 1]} : vector<2x128xf32> to vector<2x32xf32>
    %798 = arith.negf %797 : vector<2x32xf32>
    %799 = math.exp %798 : vector<2x32xf32>
    %cst_126 = arith.constant 1.000000e+00 : f32
    %800 = vector.broadcast %cst_126 : f32 to vector<2x32xf32>
    %801 = arith.addf %800, %799 : vector<2x32xf32>
    %802 = arith.divf %800, %801 : vector<2x32xf32>
    %803 = arith.mulf %794, %773 : vector<2x32xf32>
    %804 = arith.mulf %788, %796 : vector<2x32xf32>
    %805 = arith.addf %803, %804 : vector<2x32xf32>
    %806 = math.tanh %805 : vector<2x32xf32>
    %807 = arith.mulf %802, %806 : vector<2x32xf32>
    %c40 = arith.constant 40 : index
    %c0_127 = arith.constant 0 : index
    %808 = vector.load %arg2[%c40, %c0_127] : memref<96x64xf32, #tpu.memory_space<vmem>>, vector<2x32xf32>
    %809 = arith.subf %805, %773 : vector<2x32xf32>
    %810 = arith.mulf %808, %809 : vector<2x32xf32>
    %811 = arith.addf %773, %810 : vector<2x32xf32>
    %812 = arith.subf %807, %776 : vector<2x32xf32>
    %813 = arith.mulf %808, %812 : vector<2x32xf32>
    %814 = arith.addf %776, %813 : vector<2x32xf32>
    %815 = arith.mulf %808, %807 : vector<2x32xf32>
    %816 = arith.addf %778, %815 : vector<2x32xf32>
    %817 = vector.extract_strided_slice %13 {offsets = [10, 0], sizes = [2, 128], strides = [1, 1]} : vector<16x128xf32> to vector<2x128xf32>
    %818 = arith.truncf %814 : vector<2x32xf32> to vector<2x32xbf16>
    %cst_128 = arith.constant dense<0.000000e+00> : vector<2x128xf32>
    %819 = tpu.matmul %818, %17, %cst_128 {dimension_numbers = #tpu.dot_dimension_numbers<[1], [0], [0], [1], [0, 0, 1, 1], [], []>} : vector<2x32xbf16>, vector<32x128xbf16>, vector<2x128xf32> -> vector<2x128xf32>
    %820 = arith.addf %817, %819 : vector<2x128xf32>
    %821 = vector.extract_strided_slice %820 {offsets = [0, 0], sizes = [2, 32], strides = [1, 1]} : vector<2x128xf32> to vector<2x32xf32>
    %822 = arith.negf %821 : vector<2x32xf32>
    %823 = math.exp %822 : vector<2x32xf32>
    %cst_129 = arith.constant 1.000000e+00 : f32
    %824 = vector.broadcast %cst_129 : f32 to vector<2x32xf32>
    %825 = arith.addf %824, %823 : vector<2x32xf32>
    %826 = arith.divf %824, %825 : vector<2x32xf32>
    %827 = vector.extract_strided_slice %820 {offsets = [0, 32], sizes = [2, 32], strides = [1, 1]} : vector<2x128xf32> to vector<2x32xf32>
    %828 = arith.negf %827 : vector<2x32xf32>
    %829 = math.exp %828 : vector<2x32xf32>
    %cst_130 = arith.constant 1.000000e+00 : f32
    %830 = vector.broadcast %cst_130 : f32 to vector<2x32xf32>
    %831 = arith.addf %830, %829 : vector<2x32xf32>
    %832 = arith.divf %830, %831 : vector<2x32xf32>
    %833 = vector.extract_strided_slice %820 {offsets = [0, 64], sizes = [2, 32], strides = [1, 1]} : vector<2x128xf32> to vector<2x32xf32>
    %834 = math.tanh %833 : vector<2x32xf32>
    %835 = vector.extract_strided_slice %820 {offsets = [0, 96], sizes = [2, 32], strides = [1, 1]} : vector<2x128xf32> to vector<2x32xf32>
    %836 = arith.negf %835 : vector<2x32xf32>
    %837 = math.exp %836 : vector<2x32xf32>
    %cst_131 = arith.constant 1.000000e+00 : f32
    %838 = vector.broadcast %cst_131 : f32 to vector<2x32xf32>
    %839 = arith.addf %838, %837 : vector<2x32xf32>
    %840 = arith.divf %838, %839 : vector<2x32xf32>
    %841 = arith.mulf %832, %811 : vector<2x32xf32>
    %842 = arith.mulf %826, %834 : vector<2x32xf32>
    %843 = arith.addf %841, %842 : vector<2x32xf32>
    %844 = math.tanh %843 : vector<2x32xf32>
    %845 = arith.mulf %840, %844 : vector<2x32xf32>
    %c42 = arith.constant 42 : index
    %c0_132 = arith.constant 0 : index
    %846 = vector.load %arg2[%c42, %c0_132] : memref<96x64xf32, #tpu.memory_space<vmem>>, vector<2x32xf32>
    %847 = arith.subf %843, %811 : vector<2x32xf32>
    %848 = arith.mulf %846, %847 : vector<2x32xf32>
    %849 = arith.addf %811, %848 : vector<2x32xf32>
    %850 = arith.subf %845, %814 : vector<2x32xf32>
    %851 = arith.mulf %846, %850 : vector<2x32xf32>
    %852 = arith.addf %814, %851 : vector<2x32xf32>
    %853 = arith.mulf %846, %845 : vector<2x32xf32>
    %854 = arith.addf %816, %853 : vector<2x32xf32>
    %855 = vector.extract_strided_slice %13 {offsets = [12, 0], sizes = [2, 128], strides = [1, 1]} : vector<16x128xf32> to vector<2x128xf32>
    %856 = arith.truncf %852 : vector<2x32xf32> to vector<2x32xbf16>
    %cst_133 = arith.constant dense<0.000000e+00> : vector<2x128xf32>
    %857 = tpu.matmul %856, %17, %cst_133 {dimension_numbers = #tpu.dot_dimension_numbers<[1], [0], [0], [1], [0, 0, 1, 1], [], []>} : vector<2x32xbf16>, vector<32x128xbf16>, vector<2x128xf32> -> vector<2x128xf32>
    %858 = arith.addf %855, %857 : vector<2x128xf32>
    %859 = vector.extract_strided_slice %858 {offsets = [0, 0], sizes = [2, 32], strides = [1, 1]} : vector<2x128xf32> to vector<2x32xf32>
    %860 = arith.negf %859 : vector<2x32xf32>
    %861 = math.exp %860 : vector<2x32xf32>
    %cst_134 = arith.constant 1.000000e+00 : f32
    %862 = vector.broadcast %cst_134 : f32 to vector<2x32xf32>
    %863 = arith.addf %862, %861 : vector<2x32xf32>
    %864 = arith.divf %862, %863 : vector<2x32xf32>
    %865 = vector.extract_strided_slice %858 {offsets = [0, 32], sizes = [2, 32], strides = [1, 1]} : vector<2x128xf32> to vector<2x32xf32>
    %866 = arith.negf %865 : vector<2x32xf32>
    %867 = math.exp %866 : vector<2x32xf32>
    %cst_135 = arith.constant 1.000000e+00 : f32
    %868 = vector.broadcast %cst_135 : f32 to vector<2x32xf32>
    %869 = arith.addf %868, %867 : vector<2x32xf32>
    %870 = arith.divf %868, %869 : vector<2x32xf32>
    %871 = vector.extract_strided_slice %858 {offsets = [0, 64], sizes = [2, 32], strides = [1, 1]} : vector<2x128xf32> to vector<2x32xf32>
    %872 = math.tanh %871 : vector<2x32xf32>
    %873 = vector.extract_strided_slice %858 {offsets = [0, 96], sizes = [2, 32], strides = [1, 1]} : vector<2x128xf32> to vector<2x32xf32>
    %874 = arith.negf %873 : vector<2x32xf32>
    %875 = math.exp %874 : vector<2x32xf32>
    %cst_136 = arith.constant 1.000000e+00 : f32
    %876 = vector.broadcast %cst_136 : f32 to vector<2x32xf32>
    %877 = arith.addf %876, %875 : vector<2x32xf32>
    %878 = arith.divf %876, %877 : vector<2x32xf32>
    %879 = arith.mulf %870, %849 : vector<2x32xf32>
    %880 = arith.mulf %864, %872 : vector<2x32xf32>
    %881 = arith.addf %879, %880 : vector<2x32xf32>
    %882 = math.tanh %881 : vector<2x32xf32>
    %883 = arith.mulf %878, %882 : vector<2x32xf32>
    %c44 = arith.constant 44 : index
    %c0_137 = arith.constant 0 : index
    %884 = vector.load %arg2[%c44, %c0_137] : memref<96x64xf32, #tpu.memory_space<vmem>>, vector<2x32xf32>
    %885 = arith.subf %881, %849 : vector<2x32xf32>
    %886 = arith.mulf %884, %885 : vector<2x32xf32>
    %887 = arith.addf %849, %886 : vector<2x32xf32>
    %888 = arith.subf %883, %852 : vector<2x32xf32>
    %889 = arith.mulf %884, %888 : vector<2x32xf32>
    %890 = arith.addf %852, %889 : vector<2x32xf32>
    %891 = arith.mulf %884, %883 : vector<2x32xf32>
    %892 = arith.addf %854, %891 : vector<2x32xf32>
    %893 = vector.extract_strided_slice %13 {offsets = [14, 0], sizes = [2, 128], strides = [1, 1]} : vector<16x128xf32> to vector<2x128xf32>
    %894 = arith.truncf %890 : vector<2x32xf32> to vector<2x32xbf16>
    %cst_138 = arith.constant dense<0.000000e+00> : vector<2x128xf32>
    %895 = tpu.matmul %894, %17, %cst_138 {dimension_numbers = #tpu.dot_dimension_numbers<[1], [0], [0], [1], [0, 0, 1, 1], [], []>} : vector<2x32xbf16>, vector<32x128xbf16>, vector<2x128xf32> -> vector<2x128xf32>
    %896 = arith.addf %893, %895 : vector<2x128xf32>
    %897 = vector.extract_strided_slice %896 {offsets = [0, 0], sizes = [2, 32], strides = [1, 1]} : vector<2x128xf32> to vector<2x32xf32>
    %898 = arith.negf %897 : vector<2x32xf32>
    %899 = math.exp %898 : vector<2x32xf32>
    %cst_139 = arith.constant 1.000000e+00 : f32
    %900 = vector.broadcast %cst_139 : f32 to vector<2x32xf32>
    %901 = arith.addf %900, %899 : vector<2x32xf32>
    %902 = arith.divf %900, %901 : vector<2x32xf32>
    %903 = vector.extract_strided_slice %896 {offsets = [0, 32], sizes = [2, 32], strides = [1, 1]} : vector<2x128xf32> to vector<2x32xf32>
    %904 = arith.negf %903 : vector<2x32xf32>
    %905 = math.exp %904 : vector<2x32xf32>
    %cst_140 = arith.constant 1.000000e+00 : f32
    %906 = vector.broadcast %cst_140 : f32 to vector<2x32xf32>
    %907 = arith.addf %906, %905 : vector<2x32xf32>
    %908 = arith.divf %906, %907 : vector<2x32xf32>
    %909 = vector.extract_strided_slice %896 {offsets = [0, 64], sizes = [2, 32], strides = [1, 1]} : vector<2x128xf32> to vector<2x32xf32>
    %910 = math.tanh %909 : vector<2x32xf32>
    %911 = vector.extract_strided_slice %896 {offsets = [0, 96], sizes = [2, 32], strides = [1, 1]} : vector<2x128xf32> to vector<2x32xf32>
    %912 = arith.negf %911 : vector<2x32xf32>
    %913 = math.exp %912 : vector<2x32xf32>
    %cst_141 = arith.constant 1.000000e+00 : f32
    %914 = vector.broadcast %cst_141 : f32 to vector<2x32xf32>
    %915 = arith.addf %914, %913 : vector<2x32xf32>
    %916 = arith.divf %914, %915 : vector<2x32xf32>
    %917 = arith.mulf %908, %887 : vector<2x32xf32>
    %918 = arith.mulf %902, %910 : vector<2x32xf32>
    %919 = arith.addf %917, %918 : vector<2x32xf32>
    %920 = math.tanh %919 : vector<2x32xf32>
    %921 = arith.mulf %916, %920 : vector<2x32xf32>
    %c46 = arith.constant 46 : index
    %c0_142 = arith.constant 0 : index
    %922 = vector.load %arg2[%c46, %c0_142] : memref<96x64xf32, #tpu.memory_space<vmem>>, vector<2x32xf32>
    %923 = arith.mulf %922, %921 : vector<2x32xf32>
    %924 = arith.addf %892, %923 : vector<2x32xf32>
    %cst_143 = arith.constant 0.000000e+00 : f32
    %925 = vector.broadcast %cst_143 : f32 to vector<2x64xf32>
    %cst_144 = arith.constant 0.000000e+00 : f32
    %926 = vector.broadcast %cst_144 : f32 to vector<2x64xf32>
    %cst_145 = arith.constant 0.000000e+00 : f32
    %927 = vector.broadcast %cst_145 : f32 to vector<2x64xf32>
    %928 = vector.extract_strided_slice %14 {offsets = [0, 0], sizes = [2, 256], strides = [1, 1]} : vector<8x256xf32> to vector<2x256xf32>
    %929 = vector.extract_strided_slice %15 {offsets = [6, 0], sizes = [2, 256], strides = [1, 1]} : vector<8x256xf32> to vector<2x256xf32>
    %930 = arith.addf %928, %929 : vector<2x256xf32>
    %931 = arith.truncf %925 : vector<2x64xf32> to vector<2x64xbf16>
    %cst_146 = arith.constant dense<0.000000e+00> : vector<2x256xf32>
    %932 = tpu.matmul %931, %18, %cst_146 {dimension_numbers = #tpu.dot_dimension_numbers<[1], [0], [0], [1], [0, 0, 1, 1], [], []>} : vector<2x64xbf16>, vector<64x256xbf16>, vector<2x256xf32> -> vector<2x256xf32>
    %933 = arith.addf %930, %932 : vector<2x256xf32>
    %934 = vector.extract_strided_slice %933 {offsets = [0, 0], sizes = [2, 64], strides = [1, 1]} : vector<2x256xf32> to vector<2x64xf32>
    %935 = arith.negf %934 : vector<2x64xf32>
    %936 = math.exp %935 : vector<2x64xf32>
    %cst_147 = arith.constant 1.000000e+00 : f32
    %937 = vector.broadcast %cst_147 : f32 to vector<2x64xf32>
    %938 = arith.addf %937, %936 : vector<2x64xf32>
    %939 = arith.divf %937, %938 : vector<2x64xf32>
    %940 = vector.extract_strided_slice %933 {offsets = [0, 64], sizes = [2, 64], strides = [1, 1]} : vector<2x256xf32> to vector<2x64xf32>
    %941 = arith.negf %940 : vector<2x64xf32>
    %942 = math.exp %941 : vector<2x64xf32>
    %cst_148 = arith.constant 1.000000e+00 : f32
    %943 = vector.broadcast %cst_148 : f32 to vector<2x64xf32>
    %944 = arith.addf %943, %942 : vector<2x64xf32>
    %945 = arith.divf %943, %944 : vector<2x64xf32>
    %946 = vector.extract_strided_slice %933 {offsets = [0, 128], sizes = [2, 64], strides = [1, 1]} : vector<2x256xf32> to vector<2x64xf32>
    %947 = math.tanh %946 : vector<2x64xf32>
    %948 = vector.extract_strided_slice %933 {offsets = [0, 192], sizes = [2, 64], strides = [1, 1]} : vector<2x256xf32> to vector<2x64xf32>
    %949 = arith.negf %948 : vector<2x64xf32>
    %950 = math.exp %949 : vector<2x64xf32>
    %cst_149 = arith.constant 1.000000e+00 : f32
    %951 = vector.broadcast %cst_149 : f32 to vector<2x64xf32>
    %952 = arith.addf %951, %950 : vector<2x64xf32>
    %953 = arith.divf %951, %952 : vector<2x64xf32>
    %954 = arith.mulf %945, %926 : vector<2x64xf32>
    %955 = arith.mulf %939, %947 : vector<2x64xf32>
    %956 = arith.addf %954, %955 : vector<2x64xf32>
    %957 = math.tanh %956 : vector<2x64xf32>
    %958 = arith.mulf %953, %957 : vector<2x64xf32>
    %c48 = arith.constant 48 : index
    %c0_150 = arith.constant 0 : index
    %959 = vector.load %arg2[%c48, %c0_150] : memref<96x64xf32, #tpu.memory_space<vmem>>, vector<2x64xf32>
    %960 = arith.subf %956, %926 : vector<2x64xf32>
    %961 = arith.mulf %959, %960 : vector<2x64xf32>
    %962 = arith.addf %926, %961 : vector<2x64xf32>
    %963 = arith.subf %958, %925 : vector<2x64xf32>
    %964 = arith.mulf %959, %963 : vector<2x64xf32>
    %965 = arith.addf %925, %964 : vector<2x64xf32>
    %966 = arith.mulf %959, %958 : vector<2x64xf32>
    %967 = arith.addf %927, %966 : vector<2x64xf32>
    %968 = vector.extract_strided_slice %14 {offsets = [2, 0], sizes = [2, 256], strides = [1, 1]} : vector<8x256xf32> to vector<2x256xf32>
    %969 = vector.extract_strided_slice %15 {offsets = [4, 0], sizes = [2, 256], strides = [1, 1]} : vector<8x256xf32> to vector<2x256xf32>
    %970 = arith.addf %968, %969 : vector<2x256xf32>
    %971 = arith.truncf %965 : vector<2x64xf32> to vector<2x64xbf16>
    %cst_151 = arith.constant dense<0.000000e+00> : vector<2x256xf32>
    %972 = tpu.matmul %971, %18, %cst_151 {dimension_numbers = #tpu.dot_dimension_numbers<[1], [0], [0], [1], [0, 0, 1, 1], [], []>} : vector<2x64xbf16>, vector<64x256xbf16>, vector<2x256xf32> -> vector<2x256xf32>
    %973 = arith.addf %970, %972 : vector<2x256xf32>
    %974 = vector.extract_strided_slice %973 {offsets = [0, 0], sizes = [2, 64], strides = [1, 1]} : vector<2x256xf32> to vector<2x64xf32>
    %975 = arith.negf %974 : vector<2x64xf32>
    %976 = math.exp %975 : vector<2x64xf32>
    %cst_152 = arith.constant 1.000000e+00 : f32
    %977 = vector.broadcast %cst_152 : f32 to vector<2x64xf32>
    %978 = arith.addf %977, %976 : vector<2x64xf32>
    %979 = arith.divf %977, %978 : vector<2x64xf32>
    %980 = vector.extract_strided_slice %973 {offsets = [0, 64], sizes = [2, 64], strides = [1, 1]} : vector<2x256xf32> to vector<2x64xf32>
    %981 = arith.negf %980 : vector<2x64xf32>
    %982 = math.exp %981 : vector<2x64xf32>
    %cst_153 = arith.constant 1.000000e+00 : f32
    %983 = vector.broadcast %cst_153 : f32 to vector<2x64xf32>
    %984 = arith.addf %983, %982 : vector<2x64xf32>
    %985 = arith.divf %983, %984 : vector<2x64xf32>
    %986 = vector.extract_strided_slice %973 {offsets = [0, 128], sizes = [2, 64], strides = [1, 1]} : vector<2x256xf32> to vector<2x64xf32>
    %987 = math.tanh %986 : vector<2x64xf32>
    %988 = vector.extract_strided_slice %973 {offsets = [0, 192], sizes = [2, 64], strides = [1, 1]} : vector<2x256xf32> to vector<2x64xf32>
    %989 = arith.negf %988 : vector<2x64xf32>
    %990 = math.exp %989 : vector<2x64xf32>
    %cst_154 = arith.constant 1.000000e+00 : f32
    %991 = vector.broadcast %cst_154 : f32 to vector<2x64xf32>
    %992 = arith.addf %991, %990 : vector<2x64xf32>
    %993 = arith.divf %991, %992 : vector<2x64xf32>
    %994 = arith.mulf %985, %962 : vector<2x64xf32>
    %995 = arith.mulf %979, %987 : vector<2x64xf32>
    %996 = arith.addf %994, %995 : vector<2x64xf32>
    %997 = math.tanh %996 : vector<2x64xf32>
    %998 = arith.mulf %993, %997 : vector<2x64xf32>
    %c50 = arith.constant 50 : index
    %c0_155 = arith.constant 0 : index
    %999 = vector.load %arg2[%c50, %c0_155] : memref<96x64xf32, #tpu.memory_space<vmem>>, vector<2x64xf32>
    %1000 = arith.subf %996, %962 : vector<2x64xf32>
    %1001 = arith.mulf %999, %1000 : vector<2x64xf32>
    %1002 = arith.addf %962, %1001 : vector<2x64xf32>
    %1003 = arith.subf %998, %965 : vector<2x64xf32>
    %1004 = arith.mulf %999, %1003 : vector<2x64xf32>
    %1005 = arith.addf %965, %1004 : vector<2x64xf32>
    %1006 = arith.mulf %999, %998 : vector<2x64xf32>
    %1007 = arith.addf %967, %1006 : vector<2x64xf32>
    %1008 = vector.extract_strided_slice %14 {offsets = [4, 0], sizes = [2, 256], strides = [1, 1]} : vector<8x256xf32> to vector<2x256xf32>
    %1009 = vector.extract_strided_slice %15 {offsets = [2, 0], sizes = [2, 256], strides = [1, 1]} : vector<8x256xf32> to vector<2x256xf32>
    %1010 = arith.addf %1008, %1009 : vector<2x256xf32>
    %1011 = arith.truncf %1005 : vector<2x64xf32> to vector<2x64xbf16>
    %cst_156 = arith.constant dense<0.000000e+00> : vector<2x256xf32>
    %1012 = tpu.matmul %1011, %18, %cst_156 {dimension_numbers = #tpu.dot_dimension_numbers<[1], [0], [0], [1], [0, 0, 1, 1], [], []>} : vector<2x64xbf16>, vector<64x256xbf16>, vector<2x256xf32> -> vector<2x256xf32>
    %1013 = arith.addf %1010, %1012 : vector<2x256xf32>
    %1014 = vector.extract_strided_slice %1013 {offsets = [0, 0], sizes = [2, 64], strides = [1, 1]} : vector<2x256xf32> to vector<2x64xf32>
    %1015 = arith.negf %1014 : vector<2x64xf32>
    %1016 = math.exp %1015 : vector<2x64xf32>
    %cst_157 = arith.constant 1.000000e+00 : f32
    %1017 = vector.broadcast %cst_157 : f32 to vector<2x64xf32>
    %1018 = arith.addf %1017, %1016 : vector<2x64xf32>
    %1019 = arith.divf %1017, %1018 : vector<2x64xf32>
    %1020 = vector.extract_strided_slice %1013 {offsets = [0, 64], sizes = [2, 64], strides = [1, 1]} : vector<2x256xf32> to vector<2x64xf32>
    %1021 = arith.negf %1020 : vector<2x64xf32>
    %1022 = math.exp %1021 : vector<2x64xf32>
    %cst_158 = arith.constant 1.000000e+00 : f32
    %1023 = vector.broadcast %cst_158 : f32 to vector<2x64xf32>
    %1024 = arith.addf %1023, %1022 : vector<2x64xf32>
    %1025 = arith.divf %1023, %1024 : vector<2x64xf32>
    %1026 = vector.extract_strided_slice %1013 {offsets = [0, 128], sizes = [2, 64], strides = [1, 1]} : vector<2x256xf32> to vector<2x64xf32>
    %1027 = math.tanh %1026 : vector<2x64xf32>
    %1028 = vector.extract_strided_slice %1013 {offsets = [0, 192], sizes = [2, 64], strides = [1, 1]} : vector<2x256xf32> to vector<2x64xf32>
    %1029 = arith.negf %1028 : vector<2x64xf32>
    %1030 = math.exp %1029 : vector<2x64xf32>
    %cst_159 = arith.constant 1.000000e+00 : f32
    %1031 = vector.broadcast %cst_159 : f32 to vector<2x64xf32>
    %1032 = arith.addf %1031, %1030 : vector<2x64xf32>
    %1033 = arith.divf %1031, %1032 : vector<2x64xf32>
    %1034 = arith.mulf %1025, %1002 : vector<2x64xf32>
    %1035 = arith.mulf %1019, %1027 : vector<2x64xf32>
    %1036 = arith.addf %1034, %1035 : vector<2x64xf32>
    %1037 = math.tanh %1036 : vector<2x64xf32>
    %1038 = arith.mulf %1033, %1037 : vector<2x64xf32>
    %c52 = arith.constant 52 : index
    %c0_160 = arith.constant 0 : index
    %1039 = vector.load %arg2[%c52, %c0_160] : memref<96x64xf32, #tpu.memory_space<vmem>>, vector<2x64xf32>
    %1040 = arith.subf %1036, %1002 : vector<2x64xf32>
    %1041 = arith.mulf %1039, %1040 : vector<2x64xf32>
    %1042 = arith.addf %1002, %1041 : vector<2x64xf32>
    %1043 = arith.subf %1038, %1005 : vector<2x64xf32>
    %1044 = arith.mulf %1039, %1043 : vector<2x64xf32>
    %1045 = arith.addf %1005, %1044 : vector<2x64xf32>
    %1046 = arith.mulf %1039, %1038 : vector<2x64xf32>
    %1047 = arith.addf %1007, %1046 : vector<2x64xf32>
    %1048 = vector.extract_strided_slice %14 {offsets = [6, 0], sizes = [2, 256], strides = [1, 1]} : vector<8x256xf32> to vector<2x256xf32>
    %1049 = vector.extract_strided_slice %15 {offsets = [0, 0], sizes = [2, 256], strides = [1, 1]} : vector<8x256xf32> to vector<2x256xf32>
    %1050 = arith.addf %1048, %1049 : vector<2x256xf32>
    %1051 = arith.truncf %1045 : vector<2x64xf32> to vector<2x64xbf16>
    %cst_161 = arith.constant dense<0.000000e+00> : vector<2x256xf32>
    %1052 = tpu.matmul %1051, %18, %cst_161 {dimension_numbers = #tpu.dot_dimension_numbers<[1], [0], [0], [1], [0, 0, 1, 1], [], []>} : vector<2x64xbf16>, vector<64x256xbf16>, vector<2x256xf32> -> vector<2x256xf32>
    %1053 = arith.addf %1050, %1052 : vector<2x256xf32>
    %1054 = vector.extract_strided_slice %1053 {offsets = [0, 0], sizes = [2, 64], strides = [1, 1]} : vector<2x256xf32> to vector<2x64xf32>
    %1055 = arith.negf %1054 : vector<2x64xf32>
    %1056 = math.exp %1055 : vector<2x64xf32>
    %cst_162 = arith.constant 1.000000e+00 : f32
    %1057 = vector.broadcast %cst_162 : f32 to vector<2x64xf32>
    %1058 = arith.addf %1057, %1056 : vector<2x64xf32>
    %1059 = arith.divf %1057, %1058 : vector<2x64xf32>
    %1060 = vector.extract_strided_slice %1053 {offsets = [0, 64], sizes = [2, 64], strides = [1, 1]} : vector<2x256xf32> to vector<2x64xf32>
    %1061 = arith.negf %1060 : vector<2x64xf32>
    %1062 = math.exp %1061 : vector<2x64xf32>
    %cst_163 = arith.constant 1.000000e+00 : f32
    %1063 = vector.broadcast %cst_163 : f32 to vector<2x64xf32>
    %1064 = arith.addf %1063, %1062 : vector<2x64xf32>
    %1065 = arith.divf %1063, %1064 : vector<2x64xf32>
    %1066 = vector.extract_strided_slice %1053 {offsets = [0, 128], sizes = [2, 64], strides = [1, 1]} : vector<2x256xf32> to vector<2x64xf32>
    %1067 = math.tanh %1066 : vector<2x64xf32>
    %1068 = vector.extract_strided_slice %1053 {offsets = [0, 192], sizes = [2, 64], strides = [1, 1]} : vector<2x256xf32> to vector<2x64xf32>
    %1069 = arith.negf %1068 : vector<2x64xf32>
    %1070 = math.exp %1069 : vector<2x64xf32>
    %cst_164 = arith.constant 1.000000e+00 : f32
    %1071 = vector.broadcast %cst_164 : f32 to vector<2x64xf32>
    %1072 = arith.addf %1071, %1070 : vector<2x64xf32>
    %1073 = arith.divf %1071, %1072 : vector<2x64xf32>
    %1074 = arith.mulf %1065, %1042 : vector<2x64xf32>
    %1075 = arith.mulf %1059, %1067 : vector<2x64xf32>
    %1076 = arith.addf %1074, %1075 : vector<2x64xf32>
    %1077 = math.tanh %1076 : vector<2x64xf32>
    %1078 = arith.mulf %1073, %1077 : vector<2x64xf32>
    %c54 = arith.constant 54 : index
    %c0_165 = arith.constant 0 : index
    %1079 = vector.load %arg2[%c54, %c0_165] : memref<96x64xf32, #tpu.memory_space<vmem>>, vector<2x64xf32>
    %1080 = arith.mulf %1079, %1078 : vector<2x64xf32>
    %1081 = arith.addf %1047, %1080 : vector<2x64xf32>
    %c56 = arith.constant 56 : index
    %c0_166 = arith.constant 0 : index
    %1082 = vector.load %arg2[%c56, %c0_166] : memref<96x64xf32, #tpu.memory_space<vmem>>, vector<2x32xf32>
    %1083 = arith.mulf %623, %1082 : vector<2x32xf32>
    %c58 = arith.constant 58 : index
    %c0_167 = arith.constant 0 : index
    %1084 = vector.load %arg2[%c58, %c0_167] : memref<96x64xf32, #tpu.memory_space<vmem>>, vector<2x32xf32>
    %1085 = arith.mulf %924, %1084 : vector<2x32xf32>
    %c60 = arith.constant 60 : index
    %c0_168 = arith.constant 0 : index
    %1086 = vector.load %arg2[%c60, %c0_168] : memref<96x64xf32, #tpu.memory_space<vmem>>, vector<2x64xf32>
    %1087 = arith.mulf %1081, %1086 : vector<2x64xf32>
    %1088 = tpu.concatenate %58, %96, %134, %172, %210, %248, %286, %324, %362, %400, %438, %476, %514, %552, %590, %622 in 0 : vector<2x32xf32>, vector<2x32xf32>, vector<2x32xf32>, vector<2x32xf32>, vector<2x32xf32>, vector<2x32xf32>, vector<2x32xf32>, vector<2x32xf32>, vector<2x32xf32>, vector<2x32xf32>, vector<2x32xf32>, vector<2x32xf32>, vector<2x32xf32>, vector<2x32xf32>, vector<2x32xf32>, vector<2x32xf32> -> vector<32x32xf32>
    %1089 = tpu.concatenate %663, %701, %739, %777, %815, %853, %891, %923 in 0 : vector<2x32xf32>, vector<2x32xf32>, vector<2x32xf32>, vector<2x32xf32>, vector<2x32xf32>, vector<2x32xf32>, vector<2x32xf32>, vector<2x32xf32> -> vector<16x32xf32>
    %c0_169 = arith.constant 0 : index
    %c0_170 = arith.constant 0 : index
    %1090 = vector.load %arg5[%c0_169, %c0_170] : memref<129x195xf32, #tpu.memory_space<vmem>>, vector<32x32xf32>
    %c128_171 = arith.constant 128 : index
    %c0_172 = arith.constant 0 : index
    %1091 = vector.load %arg5[%c128_171, %c0_172] : memref<129x195xf32, #tpu.memory_space<vmem>>, vector<1x32xf32>
    %c0_173 = arith.constant 0 : index
    %c32_174 = arith.constant 32 : index
    %1092 = vector.load %arg5[%c0_173, %c32_174] : memref<129x195xf32, #tpu.memory_space<vmem>>, vector<32x32xf32>
    %c128_175 = arith.constant 128 : index
    %c32_176 = arith.constant 32 : index
    %1093 = vector.load %arg5[%c128_175, %c32_176] : memref<129x195xf32, #tpu.memory_space<vmem>>, vector<1x32xf32>
    %c0_177 = arith.constant 0 : index
    %c64 = arith.constant 64 : index
    %1094 = vector.load %arg5[%c0_177, %c64] : memref<129x195xf32, #tpu.memory_space<vmem>>, vector<32x32xf32>
    %c128_178 = arith.constant 128 : index
    %c64_179 = arith.constant 64 : index
    %1095 = vector.load %arg5[%c128_178, %c64_179] : memref<129x195xf32, #tpu.memory_space<vmem>>, vector<1x32xf32>
    %c62 = arith.constant 62 : index
    %c0_180 = arith.constant 0 : index
    %1096 = vector.load %arg2[%c62, %c0_180] : memref<96x64xf32, #tpu.memory_space<vmem>>, vector<16x2xf32>
    %c94 = arith.constant 94 : index
    %c0_181 = arith.constant 0 : index
    %1097 = vector.load %arg2[%c94, %c0_181] : memref<96x64xf32, #tpu.memory_space<vmem>>, vector<2x16xf32>
    %cst_182 = arith.constant dense<0.000000e+00> : vector<16x32xf32>
    %1098 = tpu.matmul %1089, %1090, %cst_182 {dimension_numbers = #tpu.dot_dimension_numbers<[1], [0], [0], [1], [0, 0, 1, 1], [], []>} : vector<16x32xf32>, vector<32x32xf32>, vector<16x32xf32> -> vector<16x32xf32>
    %1099 = vector.broadcast %1091 : vector<1x32xf32> to vector<16x32xf32>
    %1100 = arith.addf %1098, %1099 : vector<16x32xf32>
    %cst_183 = arith.constant dense<0.000000e+00> : vector<2x32xf32>
    %1101 = tpu.matmul %1083, %1092, %cst_183 {dimension_numbers = #tpu.dot_dimension_numbers<[1], [0], [0], [1], [0, 0, 1, 1], [], []>} : vector<2x32xf32>, vector<32x32xf32>, vector<2x32xf32> -> vector<2x32xf32>
    %1102 = vector.broadcast %1093 : vector<1x32xf32> to vector<2x32xf32>
    %1103 = arith.addf %1101, %1102 : vector<2x32xf32>
    %cst_184 = arith.constant dense<0.000000e+00> : vector<16x32xf32>
    %1104 = tpu.matmul %1096, %1103, %cst_184 {dimension_numbers = #tpu.dot_dimension_numbers<[1], [0], [0], [1], [0, 0, 1, 1], [], []>} : vector<16x2xf32>, vector<2x32xf32>, vector<16x32xf32> -> vector<16x32xf32>
    %1105 = arith.mulf %1100, %1104 : vector<16x32xf32>
    %cst_185 = arith.constant dense<0.000000e+00> : vector<16xf32>
    %1106 = vector.multi_reduction <add>, %1105, %cst_185 [1] : vector<16x32xf32> to vector<16xf32>
    %1107 = vector.shape_cast %1106 : vector<16xf32> to vector<16x1xf32>
    %1108 = vector.broadcast %1107 : vector<16x1xf32> to vector<16x2xf32>
    %1109 = arith.mulf %1108, %1096 : vector<16x2xf32>
    %cst_186 = arith.constant 1.000000e+00 : f32
    %1110 = vector.broadcast %cst_186 : f32 to vector<16x2xf32>
    %1111 = arith.subf %1096, %1110 : vector<16x2xf32>
    %cst_187 = arith.constant 1.000000e+30 : f32
    %1112 = vector.broadcast %cst_187 : f32 to vector<16x2xf32>
    %1113 = arith.mulf %1111, %1112 : vector<16x2xf32>
    %1114 = arith.addf %1109, %1113 : vector<16x2xf32>
    %cst_188 = arith.constant dense<0xFF800000> : vector<2xf32>
    %1115 = vector.multi_reduction <maximumf>, %1114, %cst_188 [0] : vector<16x2xf32> to vector<2xf32>
    %1116 = vector.shape_cast %1115 : vector<2xf32> to vector<1x2xf32>
    %1117 = vector.broadcast %1116 : vector<1x2xf32> to vector<16x2xf32>
    %1118 = arith.mulf %1096, %1117 : vector<16x2xf32>
    %cst_189 = arith.constant dense<0.000000e+00> : vector<16xf32>
    %1119 = vector.multi_reduction <add>, %1118, %cst_189 [1] : vector<16x2xf32> to vector<16xf32>
    %1120 = vector.shape_cast %1119 : vector<16xf32> to vector<16x1xf32>
    %1121 = arith.subf %1107, %1120 : vector<16x1xf32>
    %1122 = math.exp %1121 : vector<16x1xf32>
    %1123 = vector.broadcast %1122 : vector<16x1xf32> to vector<16x32xf32>
    %1124 = arith.mulf %1123, %1100 : vector<16x32xf32>
    %cst_190 = arith.constant dense<0.000000e+00> : vector<2x32xf32>
    %1125 = tpu.matmul %1097, %1124, %cst_190 {dimension_numbers = #tpu.dot_dimension_numbers<[1], [0], [0], [1], [0, 0, 1, 1], [], []>} : vector<2x16xf32>, vector<16x32xf32>, vector<2x32xf32> -> vector<2x32xf32>
    %cst_191 = arith.constant dense<0.000000e+00> : vector<2x1xf32>
    %1126 = tpu.matmul %1097, %1122, %cst_191 {dimension_numbers = #tpu.dot_dimension_numbers<[1], [0], [0], [1], [0, 0, 1, 1], [], []>} : vector<2x16xf32>, vector<16x1xf32>, vector<2x1xf32> -> vector<2x1xf32>
    %1127 = vector.broadcast %1126 : vector<2x1xf32> to vector<2x32xf32>
    %1128 = arith.divf %1125, %1127 : vector<2x32xf32>
    %cst_192 = arith.constant dense<0.000000e+00> : vector<2x32xf32>
    %1129 = tpu.matmul %1128, %1094, %cst_192 {dimension_numbers = #tpu.dot_dimension_numbers<[1], [0], [0], [1], [0, 0, 1, 1], [], []>} : vector<2x32xf32>, vector<32x32xf32>, vector<2x32xf32> -> vector<2x32xf32>
    %1130 = vector.broadcast %1095 : vector<1x32xf32> to vector<2x32xf32>
    %1131 = arith.addf %1129, %1130 : vector<2x32xf32>
    %c0_193 = arith.constant 0 : index
    %c96 = arith.constant 96 : index
    %1132 = vector.load %arg5[%c0_193, %c96] : memref<129x195xf32, #tpu.memory_space<vmem>>, vector<32x32xf32>
    %c128_194 = arith.constant 128 : index
    %c96_195 = arith.constant 96 : index
    %1133 = vector.load %arg5[%c128_194, %c96_195] : memref<129x195xf32, #tpu.memory_space<vmem>>, vector<1x32xf32>
    %c0_196 = arith.constant 0 : index
    %c128_197 = arith.constant 128 : index
    %1134 = vector.load %arg5[%c0_196, %c128_197] : memref<129x195xf32, #tpu.memory_space<vmem>>, vector<32x32xf32>
    %c128_198 = arith.constant 128 : index
    %c128_199 = arith.constant 128 : index
    %1135 = vector.load %arg5[%c128_198, %c128_199] : memref<129x195xf32, #tpu.memory_space<vmem>>, vector<1x32xf32>
    %c0_200 = arith.constant 0 : index
    %c160 = arith.constant 160 : index
    %1136 = vector.load %arg5[%c0_200, %c160] : memref<129x195xf32, #tpu.memory_space<vmem>>, vector<32x32xf32>
    %c128_201 = arith.constant 128 : index
    %c160_202 = arith.constant 160 : index
    %1137 = vector.load %arg5[%c128_201, %c160_202] : memref<129x195xf32, #tpu.memory_space<vmem>>, vector<1x32xf32>
    %c62_203 = arith.constant 62 : index
    %c0_204 = arith.constant 0 : index
    %1138 = vector.load %arg2[%c62_203, %c0_204] : memref<96x64xf32, #tpu.memory_space<vmem>>, vector<32x2xf32>
    %c94_205 = arith.constant 94 : index
    %c0_206 = arith.constant 0 : index
    %1139 = vector.load %arg2[%c94_205, %c0_206] : memref<96x64xf32, #tpu.memory_space<vmem>>, vector<2x32xf32>
    %cst_207 = arith.constant dense<0.000000e+00> : vector<32x32xf32>
    %1140 = tpu.matmul %1088, %1132, %cst_207 {dimension_numbers = #tpu.dot_dimension_numbers<[1], [0], [0], [1], [0, 0, 1, 1], [], []>} : vector<32x32xf32>, vector<32x32xf32>, vector<32x32xf32> -> vector<32x32xf32>
    %1141 = vector.broadcast %1133 : vector<1x32xf32> to vector<32x32xf32>
    %1142 = arith.addf %1140, %1141 : vector<32x32xf32>
    %cst_208 = arith.constant dense<0.000000e+00> : vector<2x32xf32>
    %1143 = tpu.matmul %1085, %1134, %cst_208 {dimension_numbers = #tpu.dot_dimension_numbers<[1], [0], [0], [1], [0, 0, 1, 1], [], []>} : vector<2x32xf32>, vector<32x32xf32>, vector<2x32xf32> -> vector<2x32xf32>
    %1144 = vector.broadcast %1135 : vector<1x32xf32> to vector<2x32xf32>
    %1145 = arith.addf %1143, %1144 : vector<2x32xf32>
    %cst_209 = arith.constant dense<0.000000e+00> : vector<32x32xf32>
    %1146 = tpu.matmul %1138, %1145, %cst_209 {dimension_numbers = #tpu.dot_dimension_numbers<[1], [0], [0], [1], [0, 0, 1, 1], [], []>} : vector<32x2xf32>, vector<2x32xf32>, vector<32x32xf32> -> vector<32x32xf32>
    %1147 = arith.mulf %1142, %1146 : vector<32x32xf32>
    %cst_210 = arith.constant dense<0.000000e+00> : vector<32xf32>
    %1148 = vector.multi_reduction <add>, %1147, %cst_210 [1] : vector<32x32xf32> to vector<32xf32>
    %1149 = vector.shape_cast %1148 : vector<32xf32> to vector<32x1xf32>
    %1150 = vector.broadcast %1149 : vector<32x1xf32> to vector<32x2xf32>
    %1151 = arith.mulf %1150, %1138 : vector<32x2xf32>
    %cst_211 = arith.constant 1.000000e+00 : f32
    %1152 = vector.broadcast %cst_211 : f32 to vector<32x2xf32>
    %1153 = arith.subf %1138, %1152 : vector<32x2xf32>
    %cst_212 = arith.constant 1.000000e+30 : f32
    %1154 = vector.broadcast %cst_212 : f32 to vector<32x2xf32>
    %1155 = arith.mulf %1153, %1154 : vector<32x2xf32>
    %1156 = arith.addf %1151, %1155 : vector<32x2xf32>
    %cst_213 = arith.constant dense<0xFF800000> : vector<2xf32>
    %1157 = vector.multi_reduction <maximumf>, %1156, %cst_213 [0] : vector<32x2xf32> to vector<2xf32>
    %1158 = vector.shape_cast %1157 : vector<2xf32> to vector<1x2xf32>
    %1159 = vector.broadcast %1158 : vector<1x2xf32> to vector<32x2xf32>
    %1160 = arith.mulf %1138, %1159 : vector<32x2xf32>
    %cst_214 = arith.constant dense<0.000000e+00> : vector<32xf32>
    %1161 = vector.multi_reduction <add>, %1160, %cst_214 [1] : vector<32x2xf32> to vector<32xf32>
    %1162 = vector.shape_cast %1161 : vector<32xf32> to vector<32x1xf32>
    %1163 = arith.subf %1149, %1162 : vector<32x1xf32>
    %1164 = math.exp %1163 : vector<32x1xf32>
    %1165 = vector.broadcast %1164 : vector<32x1xf32> to vector<32x32xf32>
    %1166 = arith.mulf %1165, %1142 : vector<32x32xf32>
    %cst_215 = arith.constant dense<0.000000e+00> : vector<2x32xf32>
    %1167 = tpu.matmul %1139, %1166, %cst_215 {dimension_numbers = #tpu.dot_dimension_numbers<[1], [0], [0], [1], [0, 0, 1, 1], [], []>} : vector<2x32xf32>, vector<32x32xf32>, vector<2x32xf32> -> vector<2x32xf32>
    %cst_216 = arith.constant dense<0.000000e+00> : vector<2x1xf32>
    %1168 = tpu.matmul %1139, %1164, %cst_216 {dimension_numbers = #tpu.dot_dimension_numbers<[1], [0], [0], [1], [0, 0, 1, 1], [], []>} : vector<2x32xf32>, vector<32x1xf32>, vector<2x1xf32> -> vector<2x1xf32>
    %1169 = vector.broadcast %1168 : vector<2x1xf32> to vector<2x32xf32>
    %1170 = arith.divf %1167, %1169 : vector<2x32xf32>
    %cst_217 = arith.constant dense<0.000000e+00> : vector<2x32xf32>
    %1171 = tpu.matmul %1170, %1136, %cst_217 {dimension_numbers = #tpu.dot_dimension_numbers<[1], [0], [0], [1], [0, 0, 1, 1], [], []>} : vector<2x32xf32>, vector<32x32xf32>, vector<2x32xf32> -> vector<2x32xf32>
    %1172 = vector.broadcast %1137 : vector<1x32xf32> to vector<2x32xf32>
    %1173 = arith.addf %1171, %1172 : vector<2x32xf32>
    %c0_218 = arith.constant 0 : index
    %c192 = arith.constant 192 : index
    %1174 = vector.load %arg5[%c0_218, %c192] : memref<129x195xf32, #tpu.memory_space<vmem>>, vector<128x3xf32>
    %c128_219 = arith.constant 128 : index
    %c192_220 = arith.constant 192 : index
    %1175 = vector.load %arg5[%c128_219, %c192_220] : memref<129x195xf32, #tpu.memory_space<vmem>>, vector<1x3xf32>
    %1176 = tpu.concatenate %1131, %1173, %1087 in 1 : vector<2x32xf32>, vector<2x32xf32>, vector<2x64xf32> -> vector<2x128xf32>
    %cst_221 = arith.constant dense<0.000000e+00> : vector<2x3xf32>
    %1177 = tpu.matmul %1176, %1174, %cst_221 {dimension_numbers = #tpu.dot_dimension_numbers<[1], [0], [0], [1], [0, 0, 1, 1], [], []>} : vector<2x128xf32>, vector<128x3xf32>, vector<2x3xf32> -> vector<2x3xf32>
    %1178 = vector.broadcast %1175 : vector<1x3xf32> to vector<2x3xf32>
    %1179 = arith.addf %1177, %1178 : vector<2x3xf32>
    %c0_222 = arith.constant 0 : index
    %c0_223 = arith.constant 0 : index
    %1180 = vector.load %arg6[%c0_222, %c0_223] : memref<2x3xf32, #tpu.memory_space<vmem>>, vector<2x3xf32>
    tpu.vector_store %arg6[%c0_222, %c0_223], %1179 {strides = array<i32>} : memref<2x3xf32, #tpu.memory_space<vmem>>, vector<2x3xf32>,
    return
  }
}

</mosaic_0001>

<bundles_post_ra>
// kernel: mul.31
= control target key start
LH: loop header
LB: loop body
LE: loop exit
PB: predicated region body
PF: predicated region fallthrough
CT: control target
= control target key end

     0   :  { %vm7_vm0 = vcmask 15360   ;;  %s37_s8 = smov 2   ;;  %s38_s9 = smov 4   ;;  %vm13_vm1 = vcmask 64560   ;;  %vm19_vm2 = vcmask 48160   ;;  %vm25_vm3 = vcmask 31760   ;;  %s55_s0 = inlined_call_operand.vmem [shape: f32[4,2], index: 0, kind: input, shape index: {}]   ;;  %s56_s1 = inlined_call_operand.vmem [shape: f32[8], index: 1, kind: output, shape index: {}]  }
   0x1   :  { %v4_v0 = vld [vmem:[%s55_s0] sm:$0xf]  ;;  %s36_s0 = smov 6  }
   0x2   :  { %5 = vst [vmem:[#allocation1] sm:$0xf] %v4_v0 }
   0x9   :  { %v10_v1 = vld [vmem:[#allocation1 + $0x3] sm:$0x1]   ;;  %v22_v2 = vld [vmem:[#allocation1 + $0x1] sm:$0x1]   ;;  %v6_v3 = vld [vmem:[#allocation1] sm:$0x1]  }
   0xa   :  { %11 = vrot.lane.b32.xlu0 %v10_v1, %s36_s0  ;;  %23 = vrot.lane.b32.xlu1 %v22_v2, %s37_s8  ;;  %v16_v4 = vld [vmem:[#allocation1 + $0x2] sm:$0x1]   ;;  %8 = vst.msk [vmem:[#allocation0] sm:$0x1] %vm7_vm0, %v6_v3  }
   0xe   :  { %17 = vrot.lane.b32.xlu0 %v16_v4, %s38_s9 }
  0x7c   :  { %v12_v5 = vpop.permute.xlu0 %11   ;;  %v24_v6 = vpop.permute.xlu1 %23  }
  0x7d   :  { %14 = vst.msk [vmem:[#allocation0] sm:$0x1] %vm13_vm1, %v12_v5  }
  0x80   :  { %v18_v7 = vpop.permute.xlu0 %17  }
  0x81   :  { %20 = vst.msk [vmem:[#allocation0] sm:$0x1] %vm19_vm2, %v18_v7  }
  0x82   :  { %26 = vst.msk [vmem:[#allocation0] sm:$0x1] %vm25_vm3, %v24_v6  }
  0x89   :  { %v30_v8 = vld [vmem:[#allocation0] sm:$0x1] }
  0x8a   :  { %32 = vst [vmem:[%s56_s1] sm:$0x1] %v30_v8 }

// kernel: reverse
= control target key start
LH: loop header
LB: loop body
LE: loop exit
PB: predicated region body
PF: predicated region fallthrough
CT: control target
= control target key end

     0   :  { %v40_v1 = vld [vmem:[#allocation1] sm:$0xf]  ;;  %v50_v4 = vlaneseq  ;;  %s116_s0 = inlined_call_operand.vmem [shape: f32[4,2], index: 0, kind: input, shape index: {}]   ;;  %s117_s1 = inlined_call_operand.vmem [shape: f32[4,2], index: 1, kind: output, shape index: {}]  }
   0x1   :  { %v18_v0 = vld [vmem:[%s116_s0] sm:$0xf]  ;;  %41 = vst [vmem:[#allocation0] sm:$0xf] %v40_v1 }
   0x2   :  { %19 = vst [vmem:[#allocation1 + $0x4] sm:$0xf] %v18_v0  ;;  %v51_v6 = vshrl.u32 %v50_v4, 7 }
   0x4   :  { %vm52_vm0 = vcmp.lt.s32.totalorder %v51_v6, 4 }
   0x8   :  { %v43_v3 = vld [vmem:[#allocation0 + $0x7] ss:$-1 sm:$0xff] }
   0x9   :  { %v37_v2 = vld [vmem:[#allocation1 + $0x4] sm:$0xf]  ;;  %v44_v5 = vrot.slane %v43_v3, 4 }
   0xa   :  { %39 = vst [vmem:[#allocation0 + $0x8] sm:$0xf] %v37_v2 }
   0xb   :  { %45 = vst [vmem:[#allocation2] sm:$0xff] %v44_v5 }
  0x11   :  { %v48_v7 = vld [vmem:[#allocation0 + $0xf] ss:$-1 sm:$0xff] }
  0x12   :  { %v49_v8 = vrot.slane %v48_v7, 4 }
  0x14   :  { %53 = vst.msk [vmem:[#allocation2] sm:$0xff] %vm52_vm0, %v49_v8 }
  0x1b   :  { %v57_v9 = vld [vmem:[#allocation2] sm:$0xf] }
  0x1c   :  { %59 = vst [vmem:[#allocation3] sm:$0xf] %v57_v9 }
  0x23   :  { %v75_v10 = vld [vmem:[#allocation3] sm:$0xf] }
  0x24   :  { %76 = vst [vmem:[%s117_s1] sm:$0xf] %v75_v10 }

// kernel: mul.32
= control target key start
LH: loop header
LB: loop body
LE: loop exit
PB: predicated region body
PF: predicated region fallthrough
CT: control target
= control target key end

     0   :  { %s25_s0 = inlined_call_operand.vmem [shape: f32[8], index: 0, kind: input, shape index: {}]   ;;  %s26_s1 = inlined_call_operand.vmem [shape: f32[8,32], index: 1, kind: output, shape index: {}]  }
   0x1   :  { %v4_v0 = vld [vmem:[%s25_s0] ss:$0 sm:$0xff] }
   0x2   :  { %6 = vbcast.lane.b32.xlu0 %v4_v0, 256 }
  0x74   :  { %v7_v1 = vpop.permute.xlu0 %6 }
  0x75   :  { %8 = vst [vmem:[%s26_s1] sm:$0xff] %v7_v1 }

// kernel: mul.23
= control target key start
LH: loop header
LB: loop body
LE: loop exit
PB: predicated region body
PF: predicated region fallthrough
CT: control target
= control target key end

     0   :  { %s58_s0 = inlined_call_operand.vmem [shape: f32[32], index: 0, kind: input, shape index: {}]   ;;  %s59_s1 = inlined_call_operand.vmem [shape: f32[32,64], index: 1, kind: output, shape index: {}]  }
   0x1   :  { %v16_v0 = vld [vmem:[%s58_s0] ss:$0 sm:$0xff] }
   0x2   :  { %19 = vbcast.lane.b32.xlu1 %v16_v0, 272  ;;  %6 = vbcast.lane.b32.xlu0 %v16_v0, 256 }
   0x6   :  { %26 = vbcast.lane.b32.xlu1 %v16_v0, 280  ;;  %12 = vbcast.lane.b32.xlu0 %v16_v0, 264 }
  0x74   :  { %v20_v1 = vpop.permute.xlu1 %19  ;;  %v7_v2 = vpop.permute.xlu0 %6 }
  0x75   :  { %31 = vst [vmem:[%s59_s1 + $0x10] sm:$0xff] %v20_v1  ;;  %8 = vst [vmem:[%s59_s1] sm:$0xff] %v7_v2 }
  0x78   :  { %v27_v3 = vpop.permute.xlu1 %26  ;;  %v13_v4 = vpop.permute.xlu0 %12 }
  0x79   :  { %32 = vst [vmem:[%s59_s1 + $0x18] sm:$0xff] %v27_v3  ;;  %30 = vst [vmem:[%s59_s1 + $0x8] sm:$0xff] %v13_v4 }

// kernel: mul.26
= control target key start
LH: loop header
LB: loop body
LE: loop exit
PB: predicated region body
PF: predicated region fallthrough
CT: control target
= control target key end

     0   :  { %s36_s0 = inlined_call_operand.vmem [shape: f32[16], index: 0, kind: input, shape index: {}]   ;;  %s37_s1 = inlined_call_operand.vmem [shape: f32[16,64], index: 1, kind: output, shape index: {}]  }
   0x1   :  { %v4_v0 = vld [vmem:[%s36_s0] ss:$0 sm:$0xff] }
   0x2   :  { %6 = vbcast.lane.b32.xlu0 %v4_v0, 256 }
   0x6   :  { %12 = vbcast.lane.b32.xlu0 %v4_v0, 264 }
  0x74   :  { %v7_v1 = vpop.permute.xlu0 %6 }
  0x75   :  { %8 = vst [vmem:[%s37_s1] sm:$0xff] %v7_v1 }
  0x78   :  { %v13_v2 = vpop.permute.xlu0 %12 }
  0x79   :  { %16 = vst [vmem:[%s37_s1 + $0x8] sm:$0xff] %v13_v2 }

// kernel: mul.35
= control target key start
LH: loop header
LB: loop body
LE: loop exit
PB: predicated region body
PF: predicated region fallthrough
CT: control target
= control target key end

     0   :  { %s25_s0 = inlined_call_operand.vmem [shape: f32[2], index: 0, kind: input, shape index: {}]   ;;  %s26_s1 = inlined_call_operand.vmem [shape: f32[2,64], index: 1, kind: output, shape index: {}]  }
   0x1   :  { %v4_v0 = vld [vmem:[%s25_s0] ss:$0 sm:$0xff] }
   0x2   :  { %6 = vbcast.lane.b32.xlu0 %v4_v0, 256 }
  0x74   :  { %v7_v1 = vpop.permute.xlu0 %6 }
  0x75   :  { %8 = vst [vmem:[%s26_s1] sm:$0x3] %v7_v1 }

// kernel: ian2m_forward.1
= control target key start
LH: loop header
LB: loop body
LE: loop exit
PB: predicated region body
PF: predicated region fallthrough
CT: control target
= control target key end

     0   :  { %v5784_v7 = vmov 0.0   ;;  %v5785_v12 = vmov 0   ;;  %vm52_vm0 = vcmask 261120   ;;  %s7217_s0 = inlined_call_operand.vmem [shape: f32[48,32], index: 0, kind: input, shape index: {}]   ;;  %s7218_s1 = inlined_call_operand.vmem [shape: f32[8,32], index: 1, kind: input, shape index: {}]   ;;  %s7219_s2 = inlined_call_operand.vmem [shape: f32[96,64], index: 2, kind: input, shape index: {}]   ;;  %s7220_s3 = inlined_call_operand.vmem [shape: f32[33,768], index: 3, kind: input, shape index: {}]   ;;  %s7221_s4 = inlined_call_operand.vmem [shape: bf16[64,512], index: 4, kind: input, shape index: {}]   ;;  %s7222_s5 = inlined_call_operand.vmem [shape: f32[129,195], index: 5, kind: input, shape index: {}]   ;;  %s7223_s6 = inlined_call_operand.hbm [shape: f32[2,3], index: 6, kind: output, shape index: {}]  }
   0x1   :  { %v32_v0 = vld [vmem:[%s7220_s3 + $0x8] sm:$0xff]  ;;  %v34_v1 = vld [vmem:[%s7220_s3 + $0x38] sm:$0xff]  ;;  %v31_v2 = vld [vmem:[%s7220_s3] sm:$0xff]  ;;  %145 = vmatprep.mubr.f32.mxu1 %v5784_v7  ;;  %135 = vmatprep.mubr.f32.mxu0 %v5784_v7 }
   0x2   :  { %v5268_v3 = vpack.c.bf16 %v34_v1, %v32_v0  ;;  %v33_v4 = vld [vmem:[%s7220_s3 + $0x30] sm:$0xff]  ;;  %v36_v5 = vld [vmem:[%s7220_s3 + $0x68] sm:$0xff]  ;;  %v38_v6 = vld [vmem:[%s7220_s3 + $0x98] sm:$0xff]  ;;  %5396 = vset.pattern.permute.xlu0 %v5785_v12 }
   0x3   :  { %v5270_v8 = vpack.c.bf16 %v33_v4, %v31_v2  ;;  %v5272_v9 = vpack.c.bf16 %v38_v6, %v36_v5  ;;  %v35_v10 = vld [vmem:[%s7220_s3 + $0x60] sm:$0xff]  ;;  %v37_v11 = vld [vmem:[%s7220_s3 + $0x90] sm:$0xff]  ;;  %v168_v13 = vld [vmem:[%s7220_s3 + $0x18] sm:$0xff] }
   0x4   :  { %5374 = vmatprep.subr.bf16.mxu1 %v5268_v3  ;;  %v172_v14 = vld [vmem:[%s7220_s3 + $0x48] sm:$0xff]  ;;  %5269 = vmatprep.subr.bf16.mxu0 %v5268_v3  ;;  %v5274_v15 = vpack.c.bf16 %v37_v11, %v35_v10  ;;  %v167_v17 = vld [vmem:[%s7220_s3 + $0x10] sm:$0xff]  ;;  %v171_v18 = vld [vmem:[%s7220_s3 + $0x40] sm:$0xff] }
   0x5   :  { %5376 = vmatpush1.bf16.msra.mxu1 %v5270_v8  ;;  %5271 = vmatpush1.bf16.msra.mxu0 %v5270_v8  ;;  %v5276_v16 = vpack.c.bf16 %v172_v14, %v168_v13  ;;  %v176_v19 = vld [vmem:[%s7220_s3 + $0x78] sm:$0xff]  ;;  %v180_v20 = vld [vmem:[%s7220_s3 + $0xa8] sm:$0xff]  ;;  %v27_v21 = vld [vmem:[%s7217_s0 + $0x10] sm:$0xff]  ;;  %v5278_v22 = vpack.c.bf16 %v171_v18, %v167_v17 }
   0x6   :  { %5375 = vmatprep.subr.bf16.mxu1 %v5272_v9  ;;  %5273 = vmatprep.subr.bf16.mxu0 %v5272_v9  ;;  %v175_v23 = vld [vmem:[%s7220_s3 + $0x70] sm:$0xff]  ;;  %v5280_v24 = vpack.c.bf16 %v180_v20, %v176_v19  ;;  %v179_v25 = vld [vmem:[%s7220_s3 + $0xa0] sm:$0xff]  ;;  %v170_v26 = vld [vmem:[%s7220_s3 + $0x28] sm:$0xff] }
   0x7   :  { %v174_v27 = vld [vmem:[%s7220_s3 + $0x58] sm:$0xff]  ;;  %v25_v28 = vld [vmem:[%s7217_s0] sm:$0xff]  ;;  %v5282_v31 = vpack.c.bf16 %v179_v25, %v175_v23 }
   0x8   :  { %v5895_v29 = vld [vmem:[%s7221_s4] ss:$16 sps:$4 sm:$0xff]   ;;  %v28_v30 = vld [vmem:[%s7217_s0 + $0x18] sm:$0xff]  ;;  %v5284_v32 = vpack.c.bf16 %v174_v27, %v170_v26 }
   0x9   :  { %5377 = vmatpush1.bf16.msra.mxu1 %v5274_v15  ;;  %5275 = vmatpush1.bf16.msra.mxu0 %v5274_v15  ;;  %v5905_v33 = vld [vmem:[%s7221_s4 + $0x20] ss:$16 sps:$4 sm:$0xff]  }
   0xa   :  { %5277 = vmatprep.subr.bf16.mxu1 %v5276_v16  ;;  %4931 = vmatprep.subr.bf16.mxu0 %v5784_v7  ;;  %v29_v34 = vld [vmem:[%s7217_s0 + $0x20] sm:$0xff] }
   0xc   :  { %4672 = vmatmul.mubr.msk.f32.vlgmr.msra.gmra.mrb[0].mxu1 %vm52_vm0, %v27_v21  ;;  %4670 = vmatmul.mubr.msk.f32.vlgmr.msra.gmra.mrb[0].mxu0 %vm52_vm0, %v25_v28 }
   0xd   :  { %150 = vmatprep.mubr.f32.mxu1 %v5784_v7  ;;  %5279 = vmatpush1.bf16.msra.mxu1 %v5278_v22 }
   0xe   :  { %5281 = vmatprep.subr.bf16.mxu1 %v5280_v24  ;;  %4932 = vmatpush3.bf16.msra.mxu0 %v5895_v29 }
   0xf   :  { %140 = vmatprep.mubr.f32.mxu0 %v5784_v7  ;;  %4933 = vmatprep.subr.bf16.mxu0 %v5784_v7 }
  0x10   :  { %4673 = vmatmul.mubr.msk.f32.gmra.mrb[2].mxu1 %vm52_vm0, %v28_v30 }
  0x11   :  { %155 = vmatprep.mubr.f32.mxu1 %v5784_v7  ;;  %5283 = vmatpush1.bf16.msra.mxu1 %v5282_v31 }
  0x12   :  { %11 = vsyncpa [#allocation3], 0  ;;  %5285 = vmatprep.subr.bf16.mxu1 %v5284_v32  ;;  %4934 = vmatpush3.bf16.msra.mxu0 %v5905_v33  ;;  %v30_v35 = vld [vmem:[%s7217_s0 + $0x28] sm:$0xff]  ;;  %v169_v36 = vld [vmem:[%s7220_s3 + $0x20] sm:$0xff]  ;;  %vm5786_vm1 = vmmov 0   ;;  %v42_v50 = vlaneseq  ;;  %s5788_s16 = smov 32  }
  0x13   :  { %4947 = vmatprep.subr.bf16.mxu0 %v5784_v7  ;;  %v173_v37 = vld [vmem:[%s7220_s3 + $0x50] sm:$0xff]  ;;  %v178_v38 = vld [vmem:[%s7220_s3 + $0x88] sm:$0xff]  ;;  %v182_v39 = vld [vmem:[%s7220_s3 + $0xb8] sm:$0xff]  ;;  %s5789_s17 = smov 96   ;;  %vm2856_vm2 = vcmask 523264   ;;  %vm3291_vm3 = vcmask 1041408  }
  0x14   :  { %4674 = vmatmul.mubr.msk.f32.gmra.mrb[4].mxu1 %vm52_vm0, %v29_v34  ;;  %v166_v40 = vld [vmem:[%s7218_s1] sm:$0xff]  ;;  %v5286_v41 = vpack.c.bf16 %v173_v37, %v169_v36  ;;  %v5288_v42 = vpack.c.bf16 %v182_v39, %v178_v38  ;;  %v181_v44 = vld [vmem:[%s7220_s3 + $0xb0] sm:$0xff]  ;;  %v43_v53 = vshrl.u32 %v42_v50, 7  ;;  %vm3293_vm4 = vcmask 1043456  }
  0x15   :  { %160 = vmatprep.mubr.f32.mxu1 %v5784_v7  ;;  %v177_v43 = vld [vmem:[%s7220_s3 + $0x80] sm:$0xff]  ;;  %vm3295_vm5 = vcmask 1045504   ;;  %vm3512_vm6 = vcmask 15360   ;;  %vm3638_vm7 = vcmask 130048   ;;  %vm4653_vm8 = vcmask 17408  }
  0x16   :  { %v5290_v45 = vpack.c.bf16 %v181_v44, %v177_v43  ;;  %v48_v55 = vsub.s32 1, %v43_v53  ;;  %v4669_v57 = vld [vmem:[%s7220_s3 + $0xc0] ss:$8 sm:$0x3]  ;;  %v196_v2 = vsub.s32 2, %v43_v53  ;;  %v200_v4 = vsub.s32 3, %v43_v53 }
  0x17   :  { %v4676_v58 = vld [vmem:[%s7220_s3 + $0xd0] ss:$8 sm:$0xf]  ;;  %v44_v5 = vsub.s32 0, %v43_v53  ;;  %s5787_s3 = smov 64  }
  0x18   :  { %4675 = vmatmul.mubr.msk.f32.gmra.mrb[6].mxu1 %vm52_vm0, %v30_v35  ;;  %v5974_v59 = vrot.slane %v4669_v57, %v48_v55  ;;  %v193_v63 = vrot.slane %v4676_v58, %v48_v55  ;;  %v197_v6 = vrot.slane %v4676_v58, %v196_v2  ;;  %v201_v8 = vrot.slane %v4676_v58, %v200_v4  ;;  %v26_v44 = vld [vmem:[%s7217_s0 + $0x8] sm:$0xff] }
  0x19   :  { %273 = vmatprep.mubr.f32.mxu1 %v5784_v7  ;;  %v189_v9 = vrot.slane %v4676_v58, %v44_v5  ;;  %v5979_v15 = vrot.slane %v4669_v57, %v44_v5  ;;  %4671 = vmatmul.mubr.msk.f32.gmra.mrb[2].mxu0 %vm52_vm0, %v26_v44 }
  0x1a   :  { %4935 = vmatprep.mubr.msk.bf16.mxu0 %vm5786_vm1, %v5784_v7 }
  0x1c   :  { %4677 = vmatmul.mubr.msk.f32.vlgmr.msra.gmra.mrb[8].mxu1 %vm52_vm0, %v166_v40 }
  0x1d   :  { %5287 = vmatpush1.bf16.msra.mxu1 %v5286_v41  ;;  %344 = vmatprep.mubr.f32.mxu1 %v5784_v7 }
  0x1e   :  { %5289 = vmatprep.subr.bf16.mxu1 %v5288_v42 }
  0x21   :  { %5291 = vmatpush1.bf16.msra.mxu1 %v5290_v45  ;;  %v447_v45 = vld [vmem:[%s7219_s2] sm:$0x3] }
  0x22   :  { %4923 = vmatprep.subr.bf16.mxu1 %v5784_v7 }
  0x24   :  { %4678 = vmatmul.mubr.msk.f32.vlgmr.msra.gmra.mrb[10].mxu1 %vm52_vm0, %v166_v40 }
  0x25   :  { %4924 = vmatpush3.bf16.msra.mxu1 %v5895_v29  ;;  %4927 = vmatprep.mubr.msk.bf16.mxu1 %vm5786_vm1, %v5784_v7 }
  0x26   :  { %4925 = vmatprep.subr.bf16.mxu1 %v5784_v7 }
  0x29   :  { %4926 = vmatpush3.bf16.msra.mxu1 %v5905_v33 }
  0x2a   :  { %4939 = vmatprep.subr.bf16.mxu1 %v5784_v7 }
  0x2c   :  { %4928 = vmatmul.mubr.bf16.vlgmr.msra.gmra.mrb[12].mxu1 %v5785_v12 }
  0x2d   :  { %4940 = vmatpush3.bf16.msra.mxu1 %v5895_v29  ;;  %4943 = vmatprep.mubr.msk.bf16.mxu1 %vm5786_vm1, %v5784_v7 }
  0x2e   :  { %4941 = vmatprep.subr.bf16.mxu1 %v5784_v7 }
  0x31   :  { %4942 = vmatpush3.bf16.msra.mxu1 %v5905_v33 }
  0x32   :  { %4955 = vmatprep.subr.bf16.mxu1 %v5784_v7 }
  0xdf   :  { %v5962_v46 = vpop.f32.mrb[0].mxu1  ;;  %v137_v47 = vpop.f32.mrb[0].mxu0 }
  0xe0   :  { %v149_v48 = vpop.f32.mrb[1].mxu1  ;;  %v139_v49 = vpop.f32.mrb[1].mxu0  ;;  %v5982_v21 = vadd.f32 %v137_v47, %v5979_v15 }
  0xe3   :  { %v5964_v51 = vpop.f32.mrb[2].mxu1 }
  0xe4   :  { %v154_v52 = vpop.f32.mrb[3].mxu1 }
  0xe7   :  { %v157_v54 = vpop.f32.mrb[4].mxu1 }
  0xe8   :  { %v5966_v56 = vpop.f32.mrb[5].mxu1 }
  0xeb   :  { %v162_v60 = vpop.f32.mrb[6].mxu1 }
  0xec   :  { %v163_v61 = vpop.f32.mrb[7].mxu1  ;;  %v6019_v57 = vpop.f32.mrb[2].mxu0 }
  0xed   :  { %v5977_v62 = vadd.f32 %v163_v61, %v5974_v59  ;;  %v144_v58 = vpop.f32.mrb[3].mxu0 }
  0xef   :  { %v275_v0 = vpop.f32.mrb[8].mxu1 }
  0xf0   :  { %v277_v1 = vpop.f32.mrb[9].mxu1  ;;  %v276_v16 = vadd.f32 %v275_v0, %v189_v9 }
  0xf1   :  { %v278_v3 = vadd.f32 %v277_v1, %v193_v63 }
  0xf7   :  { %v346_v10 = vpop.f32.mrb[10].mxu1 }
  0xf8   :  { %v347_v11 = vadd.f32 %v346_v10, %v197_v6  ;;  %v348_v13 = vpop.f32.mrb[11].mxu1 }
  0xf9   :  { %v349_v14 = vadd.f32 %v348_v13, %v201_v8 }
  0xfa   :  { %v2810_v17 = vrot.slane %v347_v11, 6  ;;  %v2937_v18 = vrot.slane %v347_v11, 2 }
  0xfb   :  { %v2811_v19 = vrot.slane %v349_v14, 6  ;;  %v2938_v20 = vrot.slane %v349_v14, 2 }
  0xfc   :  { %v5984_v22 = vadd.f32 %v2810_v17, %v276_v16  ;;  %v5986_v23 = vadd.f32 %v2937_v18, %v276_v16 }
  0xfd   :  { %v5988_v24 = vadd.f32 %v2811_v19, %v278_v3  ;;  %v5990_v25 = vadd.f32 %v2938_v20, %v278_v3 }
  0xff   :  { %v416_v26 = vpop.f32.mrb[12].mxu1 }
 0x100   :  { %v422_v27 = vadd.f32 %v416_v26, %v5982_v21  ;;  %v4929_v28 = vpop.f32.mrb[13].mxu1 }
 0x101   :  { %v419_v30 = vpop.f32.mrb[14].mxu1 }
 0x102   :  { %5483 = vtanh.f32 %v422_v27  ;;  %v4930_v31 = vpop.f32.mrb[15].mxu1  ;;  %v4681_v34 = vmul.f32 -1.442695, %v422_v27  ;;  %v537_v27 = vld [vmem:[%s7219_s2 + $0x2] sm:$0x3] }
 0x104   :  { %5485 = vpow2.f32 %v4681_v34 }
 0x10c   :  { %v5484_v32 = vpop.eup %5483 }
 0x10d   :  { %432 = vrot.lane.b32.xlu0 %v5484_v32, %s5787_s3 }
 0x10e   :  { %v5486_v35 = vpop.eup %5485 }
 0x10f   :  { %v426_v36 = vadd.f32 1.0, %v5486_v35 }
 0x111   :  { %5487 = vrcp.f32 %v426_v36 }
 0x11b   :  { %v5488_v37 = vpop.eup %5487 }
 0x11c   :  { %v430_v40 = vmul.f32 0.0, %v5488_v37 }
 0x17f   :  { %v433_v38 = vpop.permute.xlu0 %432 }
 0x180   :  { %v435_v39 = vmul.f32 %v5488_v37, %v433_v38 }
 0x182   :  { %437 = vrot.lane.b32.xlu0 %v435_v39, %s5788_s16 }
 0x1f4   :  { %v438_v41 = vpop.permute.xlu0 %437 }
 0x1f5   :  { %v440_v42 = vadd.f32 %v438_v41, %v430_v40 }
 0x1f7   :  { %5489 = vtanh.f32 %v440_v42  ;;  %449 = vrot.lane.b32.xlu0 %v440_v42, %s5789_s17 }
 0x201   :  { %v5490_v43 = vpop.eup %5489 }
 0x202   :  { %443 = vrot.lane.b32.xlu1 %v5490_v43, %s5787_s3 }
 0x269   :  { %v450_v47 = vpop.permute.xlu0 %449 }
 0x26a   :  { %v452_v48 = vmul.f32 %v450_v47, %v447_v45 }
 0x26c   :  { %v516_v49 = vrot.slane %v452_v48, 6 }
 0x26e   :  { %517 = vrot.lane.b32.xlu0 %v516_v49, %s5788_s16 }
 0x274   :  { %v444_v50 = vpop.permute.xlu1 %443 }
 0x275   :  { %v446_v52 = vmul.f32 %v5488_v37, %v444_v50 }
 0x277   :  { %455 = vrot.lane.b32.xlu1 %v446_v52, %s5788_s16 }
 0x2e0   :  { %v518_v13 = vpop.permute.xlu0 %517 }
 0x2e9   :  { %v456_v53 = vpop.permute.xlu1 %455 }
 0x2ea   :  { %v6008_v54 = vmul.f32 %v456_v53, %v447_v45 }
 0x2ec   :  { %v460_v55 = vpack.c.bf16 %v6008_v54, %v6008_v54  ;;  %v547_v11 = vrot.slane %v6008_v54, 6 }
 0x2ee   :  { %4936 = vmatmul.mubr.msk.bf16.vlgmr.msra.gmra.mrb[4].mxu0 %vm52_vm0, %v460_v55 }
 0x2ef   :  { %4948 = vmatpush3.bf16.msra.mxu0 %v5895_v29  ;;  %4951 = vmatprep.mubr.msk.bf16.mxu0 %vm5786_vm1, %v5784_v7 }
 0x2f0   :  { %4949 = vmatprep.subr.bf16.mxu0 %v5784_v7 }
 0x2f3   :  { %4950 = vmatpush3.bf16.msra.mxu0 %v5905_v33 }
 0x2f4   :  { %4963 = vmatprep.subr.bf16.mxu0 %v5784_v7 }
 0x3c1   :  { %v498_v60 = vpop.f32.mrb[4].mxu0 }
 0x3c2   :  { %v505_v61 = vrot.slane %v498_v60, 6  ;;  %v4937_v63 = vpop.f32.mrb[5].mxu0 }
 0x3c3   :  { %v501_v0 = vpop.f32.mrb[6].mxu0 }
 0x3c4   :  { %v507_v1 = vadd.f32 %v505_v61, %v5982_v21  ;;  %v4938_v2 = vpop.f32.mrb[7].mxu0 }
 0x3c6   :  { %5491 = vtanh.f32 %v507_v1  ;;  %v4683_v4 = vmul.f32 -1.442695, %v507_v1 }
 0x3c8   :  { %5493 = vpow2.f32 %v4683_v4 }
 0x3d0   :  { %v5492_v3 = vpop.eup %5491 }
 0x3d1   :  { %522 = vrot.lane.b32.xlu1 %v5492_v3, %s5787_s3 }
 0x3d2   :  { %v5494_v5 = vpop.eup %5493 }
 0x3d3   :  { %v511_v6 = vadd.f32 1.0, %v5494_v5 }
 0x3d5   :  { %5495 = vrcp.f32 %v511_v6 }
 0x3df   :  { %v5496_v8 = vpop.eup %5495 }
 0x3e0   :  { %v520_v14 = vmul.f32 %v5496_v8, %v518_v13 }
 0x443   :  { %v523_v9 = vpop.permute.xlu1 %522 }
 0x444   :  { %v525_v10 = vmul.f32 %v5496_v8, %v523_v9 }
 0x446   :  { %527 = vrot.lane.b32.xlu1 %v525_v10, %s5788_s16 }
 0x44a   :  { %548 = vrot.lane.b32.xlu1 %v547_v11, %s5789_s17 }
 0x4b8   :  { %v528_v16 = vpop.permute.xlu1 %527 }
 0x4b9   :  { %v530_v17 = vadd.f32 %v528_v16, %v520_v14 }
 0x4bb   :  { %5497 = vtanh.f32 %v530_v17  ;;  %v538_v18 = vsub.f32 %v530_v17, %v518_v13 }
 0x4bc   :  { %v549_v26 = vpop.permute.xlu1 %548 }
 0x4bd   :  { %v540_v19 = vrot.slane %v538_v18, 2 }
 0x4bf   :  { %541 = vrot.lane.b32.xlu1 %v540_v19, %s5789_s17 }
 0x4c5   :  { %v5498_v20 = vpop.eup %5497 }
 0x4c6   :  { %533 = vrot.lane.b32.xlu0 %v5498_v20, %s5787_s3 }
 0x531   :  { %v542_v28 = vpop.permute.xlu1 %541 }
 0x532   :  { %v544_v30 = vmul.f32 %v542_v28, %v537_v27 }
 0x534   :  { %v545_v31 = vadd.f32 %v544_v30, %v452_v48 }
 0x536   :  { %v622_v32 = vrot.slane %v545_v31, 4 }
 0x538   :  { %623 = vrot.lane.b32.xlu1 %v622_v32, %s5788_s16  ;;  %v534_v34 = vpop.permute.xlu0 %533 }
 0x539   :  { %v6032_v35 = vmul.f32 %v5496_v8, %v534_v34  ;;  %v643_v8 = vld [vmem:[%s7219_s2 + $0x4] sm:$0x3] }
 0x53b   :  { %v551_v36 = vsub.f32 %v6032_v35, %v549_v26 }
 0x53d   :  { %v553_v37 = vrot.slane %v551_v36, 2 }
 0x53f   :  { %554 = vrot.lane.b32.xlu0 %v553_v37, %s5788_s16 }
 0x5aa   :  { %v624_v63 = vpop.permute.xlu1 %623 }
 0x5b1   :  { %v555_v38 = vpop.permute.xlu0 %554 }
 0x5b2   :  { %v557_v39 = vmul.f32 %v555_v38, %v537_v27 }
 0x5b4   :  { %v558_v40 = vadd.f32 %v557_v39, %v6008_v54 }
 0x5b6   :  { %v566_v41 = vpack.c.bf16 %v558_v40, %v558_v40  ;;  %v653_v61 = vrot.slane %v558_v40, 4 }
 0x5b8   :  { %4944 = vmatmul.mubr.msk.bf16.vlgmr.msra.gmra.mrb[16].mxu1 %vm52_vm0, %v566_v41 }
 0x5b9   :  { %4956 = vmatpush3.bf16.msra.mxu1 %v5895_v29  ;;  %4959 = vmatprep.mubr.msk.bf16.mxu1 %vm5786_vm1, %v5784_v7 }
 0x5ba   :  { %4957 = vmatprep.subr.bf16.mxu1 %v5784_v7 }
 0x5bd   :  { %4958 = vmatpush3.bf16.msra.mxu1 %v5905_v33 }
 0x5be   :  { %4971 = vmatprep.subr.bf16.mxu1 %v5784_v7 }
 0x68b   :  { %v604_v42 = vpop.f32.mrb[16].mxu1 }
 0x68c   :  { %v611_v43 = vrot.slane %v604_v42, 4  ;;  %v4945_v44 = vpop.f32.mrb[17].mxu1 }
 0x68d   :  { %v607_v45 = vpop.f32.mrb[18].mxu1 }
 0x68e   :  { %v613_v47 = vadd.f32 %v611_v43, %v5982_v21  ;;  %v4946_v48 = vpop.f32.mrb[19].mxu1 }
 0x690   :  { %5499 = vtanh.f32 %v613_v47  ;;  %v4685_v50 = vmul.f32 -1.442695, %v613_v47 }
 0x692   :  { %5501 = vpow2.f32 %v4685_v50 }
 0x69a   :  { %v5500_v49 = vpop.eup %5499 }
 0x69b   :  { %628 = vrot.lane.b32.xlu0 %v5500_v49, %s5787_s3 }
 0x69c   :  { %v5502_v52 = vpop.eup %5501 }
 0x69d   :  { %v617_v53 = vadd.f32 1.0, %v5502_v52 }
 0x69f   :  { %5503 = vrcp.f32 %v617_v53 }
 0x6a9   :  { %v5504_v55 = vpop.eup %5503 }
 0x6aa   :  { %v626_v0 = vmul.f32 %v5504_v55, %v624_v63 }
 0x70d   :  { %v629_v58 = vpop.permute.xlu0 %628 }
 0x70e   :  { %v631_v60 = vmul.f32 %v5504_v55, %v629_v58 }
 0x710   :  { %633 = vrot.lane.b32.xlu0 %v631_v60, %s5788_s16 }
 0x714   :  { %654 = vrot.lane.b32.xlu0 %v653_v61, %s5789_s17 }
 0x782   :  { %v634_v1 = vpop.permute.xlu0 %633 }
 0x783   :  { %v636_v2 = vadd.f32 %v634_v1, %v626_v0 }
 0x785   :  { %5505 = vtanh.f32 %v636_v2  ;;  %v644_v3 = vsub.f32 %v636_v2, %v624_v63 }
 0x786   :  { %v655_v6 = vpop.permute.xlu0 %654 }
 0x787   :  { %v646_v4 = vrot.slane %v644_v3, 4 }
 0x789   :  { %647 = vrot.lane.b32.xlu0 %v646_v4, %s5789_s17 }
 0x78f   :  { %v5506_v5 = vpop.eup %5505 }
 0x790   :  { %639 = vrot.lane.b32.xlu1 %v5506_v5, %s5787_s3 }
 0x7fb   :  { %v648_v9 = vpop.permute.xlu0 %647 }
 0x7fc   :  { %v650_v10 = vmul.f32 %v648_v9, %v643_v8 }
 0x7fe   :  { %v651_v11 = vadd.f32 %v650_v10, %v545_v31 }
 0x800   :  { %v728_v13 = vrot.slane %v651_v11, 2 }
 0x802   :  { %729 = vrot.lane.b32.xlu0 %v728_v13, %s5788_s16  ;;  %v640_v14 = vpop.permute.xlu1 %639 }
 0x803   :  { %v6054_v16 = vmul.f32 %v5504_v55, %v640_v14  ;;  %v749_v55 = vld [vmem:[%s7219_s2 + $0x6] sm:$0x3] }
 0x805   :  { %v657_v17 = vsub.f32 %v6054_v16, %v655_v6 }
 0x807   :  { %v659_v18 = vrot.slane %v657_v17, 4 }
 0x809   :  { %660 = vrot.lane.b32.xlu1 %v659_v18, %s5788_s16 }
 0x874   :  { %v730_v45 = vpop.permute.xlu0 %729 }
 0x87b   :  { %v661_v19 = vpop.permute.xlu1 %660 }
 0x87c   :  { %v663_v20 = vmul.f32 %v661_v19, %v643_v8  ;;  %v6088_v8 = vadd.f32 %v6019_v57, %v5979_v15 }
 0x87e   :  { %v664_v26 = vadd.f32 %v663_v20, %v558_v40 }
 0x880   :  { %v672_v27 = vpack.c.bf16 %v664_v26, %v664_v26  ;;  %v759_v44 = vrot.slane %v664_v26, 2 }
 0x882   :  { %4952 = vmatmul.mubr.msk.bf16.vlgmr.msra.gmra.mrb[8].mxu0 %vm52_vm0, %v672_v27 }
 0x883   :  { %4964 = vmatpush3.bf16.msra.mxu0 %v5895_v29  ;;  %4967 = vmatprep.mubr.msk.bf16.mxu0 %vm5786_vm1, %v5784_v7 }
 0x884   :  { %4965 = vmatprep.subr.bf16.mxu0 %v5784_v7 }
 0x887   :  { %4966 = vmatpush3.bf16.msra.mxu0 %v5905_v33 }
 0x888   :  { %4979 = vmatprep.subr.bf16.mxu0 %v5784_v7 }
 0x955   :  { %v710_v28 = vpop.f32.mrb[8].mxu0 }
 0x956   :  { %v717_v30 = vrot.slane %v710_v28, 2  ;;  %v4953_v31 = vpop.f32.mrb[9].mxu0 }
 0x957   :  { %v713_v32 = vpop.f32.mrb[10].mxu0 }
 0x958   :  { %v719_v34 = vadd.f32 %v717_v30, %v5982_v21  ;;  %v4954_v36 = vpop.f32.mrb[11].mxu0 }
 0x95a   :  { %5507 = vtanh.f32 %v719_v34  ;;  %v4687_v38 = vmul.f32 -1.442695, %v719_v34 }
 0x95c   :  { %5509 = vpow2.f32 %v4687_v38  ;;  %v851_v38 = vld [vmem:[%s7219_s2 + $0x8] sm:$0x3] }
 0x964   :  { %v5508_v37 = vpop.eup %5507 }
 0x965   :  { %734 = vrot.lane.b32.xlu1 %v5508_v37, %s5787_s3 }
 0x966   :  { %v5510_v39 = vpop.eup %5509 }
 0x967   :  { %v723_v40 = vadd.f32 1.0, %v5510_v39 }
 0x969   :  { %5511 = vrcp.f32 %v723_v40 }
 0x973   :  { %v5512_v41 = vpop.eup %5511 }
 0x974   :  { %v732_v21 = vmul.f32 %v5512_v41, %v730_v45 }
 0x9d7   :  { %v735_v42 = vpop.permute.xlu1 %734 }
 0x9d8   :  { %v737_v43 = vmul.f32 %v5512_v41, %v735_v42 }
 0x9da   :  { %739 = vrot.lane.b32.xlu1 %v737_v43, %s5788_s16 }
 0x9de   :  { %760 = vrot.lane.b32.xlu1 %v759_v44, %s5789_s17 }
 0xa4c   :  { %v740_v47 = vpop.permute.xlu1 %739 }
 0xa4d   :  { %v742_v48 = vadd.f32 %v740_v47, %v732_v21 }
 0xa4f   :  { %5513 = vtanh.f32 %v742_v48  ;;  %v750_v49 = vsub.f32 %v742_v48, %v730_v45 }
 0xa50   :  { %v761_v53 = vpop.permute.xlu1 %760 }
 0xa51   :  { %v752_v50 = vrot.slane %v750_v49, 6 }
 0xa53   :  { %753 = vrot.lane.b32.xlu1 %v752_v50, %s5789_s17 }
 0xa59   :  { %v5514_v52 = vpop.eup %5513 }
 0xa5a   :  { %745 = vrot.lane.b32.xlu0 %v5514_v52, %s5787_s3 }
 0xac5   :  { %v754_v58 = vpop.permute.xlu1 %753 }
 0xac6   :  { %v756_v60 = vmul.f32 %v754_v58, %v749_v55 }
 0xac8   :  { %v757_v61 = vadd.f32 %v756_v60, %v651_v11 }
 0xaca   :  { %831 = vrot.lane.b32.xlu1 %v757_v61, %s5788_s16 }
 0xacc   :  { %v746_v63 = vpop.permute.xlu0 %745 }
 0xacd   :  { %v6075_v0 = vmul.f32 %v5512_v41, %v746_v63 }
 0xacf   :  { %v763_v1 = vsub.f32 %v6075_v0, %v761_v53 }
 0xad1   :  { %v765_v2 = vrot.slane %v763_v1, 6 }
 0xad3   :  { %766 = vrot.lane.b32.xlu0 %v765_v2, %s5788_s16 }
 0xb3c   :  { %v832_v57 = vpop.permute.xlu1 %831 }
 0xb45   :  { %v767_v3 = vpop.permute.xlu0 %766 }
 0xb46   :  { %v769_v4 = vmul.f32 %v767_v3, %v749_v55 }
 0xb48   :  { %v770_v5 = vadd.f32 %v769_v4, %v664_v26 }
 0xb4a   :  { %v778_v6 = vpack.c.bf16 %v770_v5, %v770_v5 }
 0xb4c   :  { %4960 = vmatmul.mubr.msk.bf16.vlgmr.msra.gmra.mrb[20].mxu1 %vm52_vm0, %v778_v6 }
 0xb4d   :  { %4972 = vmatpush3.bf16.msra.mxu1 %v5895_v29  ;;  %4975 = vmatprep.mubr.msk.bf16.mxu1 %vm5786_vm1, %v5784_v7 }
 0xb4e   :  { %4973 = vmatprep.subr.bf16.mxu1 %v5784_v7 }
 0xb51   :  { %4974 = vmatpush3.bf16.msra.mxu1 %v5905_v33 }
 0xb52   :  { %4987 = vmatprep.subr.bf16.mxu1 %v5784_v7 }
 0xc1f   :  { %v816_v9 = vpop.f32.mrb[20].mxu1 }
 0xc20   :  { %v822_v10 = vadd.f32 %v816_v9, %v6088_v8  ;;  %v4961_v11 = vpop.f32.mrb[21].mxu1 }
 0xc21   :  { %v819_v13 = vpop.f32.mrb[22].mxu1 }
 0xc22   :  { %5515 = vtanh.f32 %v822_v10  ;;  %v4962_v14 = vpop.f32.mrb[23].mxu1  ;;  %v4689_v18 = vmul.f32 -1.442695, %v822_v10 }
 0xc24   :  { %5517 = vpow2.f32 %v4689_v18 }
 0xc2c   :  { %v5516_v17 = vpop.eup %5515 }
 0xc2d   :  { %836 = vrot.lane.b32.xlu0 %v5516_v17, %s5787_s3 }
 0xc2e   :  { %v5518_v19 = vpop.eup %5517 }
 0xc2f   :  { %v826_v20 = vadd.f32 1.0, %v5518_v19 }
 0xc31   :  { %5519 = vrcp.f32 %v826_v20  ;;  %v953_v20 = vld [vmem:[%s7219_s2 + $0xa] sm:$0x3] }
 0xc3b   :  { %v5520_v26 = vpop.eup %5519 }
 0xc3c   :  { %v834_v30 = vmul.f32 %v5520_v26, %v832_v57 }
 0xc9f   :  { %v837_v27 = vpop.permute.xlu0 %836 }
 0xca0   :  { %v839_v28 = vmul.f32 %v5520_v26, %v837_v27 }
 0xca2   :  { %841 = vrot.lane.b32.xlu0 %v839_v28, %s5788_s16 }
 0xca6   :  { %860 = vrot.lane.b32.xlu0 %v770_v5, %s5789_s17 }
 0xd14   :  { %v842_v31 = vpop.permute.xlu0 %841 }
 0xd15   :  { %v844_v32 = vadd.f32 %v842_v31, %v834_v30 }
 0xd17   :  { %5521 = vtanh.f32 %v844_v32  ;;  %v852_v34 = vsub.f32 %v844_v32, %v832_v57 }
 0xd18   :  { %v861_v37 = vpop.permute.xlu0 %860 }
 0xd19   :  { %854 = vrot.lane.b32.xlu0 %v852_v34, %s5789_s17 }
 0xd21   :  { %v5522_v36 = vpop.eup %5521 }
 0xd22   :  { %847 = vrot.lane.b32.xlu1 %v5522_v36, %s5787_s3 }
 0xd8b   :  { %v855_v39 = vpop.permute.xlu0 %854 }
 0xd8c   :  { %v857_v40 = vmul.f32 %v855_v39, %v851_v38 }
 0xd8e   :  { %v858_v41 = vadd.f32 %v857_v40, %v757_v61 }
 0xd90   :  { %v932_v42 = vrot.slane %v858_v41, 6 }
 0xd92   :  { %933 = vrot.lane.b32.xlu0 %v932_v42, %s5788_s16 }
 0xd94   :  { %v848_v43 = vpop.permute.xlu1 %847 }
 0xd95   :  { %v6100_v44 = vmul.f32 %v5520_v26, %v848_v43 }
 0xd97   :  { %v863_v45 = vsub.f32 %v6100_v44, %v861_v37 }
 0xd99   :  { %865 = vrot.lane.b32.xlu1 %v863_v45, %s5788_s16 }
 0xe04   :  { %v934_v9 = vpop.permute.xlu0 %933 }
 0xe0b   :  { %v866_v21 = vpop.permute.xlu1 %865 }
 0xe0c   :  { %v868_v47 = vmul.f32 %v866_v21, %v851_v38 }
 0xe0e   :  { %v869_v48 = vadd.f32 %v868_v47, %v770_v5 }
 0xe10   :  { %v876_v49 = vpack.c.bf16 %v869_v48, %v869_v48  ;;  %v963_v6 = vrot.slane %v869_v48, 6 }
 0xe12   :  { %4968 = vmatmul.mubr.msk.bf16.vlgmr.msra.gmra.mrb[12].mxu0 %vm52_vm0, %v876_v49 }
 0xe13   :  { %4980 = vmatpush3.bf16.msra.mxu0 %v5895_v29  ;;  %4983 = vmatprep.mubr.msk.bf16.mxu0 %vm5786_vm1, %v5784_v7 }
 0xe14   :  { %4981 = vmatprep.subr.bf16.mxu0 %v5784_v7 }
 0xe17   :  { %4982 = vmatpush3.bf16.msra.mxu0 %v5905_v33 }
 0xe18   :  { %4995 = vmatprep.subr.bf16.mxu0 %v5784_v7 }
 0xee5   :  { %v914_v50 = vpop.f32.mrb[12].mxu0 }
 0xee6   :  { %v921_v52 = vrot.slane %v914_v50, 6  ;;  %v4969_v53 = vpop.f32.mrb[13].mxu0 }
 0xee7   :  { %v917_v55 = vpop.f32.mrb[14].mxu0 }
 0xee8   :  { %v923_v58 = vadd.f32 %v921_v52, %v6088_v8  ;;  %v4970_v60 = vpop.f32.mrb[15].mxu0 }
 0xeea   :  { %5523 = vtanh.f32 %v923_v58  ;;  %v4691_v63 = vmul.f32 -1.442695, %v923_v58 }
 0xeec   :  { %5525 = vpow2.f32 %v4691_v63 }
 0xef4   :  { %v5524_v61 = vpop.eup %5523 }
 0xef5   :  { %938 = vrot.lane.b32.xlu1 %v5524_v61, %s5787_s3 }
 0xef6   :  { %v5526_v1 = vpop.eup %5525 }
 0xef7   :  { %v927_v2 = vadd.f32 1.0, %v5526_v1 }
 0xef9   :  { %5527 = vrcp.f32 %v927_v2 }
 0xf03   :  { %v5528_v3 = vpop.eup %5527 }
 0xf04   :  { %v936_v10 = vmul.f32 %v5528_v3, %v934_v9 }
 0xf67   :  { %v939_v4 = vpop.permute.xlu1 %938 }
 0xf68   :  { %v941_v5 = vmul.f32 %v5528_v3, %v939_v4 }
 0xf6a   :  { %943 = vrot.lane.b32.xlu1 %v941_v5, %s5788_s16 }
 0xf6e   :  { %964 = vrot.lane.b32.xlu1 %v963_v6, %s5789_s17  ;;  %v1059_v6 = vld [vmem:[%s7219_s2 + $0xc] sm:$0x3] }
 0xfdc   :  { %v944_v11 = vpop.permute.xlu1 %943 }
 0xfdd   :  { %v946_v13 = vadd.f32 %v944_v11, %v936_v10 }
 0xfdf   :  { %5529 = vtanh.f32 %v946_v13  ;;  %v954_v14 = vsub.f32 %v946_v13, %v934_v9 }
 0xfe0   :  { %v965_v19 = vpop.permute.xlu1 %964 }
 0xfe1   :  { %v956_v17 = vrot.slane %v954_v14, 2 }
 0xfe3   :  { %957 = vrot.lane.b32.xlu1 %v956_v17, %s5789_s17 }
 0xfe9   :  { %v5530_v18 = vpop.eup %5529 }
 0xfea   :  { %949 = vrot.lane.b32.xlu0 %v5530_v18, %s5787_s3 }
0x1055   :  { %v958_v26 = vpop.permute.xlu1 %957 }
0x1056   :  { %v960_v27 = vmul.f32 %v958_v26, %v953_v20 }
0x1058   :  { %v961_v28 = vadd.f32 %v960_v27, %v858_v41 }
0x105a   :  { %v1038_v57 = vrot.slane %v961_v28, 4 }
0x105c   :  { %1039 = vrot.lane.b32.xlu1 %v1038_v57, %s5788_s16  ;;  %v950_v30 = vpop.permute.xlu0 %949 }
0x105d   :  { %v6121_v31 = vmul.f32 %v5528_v3, %v950_v30 }
0x105f   :  { %v967_v32 = vsub.f32 %v6121_v31, %v965_v19 }
0x1061   :  { %v969_v34 = vrot.slane %v967_v32, 2 }
0x1063   :  { %970 = vrot.lane.b32.xlu0 %v969_v34, %s5788_s16 }
0x10ce   :  { %v1040_v60 = vpop.permute.xlu1 %1039 }
0x10d5   :  { %v971_v36 = vpop.permute.xlu0 %970 }
0x10d6   :  { %v973_v37 = vmul.f32 %v971_v36, %v953_v20 }
0x10d8   :  { %v974_v38 = vadd.f32 %v973_v37, %v869_v48 }
0x10da   :  { %v982_v39 = vpack.c.bf16 %v974_v38, %v974_v38  ;;  %v1069_v58 = vrot.slane %v974_v38, 4 }
0x10dc   :  { %4976 = vmatmul.mubr.msk.bf16.vlgmr.msra.gmra.mrb[24].mxu1 %vm52_vm0, %v982_v39 }
0x10dd   :  { %4988 = vmatpush3.bf16.msra.mxu1 %v5895_v29  ;;  %4991 = vmatprep.mubr.msk.bf16.mxu1 %vm5786_vm1, %v5784_v7 }
0x10de   :  { %4989 = vmatprep.subr.bf16.mxu1 %v5784_v7 }
0x10e1   :  { %4990 = vmatpush3.bf16.msra.mxu1 %v5905_v33 }
0x10e2   :  { %5003 = vmatprep.subr.bf16.mxu1 %v5784_v7 }
0x11af   :  { %v1020_v40 = vpop.f32.mrb[24].mxu1 }
0x11b0   :  { %v1027_v41 = vrot.slane %v1020_v40, 4  ;;  %v4977_v42 = vpop.f32.mrb[25].mxu1 }
0x11b1   :  { %v1023_v43 = vpop.f32.mrb[26].mxu1 }
0x11b2   :  { %v1029_v45 = vadd.f32 %v1027_v41, %v6088_v8  ;;  %v4978_v21 = vpop.f32.mrb[27].mxu1 }
0x11b4   :  { %5531 = vtanh.f32 %v1029_v45  ;;  %v4693_v48 = vmul.f32 -1.442695, %v1029_v45 }
0x11b6   :  { %5533 = vpow2.f32 %v4693_v48 }
0x11be   :  { %v5532_v47 = vpop.eup %5531 }
0x11bf   :  { %1044 = vrot.lane.b32.xlu0 %v5532_v47, %s5787_s3 }
0x11c0   :  { %v5534_v49 = vpop.eup %5533 }
0x11c1   :  { %v1033_v50 = vadd.f32 1.0, %v5534_v49 }
0x11c3   :  { %5535 = vrcp.f32 %v1033_v50 }
0x11cd   :  { %v5536_v52 = vpop.eup %5535 }
0x11ce   :  { %v1042_v61 = vmul.f32 %v5536_v52, %v1040_v60 }
0x1231   :  { %v1045_v53 = vpop.permute.xlu0 %1044 }
0x1232   :  { %v1047_v55 = vmul.f32 %v5536_v52, %v1045_v53 }
0x1234   :  { %1049 = vrot.lane.b32.xlu0 %v1047_v55, %s5788_s16  ;;  %v1165_v55 = vld [vmem:[%s7219_s2 + $0xe] sm:$0x3] }
0x1238   :  { %1070 = vrot.lane.b32.xlu0 %v1069_v58, %s5789_s17 }
0x12a6   :  { %v1050_v63 = vpop.permute.xlu0 %1049 }
0x12a7   :  { %v1052_v1 = vadd.f32 %v1050_v63, %v1042_v61 }
0x12a9   :  { %5537 = vtanh.f32 %v1052_v1  ;;  %v1060_v2 = vsub.f32 %v1052_v1, %v1040_v60 }
0x12aa   :  { %v1071_v5 = vpop.permute.xlu0 %1070 }
0x12ab   :  { %v1062_v3 = vrot.slane %v1060_v2, 4 }
0x12ad   :  { %1063 = vrot.lane.b32.xlu0 %v1062_v3, %s5789_s17 }
0x12b3   :  { %v5538_v4 = vpop.eup %5537 }
0x12b4   :  { %1055 = vrot.lane.b32.xlu1 %v5538_v4, %s5787_s3 }
0x131f   :  { %v1064_v9 = vpop.permute.xlu0 %1063 }
0x1320   :  { %v1066_v10 = vmul.f32 %v1064_v9, %v1059_v6 }
0x1322   :  { %v1067_v11 = vadd.f32 %v1066_v10, %v961_v28  ;;  %v6171_v10 = vld [vmem:[%s7221_s4] ss:$16 sps:$4 sm:$0xff]  }
0x1324   :  { %v1144_v13 = vrot.slane %v1067_v11, 2 }
0x1326   :  { %1145 = vrot.lane.b32.xlu0 %v1144_v13, %s5788_s16  ;;  %v1056_v14 = vpop.permute.xlu1 %1055 }
0x1327   :  { %v6142_v17 = vmul.f32 %v5536_v52, %v1056_v14 }
0x1329   :  { %v1073_v18 = vsub.f32 %v6142_v17, %v1071_v5 }
0x132b   :  { %v1075_v19 = vrot.slane %v1073_v18, 4 }
0x132d   :  { %1076 = vrot.lane.b32.xlu1 %v1075_v19, %s5788_s16 }
0x1398   :  { %v1146_v21 = vpop.permute.xlu0 %1145 }
0x139f   :  { %v1077_v20 = vpop.permute.xlu1 %1076 }
0x13a0   :  { %v1079_v26 = vmul.f32 %v1077_v20, %v1059_v6 }
0x13a2   :  { %v1080_v27 = vadd.f32 %v1079_v26, %v974_v38 }
0x13a4   :  { %v1088_v57 = vpack.c.bf16 %v1080_v27, %v1080_v27  ;;  %v1175_v45 = vrot.slane %v1080_v27, 2 }
0x13a6   :  { %4984 = vmatmul.mubr.msk.bf16.vlgmr.msra.gmra.mrb[16].mxu0 %vm52_vm0, %v1088_v57 }
0x13a7   :  { %4996 = vmatpush3.bf16.msra.mxu0 %v5895_v29  ;;  %4999 = vmatprep.mubr.msk.bf16.mxu0 %vm5786_vm1, %v5784_v7 }
0x13a8   :  { %4997 = vmatprep.subr.bf16.mxu0 %v5784_v7 }
0x13ab   :  { %4998 = vmatpush3.bf16.msra.mxu0 %v5905_v33 }
0x13ac   :  { %5011 = vmatprep.subr.bf16.mxu0 %v5784_v7 }
0x1479   :  { %v1126_v28 = vpop.f32.mrb[16].mxu0 }
0x147a   :  { %v1133_v30 = vrot.slane %v1126_v28, 2  ;;  %v4985_v32 = vpop.f32.mrb[17].mxu0 }
0x147b   :  { %v1129_v34 = vpop.f32.mrb[18].mxu0 }
0x147c   :  { %v1135_v36 = vadd.f32 %v1133_v30, %v6088_v8  ;;  %v4986_v37 = vpop.f32.mrb[19].mxu0 }
0x147e   :  { %5539 = vtanh.f32 %v1135_v36  ;;  %v4695_v29 = vmul.f32 -1.442695, %v1135_v36 }
0x1480   :  { %5541 = vpow2.f32 %v4695_v29 }
0x1488   :  { %v5540_v38 = vpop.eup %5539 }
0x1489   :  { %1150 = vrot.lane.b32.xlu1 %v5540_v38, %s5787_s3 }
0x148a   :  { %v5542_v39 = vpop.eup %5541 }
0x148b   :  { %v1139_v40 = vadd.f32 1.0, %v5542_v39 }
0x148d   :  { %5543 = vrcp.f32 %v1139_v40  ;;  %v1267_v40 = vld [vmem:[%s7219_s2 + $0x10] sm:$0x3] }
0x1497   :  { %v5544_v41 = vpop.eup %5543 }
0x1498   :  { %v1148_v8 = vmul.f32 %v5544_v41, %v1146_v21 }
0x14fb   :  { %v1151_v42 = vpop.permute.xlu1 %1150 }
0x14fc   :  { %v1153_v43 = vmul.f32 %v5544_v41, %v1151_v42 }
0x14fe   :  { %1155 = vrot.lane.b32.xlu1 %v1153_v43, %s5788_s16 }
0x1502   :  { %1176 = vrot.lane.b32.xlu1 %v1175_v45, %s5789_s17 }
0x1570   :  { %v1156_v47 = vpop.permute.xlu1 %1155 }
0x1571   :  { %v1158_v48 = vadd.f32 %v1156_v47, %v1148_v8 }
0x1573   :  { %5545 = vtanh.f32 %v1158_v48  ;;  %v1166_v49 = vsub.f32 %v1158_v48, %v1146_v21 }
0x1574   :  { %v1177_v53 = vpop.permute.xlu1 %1176 }
0x1575   :  { %v1168_v50 = vrot.slane %v1166_v49, 6 }
0x1577   :  { %1169 = vrot.lane.b32.xlu1 %v1168_v50, %s5789_s17 }
0x157d   :  { %v5546_v52 = vpop.eup %5545 }
0x157e   :  { %1161 = vrot.lane.b32.xlu0 %v5546_v52, %s5787_s3 }
0x15e9   :  { %v1170_v58 = vpop.permute.xlu1 %1169 }
0x15ea   :  { %v1172_v60 = vmul.f32 %v1170_v58, %v1165_v55 }
0x15ec   :  { %v1173_v61 = vadd.f32 %v1172_v60, %v1067_v11  ;;  %v6181_v11 = vadd.f32 %v5962_v46, %v5979_v15 }
0x15ee   :  { %1247 = vrot.lane.b32.xlu1 %v1173_v61, %s5788_s16 }
0x15f0   :  { %v1162_v63 = vpop.permute.xlu0 %1161 }
0x15f1   :  { %v6163_v1 = vmul.f32 %v5544_v41, %v1162_v63 }
0x15f3   :  { %v1179_v2 = vsub.f32 %v6163_v1, %v1177_v53  ;;  %v6205_v53 = vld [vmem:[%s7221_s4 + $0x20] ss:$16 sps:$4 sm:$0xff]  }
0x15f5   :  { %v1181_v3 = vrot.slane %v1179_v2, 6 }
0x15f7   :  { %1182 = vrot.lane.b32.xlu0 %v1181_v3, %s5788_s16 }
0x1660   :  { %v1248_v46 = vpop.permute.xlu1 %1247 }
0x1669   :  { %v1183_v4 = vpop.permute.xlu0 %1182 }
0x166a   :  { %v1185_v5 = vmul.f32 %v1183_v4, %v1165_v55 }
0x166c   :  { %v1186_v6 = vadd.f32 %v1185_v5, %v1080_v27 }
0x166e   :  { %v1194_v9 = vpack.c.bf16 %v1186_v6, %v1186_v6 }
0x1670   :  { %4992 = vmatmul.mubr.msk.bf16.vlgmr.msra.gmra.mrb[28].mxu1 %vm52_vm0, %v1194_v9 }
0x1671   :  { %5004 = vmatpush3.bf16.msra.mxu1 %v6171_v10  ;;  %5007 = vmatprep.mubr.msk.bf16.mxu1 %vm5786_vm1, %v5784_v7 }
0x1672   :  { %5005 = vmatprep.subr.bf16.mxu1 %v5784_v7 }
0x1675   :  { %5006 = vmatpush3.bf16.msra.mxu1 %v5905_v33 }
0x1676   :  { %5019 = vmatprep.subr.bf16.mxu1 %v5784_v7 }
0x1743   :  { %v1232_v13 = vpop.f32.mrb[28].mxu1 }
0x1744   :  { %v1238_v14 = vadd.f32 %v1232_v13, %v6181_v11  ;;  %v4993_v18 = vpop.f32.mrb[29].mxu1 }
0x1745   :  { %v1235_v19 = vpop.f32.mrb[30].mxu1 }
0x1746   :  { %5547 = vtanh.f32 %v1238_v14  ;;  %v4994_v20 = vpop.f32.mrb[31].mxu1  ;;  %v4697_v27 = vmul.f32 -1.442695, %v1238_v14 }
0x1748   :  { %5549 = vpow2.f32 %v4697_v27 }
0x1750   :  { %v5548_v26 = vpop.eup %5547 }
0x1751   :  { %1252 = vrot.lane.b32.xlu0 %v5548_v26, %s5787_s3 }
0x1752   :  { %v5550_v57 = vpop.eup %5549 }
0x1753   :  { %v1242_v33 = vadd.f32 1.0, %v5550_v57 }
0x1755   :  { %5551 = vrcp.f32 %v1242_v33 }
0x175f   :  { %v5552_v28 = vpop.eup %5551 }
0x1760   :  { %v1250_v34 = vmul.f32 %v5552_v28, %v1248_v46 }
0x17c3   :  { %v1253_v30 = vpop.permute.xlu0 %1252 }
0x17c4   :  { %v1255_v32 = vmul.f32 %v5552_v28, %v1253_v30 }
0x17c6   :  { %1257 = vrot.lane.b32.xlu0 %v1255_v32, %s5788_s16  ;;  %v1369_v32 = vld [vmem:[%s7219_s2 + $0x12] sm:$0x3] }
0x17ca   :  { %1276 = vrot.lane.b32.xlu0 %v1186_v6, %s5789_s17 }
0x1838   :  { %v1258_v36 = vpop.permute.xlu0 %1257 }
0x1839   :  { %v1260_v37 = vadd.f32 %v1258_v36, %v1250_v34 }
0x183b   :  { %5553 = vtanh.f32 %v1260_v37  ;;  %v1268_v38 = vsub.f32 %v1260_v37, %v1248_v46 }
0x183c   :  { %v1277_v39 = vpop.permute.xlu0 %1276 }
0x183d   :  { %1270 = vrot.lane.b32.xlu0 %v1268_v38, %s5789_s17 }
0x1845   :  { %v5554_v29 = vpop.eup %5553 }
0x1846   :  { %1263 = vrot.lane.b32.xlu1 %v5554_v29, %s5787_s3 }
0x18af   :  { %v1271_v41 = vpop.permute.xlu0 %1270 }
0x18b0   :  { %v1273_v42 = vmul.f32 %v1271_v41, %v1267_v40 }
0x18b2   :  { %v1274_v43 = vadd.f32 %v1273_v42, %v1173_v61 }
0x18b4   :  { %v1348_v45 = vrot.slane %v1274_v43, 6 }
0x18b6   :  { %1349 = vrot.lane.b32.xlu0 %v1348_v45, %s5788_s16 }
0x18b8   :  { %v1264_v21 = vpop.permute.xlu1 %1263 }
0x18b9   :  { %v6193_v8 = vmul.f32 %v5552_v28, %v1264_v21 }
0x18bb   :  { %v1279_v47 = vsub.f32 %v6193_v8, %v1277_v39 }
0x18bd   :  { %1281 = vrot.lane.b32.xlu1 %v1279_v47, %s5788_s16 }
0x1928   :  { %v1350_v19 = vpop.permute.xlu0 %1349 }
0x192f   :  { %v1282_v48 = vpop.permute.xlu1 %1281 }
0x1930   :  { %v1284_v49 = vmul.f32 %v1282_v48, %v1267_v40 }
0x1932   :  { %v1285_v50 = vadd.f32 %v1284_v49, %v1186_v6 }
0x1934   :  { %v1292_v52 = vpack.c.bf16 %v1285_v50, %v1285_v50  ;;  %v1379_v18 = vrot.slane %v1285_v50, 6 }
0x1936   :  { %5000 = vmatmul.mubr.msk.bf16.vlgmr.msra.gmra.mrb[20].mxu0 %vm52_vm0, %v1292_v52 }
0x1937   :  { %5012 = vmatpush3.bf16.msra.mxu0 %v6171_v10  ;;  %5015 = vmatprep.mubr.msk.bf16.mxu0 %vm5786_vm1, %v5784_v7 }
0x1938   :  { %5013 = vmatprep.subr.bf16.mxu0 %v5784_v7 }
0x193b   :  { %5014 = vmatpush3.bf16.msra.mxu0 %v6205_v53 }
0x193c   :  { %5027 = vmatprep.subr.bf16.mxu0 %v5784_v7 }
0x1a09   :  { %v1330_v55 = vpop.f32.mrb[20].mxu0 }
0x1a0a   :  { %v1337_v58 = vrot.slane %v1330_v55, 6  ;;  %v5001_v60 = vpop.f32.mrb[21].mxu0 }
0x1a0b   :  { %v1333_v61 = vpop.f32.mrb[22].mxu0 }
0x1a0c   :  { %v1339_v63 = vadd.f32 %v1337_v58, %v6181_v11  ;;  %v5002_v2 = vpop.f32.mrb[23].mxu0 }
0x1a0e   :  { %5555 = vtanh.f32 %v1339_v63  ;;  %v4699_v4 = vmul.f32 -1.442695, %v1339_v63 }
0x1a10   :  { %5557 = vpow2.f32 %v4699_v4 }
0x1a18   :  { %v5556_v3 = vpop.eup %5555 }
0x1a19   :  { %1354 = vrot.lane.b32.xlu1 %v5556_v3, %s5787_s3 }
0x1a1a   :  { %v5558_v5 = vpop.eup %5557 }
0x1a1b   :  { %v1343_v6 = vadd.f32 1.0, %v5558_v5 }
0x1a1d   :  { %5559 = vrcp.f32 %v1343_v6 }
0x1a27   :  { %v5560_v9 = vpop.eup %5559 }
0x1a28   :  { %v1352_v20 = vmul.f32 %v5560_v9, %v1350_v19 }
0x1a8b   :  { %v1355_v13 = vpop.permute.xlu1 %1354 }
0x1a8c   :  { %v1357_v14 = vmul.f32 %v5560_v9, %v1355_v13 }
0x1a8e   :  { %1359 = vrot.lane.b32.xlu1 %v1357_v14, %s5788_s16 }
0x1a92   :  { %1380 = vrot.lane.b32.xlu1 %v1379_v18, %s5789_s17 }
0x1b00   :  { %v1360_v26 = vpop.permute.xlu1 %1359 }
0x1b01   :  { %v1362_v27 = vadd.f32 %v1360_v26, %v1352_v20  ;;  %v1475_v26 = vld [vmem:[%s7219_s2 + $0x14] sm:$0x3] }
0x1b03   :  { %5561 = vtanh.f32 %v1362_v27  ;;  %v1370_v57 = vsub.f32 %v1362_v27, %v1350_v19 }
0x1b04   :  { %v1381_v30 = vpop.permute.xlu1 %1380 }
0x1b05   :  { %v1372_v33 = vrot.slane %v1370_v57, 2 }
0x1b07   :  { %1373 = vrot.lane.b32.xlu1 %v1372_v33, %s5789_s17 }
0x1b0d   :  { %v5562_v28 = vpop.eup %5561 }
0x1b0e   :  { %1365 = vrot.lane.b32.xlu0 %v5562_v28, %s5787_s3 }
0x1b79   :  { %v1374_v46 = vpop.permute.xlu1 %1373 }
0x1b7a   :  { %v1376_v34 = vmul.f32 %v1374_v46, %v1369_v32 }
0x1b7c   :  { %v1377_v36 = vadd.f32 %v1376_v34, %v1274_v43 }
0x1b7e   :  { %v1454_v37 = vrot.slane %v1377_v36, 4 }
0x1b80   :  { %1455 = vrot.lane.b32.xlu1 %v1454_v37, %s5788_s16  ;;  %v1366_v38 = vpop.permute.xlu0 %1365 }
0x1b81   :  { %v6219_v29 = vmul.f32 %v5560_v9, %v1366_v38 }
0x1b83   :  { %v1383_v39 = vsub.f32 %v6219_v29, %v1381_v30 }
0x1b85   :  { %v1385_v40 = vrot.slane %v1383_v39, 2 }
0x1b87   :  { %1386 = vrot.lane.b32.xlu0 %v1385_v40, %s5788_s16 }
0x1bf2   :  { %v1456_v5 = vpop.permute.xlu1 %1455 }
0x1bf9   :  { %v1387_v41 = vpop.permute.xlu0 %1386 }
0x1bfa   :  { %v1389_v42 = vmul.f32 %v1387_v41, %v1369_v32 }
0x1bfc   :  { %v1390_v45 = vadd.f32 %v1389_v42, %v1285_v50 }
0x1bfe   :  { %v1398_v21 = vpack.c.bf16 %v1390_v45, %v1390_v45  ;;  %v1485_v4 = vrot.slane %v1390_v45, 4 }
0x1c00   :  { %5008 = vmatmul.mubr.msk.bf16.vlgmr.msra.gmra.mrb[32].mxu1 %vm52_vm0, %v1398_v21 }
0x1c01   :  { %5020 = vmatpush3.bf16.msra.mxu1 %v6171_v10  ;;  %5023 = vmatprep.mubr.msk.bf16.mxu1 %vm5786_vm1, %v5784_v7 }
0x1c02   :  { %5021 = vmatprep.subr.bf16.mxu1 %v5784_v7 }
0x1c05   :  { %5022 = vmatpush3.bf16.msra.mxu1 %v6205_v53 }
0x1c06   :  { %5035 = vmatprep.subr.bf16.mxu1 %v5784_v7 }
0x1cd3   :  { %v1436_v43 = vpop.f32.mrb[32].mxu1 }
0x1cd4   :  { %v1443_v47 = vrot.slane %v1436_v43, 4  ;;  %v5009_v48 = vpop.f32.mrb[33].mxu1 }
0x1cd5   :  { %v1439_v49 = vpop.f32.mrb[34].mxu1 }
0x1cd6   :  { %v1445_v50 = vadd.f32 %v1443_v47, %v6181_v11  ;;  %v5010_v52 = vpop.f32.mrb[35].mxu1 }
0x1cd8   :  { %5563 = vtanh.f32 %v1445_v50  ;;  %v4701_v58 = vmul.f32 -1.442695, %v1445_v50 }
0x1cda   :  { %5565 = vpow2.f32 %v4701_v58 }
0x1ce2   :  { %v5564_v55 = vpop.eup %5563 }
0x1ce3   :  { %1460 = vrot.lane.b32.xlu0 %v5564_v55, %s5787_s3 }
0x1ce4   :  { %v5566_v60 = vpop.eup %5565 }
0x1ce5   :  { %v1449_v61 = vadd.f32 1.0, %v5566_v60 }
0x1ce7   :  { %5567 = vrcp.f32 %v1449_v61 }
0x1cf1   :  { %v5568_v63 = vpop.eup %5567 }
0x1cf2   :  { %v1458_v6 = vmul.f32 %v5568_v63, %v1456_v5 }
0x1d55   :  { %v1461_v2 = vpop.permute.xlu0 %1460 }
0x1d56   :  { %v1463_v3 = vmul.f32 %v5568_v63, %v1461_v2 }
0x1d58   :  { %1465 = vrot.lane.b32.xlu0 %v1463_v3, %s5788_s16 }
0x1d5c   :  { %1486 = vrot.lane.b32.xlu0 %v1485_v4, %s5789_s17 }
0x1dca   :  { %v1466_v9 = vpop.permute.xlu0 %1465 }
0x1dcb   :  { %v1468_v13 = vadd.f32 %v1466_v9, %v1458_v6  ;;  %v1581_v9 = vld [vmem:[%s7219_s2 + $0x16] sm:$0x3] }
0x1dcd   :  { %5569 = vtanh.f32 %v1468_v13  ;;  %v1476_v14 = vsub.f32 %v1468_v13, %v1456_v5 }
0x1dce   :  { %v1487_v20 = vpop.permute.xlu0 %1486 }
0x1dcf   :  { %v1478_v18 = vrot.slane %v1476_v14, 4 }
0x1dd1   :  { %1479 = vrot.lane.b32.xlu0 %v1478_v18, %s5789_s17 }
0x1dd7   :  { %v5570_v19 = vpop.eup %5569 }
0x1dd8   :  { %1471 = vrot.lane.b32.xlu1 %v5570_v19, %s5787_s3 }
0x1e43   :  { %v1480_v27 = vpop.permute.xlu0 %1479 }
0x1e44   :  { %v1482_v57 = vmul.f32 %v1480_v27, %v1475_v26 }
0x1e46   :  { %v1483_v33 = vadd.f32 %v1482_v57, %v1377_v36 }
0x1e48   :  { %v1560_v28 = vrot.slane %v1483_v33, 2 }
0x1e4a   :  { %1561 = vrot.lane.b32.xlu0 %v1560_v28, %s5788_s16  ;;  %v1472_v30 = vpop.permute.xlu1 %1471 }
0x1e4b   :  { %v6240_v32 = vmul.f32 %v5568_v63, %v1472_v30 }
0x1e4d   :  { %v1489_v46 = vsub.f32 %v6240_v32, %v1487_v20 }
0x1e4f   :  { %v1491_v34 = vrot.slane %v1489_v46, 4 }
0x1e51   :  { %1492 = vrot.lane.b32.xlu1 %v1491_v34, %s5788_s16 }
0x1ebc   :  { %v1562_v61 = vpop.permute.xlu0 %1561 }
0x1ec3   :  { %v1493_v37 = vpop.permute.xlu1 %1492 }
0x1ec4   :  { %v1495_v38 = vmul.f32 %v1493_v37, %v1475_v26 }
0x1ec6   :  { %v1496_v39 = vadd.f32 %v1495_v38, %v1390_v45 }
0x1ec8   :  { %v1504_v40 = vpack.c.bf16 %v1496_v39, %v1496_v39  ;;  %v1591_v60 = vrot.slane %v1496_v39, 2 }
0x1eca   :  { %5016 = vmatmul.mubr.msk.bf16.vlgmr.msra.gmra.mrb[24].mxu0 %vm52_vm0, %v1504_v40 }
0x1ecb   :  { %5028 = vmatpush3.bf16.msra.mxu0 %v6171_v10  ;;  %5031 = vmatprep.mubr.msk.bf16.mxu0 %vm5786_vm1, %v5784_v7 }
0x1ecc   :  { %5029 = vmatprep.subr.bf16.mxu0 %v5784_v7 }
0x1ecf   :  { %5030 = vmatpush3.bf16.msra.mxu0 %v6205_v53 }
0x1ed0   :  { %5043 = vmatprep.subr.bf16.mxu0 %v5784_v7 }
0x1f9d   :  { %v1542_v36 = vpop.f32.mrb[24].mxu0 }
0x1f9e   :  { %v1549_v41 = vrot.slane %v1542_v36, 2  ;;  %v5017_v42 = vpop.f32.mrb[25].mxu0 }
0x1f9f   :  { %v1545_v21 = vpop.f32.mrb[26].mxu0 }
0x1fa0   :  { %v1551_v45 = vadd.f32 %v1549_v41, %v6181_v11  ;;  %v5018_v43 = vpop.f32.mrb[27].mxu0 }
0x1fa2   :  { %5571 = vtanh.f32 %v1551_v45  ;;  %v4703_v48 = vmul.f32 -1.442695, %v1551_v45 }
0x1fa4   :  { %5573 = vpow2.f32 %v4703_v48 }
0x1fac   :  { %v5572_v47 = vpop.eup %5571 }
0x1fad   :  { %1566 = vrot.lane.b32.xlu1 %v5572_v47, %s5787_s3 }
0x1fae   :  { %v5574_v49 = vpop.eup %5573 }
0x1faf   :  { %v1555_v50 = vadd.f32 1.0, %v5574_v49 }
0x1fb1   :  { %5575 = vrcp.f32 %v1555_v50 }
0x1fbb   :  { %v5576_v52 = vpop.eup %5575 }
0x1fbc   :  { %v1564_v11 = vmul.f32 %v5576_v52, %v1562_v61 }
0x201f   :  { %v1567_v55 = vpop.permute.xlu1 %1566 }
0x2020   :  { %v1569_v58 = vmul.f32 %v5576_v52, %v1567_v55 }
0x2022   :  { %1571 = vrot.lane.b32.xlu1 %v1569_v58, %s5788_s16  ;;  %v1683_v58 = vld [vmem:[%s7219_s2 + $0x18] sm:$0x3] }
0x2026   :  { %1592 = vrot.lane.b32.xlu1 %v1591_v60, %s5789_s17 }
0x2094   :  { %v1572_v63 = vpop.permute.xlu1 %1571 }
0x2095   :  { %v1574_v2 = vadd.f32 %v1572_v63, %v1564_v11 }
0x2097   :  { %5577 = vtanh.f32 %v1574_v2  ;;  %v1582_v3 = vsub.f32 %v1574_v2, %v1562_v61 }
0x2098   :  { %v1593_v6 = vpop.permute.xlu1 %1592 }
0x2099   :  { %v1584_v4 = vrot.slane %v1582_v3, 6 }
0x209b   :  { %1585 = vrot.lane.b32.xlu1 %v1584_v4, %s5789_s17 }
0x20a1   :  { %v5578_v5 = vpop.eup %5577 }
0x20a2   :  { %1577 = vrot.lane.b32.xlu0 %v5578_v5, %s5787_s3 }
0x210d   :  { %v1586_v13 = vpop.permute.xlu1 %1585 }
0x210e   :  { %v1588_v14 = vmul.f32 %v1586_v13, %v1581_v9 }
0x2110   :  { %v1589_v18 = vadd.f32 %v1588_v14, %v1483_v33  ;;  %v6274_v33 = vadd.f32 %v5964_v51, %v5979_v15 }
0x2112   :  { %1663 = vrot.lane.b32.xlu1 %v1589_v18, %s5788_s16 }
0x2114   :  { %v1578_v19 = vpop.permute.xlu0 %1577 }
0x2115   :  { %v6261_v20 = vmul.f32 %v5576_v52, %v1578_v19 }
0x2117   :  { %v1595_v26 = vsub.f32 %v6261_v20, %v1593_v6 }
0x2119   :  { %v1597_v27 = vrot.slane %v1595_v26, 6 }
0x211b   :  { %1598 = vrot.lane.b32.xlu0 %v1597_v27, %s5788_s16 }
0x2184   :  { %v1664_v51 = vpop.permute.xlu1 %1663 }
0x218d   :  { %v1599_v57 = vpop.permute.xlu0 %1598 }
0x218e   :  { %v1601_v28 = vmul.f32 %v1599_v57, %v1581_v9 }
0x2190   :  { %v1602_v30 = vadd.f32 %v1601_v28, %v1496_v39 }
0x2192   :  { %v1610_v46 = vpack.c.bf16 %v1602_v30, %v1602_v30 }
0x2194   :  { %5024 = vmatmul.mubr.msk.bf16.vlgmr.msra.gmra.mrb[36].mxu1 %vm52_vm0, %v1610_v46 }
0x2195   :  { %5036 = vmatpush3.bf16.msra.mxu1 %v6171_v10  ;;  %5039 = vmatprep.mubr.msk.bf16.mxu1 %vm5786_vm1, %v5784_v7 }
0x2196   :  { %5037 = vmatprep.subr.bf16.mxu1 %v5784_v7 }
0x2199   :  { %5038 = vmatpush3.bf16.msra.mxu1 %v6205_v53 }
0x219a   :  { %5051 = vmatprep.subr.bf16.mxu1 %v5784_v7 }
0x2267   :  { %v1648_v34 = vpop.f32.mrb[36].mxu1 }
0x2268   :  { %v1654_v37 = vadd.f32 %v1648_v34, %v6274_v33  ;;  %v5025_v38 = vpop.f32.mrb[37].mxu1 }
0x2269   :  { %v1651_v39 = vpop.f32.mrb[38].mxu1 }
0x226a   :  { %5579 = vtanh.f32 %v1654_v37  ;;  %v5026_v40 = vpop.f32.mrb[39].mxu1  ;;  %v4705_v41 = vmul.f32 -1.442695, %v1654_v37 }
0x226c   :  { %5581 = vpow2.f32 %v4705_v41 }
0x2274   :  { %v5580_v36 = vpop.eup %5579 }
0x2275   :  { %1668 = vrot.lane.b32.xlu0 %v5580_v36, %s5787_s3 }
0x2276   :  { %v5582_v42 = vpop.eup %5581 }
0x2277   :  { %v1658_v21 = vadd.f32 1.0, %v5582_v42 }
0x2279   :  { %5583 = vrcp.f32 %v1658_v21 }
0x2283   :  { %v5584_v45 = vpop.eup %5583 }
0x2284   :  { %v1666_v15 = vmul.f32 %v5584_v45, %v1664_v51 }
0x22e7   :  { %v1669_v43 = vpop.permute.xlu0 %1668 }
0x22e8   :  { %v1671_v47 = vmul.f32 %v5584_v45, %v1669_v43 }
0x22ea   :  { %1673 = vrot.lane.b32.xlu0 %v1671_v47, %s5788_s16 }
0x22ee   :  { %1692 = vrot.lane.b32.xlu0 %v1602_v30, %s5789_s17 }
0x235c   :  { %v1674_v48 = vpop.permute.xlu0 %1673 }
0x235d   :  { %v1676_v49 = vadd.f32 %v1674_v48, %v1666_v15 }
0x235f   :  { %5585 = vtanh.f32 %v1676_v49  ;;  %v1684_v50 = vsub.f32 %v1676_v49, %v1664_v51  ;;  %v1785_v49 = vld [vmem:[%s7219_s2 + $0x1a] sm:$0x3] }
0x2360   :  { %v1693_v55 = vpop.permute.xlu0 %1692 }
0x2361   :  { %1686 = vrot.lane.b32.xlu0 %v1684_v50, %s5789_s17 }
0x2369   :  { %v5586_v52 = vpop.eup %5585 }
0x236a   :  { %1679 = vrot.lane.b32.xlu1 %v5586_v52, %s5787_s3 }
0x23d3   :  { %v1687_v60 = vpop.permute.xlu0 %1686 }
0x23d4   :  { %v1689_v61 = vmul.f32 %v1687_v60, %v1683_v58 }
0x23d6   :  { %v6285_v11 = vadd.f32 %v1689_v61, %v1589_v18  ;;  %v6327_v61 = vld [vmem:[%s7221_s4 + $0x24] ss:$16 sps:$4 sm:$0xff]  }
0x23d8   :  { %v1764_v63 = vrot.slane %v6285_v11, 6 }
0x23da   :  { %1765 = vrot.lane.b32.xlu0 %v1764_v63, %s5788_s16 }
0x23dc   :  { %v1680_v2 = vpop.permute.xlu1 %1679 }
0x23dd   :  { %v6289_v3 = vmul.f32 %v5584_v45, %v1680_v2 }
0x23df   :  { %v1695_v4 = vsub.f32 %v6289_v3, %v1693_v55 }
0x23e1   :  { %1697 = vrot.lane.b32.xlu1 %v1695_v4, %s5788_s16 }
0x244c   :  { %v1766_v39 = vpop.permute.xlu0 %1765 }
0x2453   :  { %v1698_v5 = vpop.permute.xlu1 %1697 }
0x2454   :  { %v1700_v6 = vmul.f32 %v1698_v5, %v1683_v58  ;;  %v6318_v58 = vld [vmem:[%s7221_s4 + $0x4] ss:$16 sps:$4 sm:$0xff]  }
0x2456   :  { %v1701_v9 = vadd.f32 %v1700_v6, %v1602_v30 }
0x2458   :  { %v1708_v13 = vpack.c.bf16 %v1701_v9, %v1701_v9  ;;  %v1795_v38 = vrot.slane %v1701_v9, 6 }
0x245a   :  { %5032 = vmatmul.mubr.msk.bf16.vlgmr.msra.gmra.mrb[28].mxu0 %vm52_vm0, %v1708_v13  ;;  %v6344_v13 = vadd.f32 %v5966_v56, %v5974_v59 }
0x245b   :  { %5044 = vmatpush3.bf16.msra.mxu0 %v6171_v10  ;;  %5047 = vmatprep.mubr.msk.bf16.mxu0 %vm5786_vm1, %v5784_v7 }
0x245c   :  { %5045 = vmatprep.subr.bf16.mxu0 %v5784_v7 }
0x245f   :  { %5046 = vmatpush3.bf16.msra.mxu0 %v6205_v53 }
0x2460   :  { %5059 = vmatprep.subr.bf16.mxu0 %v5784_v7 }
0x252d   :  { %v1746_v14 = vpop.f32.mrb[28].mxu0 }
0x252e   :  { %v1753_v18 = vrot.slane %v1746_v14, 6  ;;  %v5033_v19 = vpop.f32.mrb[29].mxu0 }
0x252f   :  { %v1749_v26 = vpop.f32.mrb[30].mxu0 }
0x2530   :  { %v1755_v27 = vadd.f32 %v1753_v18, %v6274_v33  ;;  %v5034_v57 = vpop.f32.mrb[31].mxu0 }
0x2532   :  { %5587 = vtanh.f32 %v1755_v27  ;;  %v4707_v10 = vmul.f32 -1.442695, %v1755_v27 }
0x2534   :  { %5589 = vpow2.f32 %v4707_v10 }
0x253c   :  { %v5588_v28 = vpop.eup %5587 }
0x253d   :  { %1770 = vrot.lane.b32.xlu1 %v5588_v28, %s5787_s3 }
0x253e   :  { %v5590_v30 = vpop.eup %5589 }
0x253f   :  { %v1759_v46 = vadd.f32 1.0, %v5590_v30 }
0x2541   :  { %5591 = vrcp.f32 %v1759_v46 }
0x254b   :  { %v5592_v34 = vpop.eup %5591 }
0x254c   :  { %v1768_v40 = vmul.f32 %v5592_v34, %v1766_v39 }
0x25af   :  { %v1771_v53 = vpop.permute.xlu1 %1770 }
0x25b0   :  { %v1773_v37 = vmul.f32 %v5592_v34, %v1771_v53 }
0x25b2   :  { %1775 = vrot.lane.b32.xlu1 %v1773_v37, %s5788_s16 }
0x25b6   :  { %1796 = vrot.lane.b32.xlu1 %v1795_v38, %s5789_s17 }
0x2624   :  { %v1776_v36 = vpop.permute.xlu1 %1775 }
0x2625   :  { %v1778_v41 = vadd.f32 %v1776_v36, %v1768_v40 }
0x2627   :  { %5593 = vtanh.f32 %v1778_v41  ;;  %v1786_v42 = vsub.f32 %v1778_v41, %v1766_v39 }
0x2628   :  { %v1797_v51 = vpop.permute.xlu1 %1796 }
0x2629   :  { %v1788_v21 = vrot.slane %v1786_v42, 2 }
0x262b   :  { %1789 = vrot.lane.b32.xlu1 %v1788_v21, %s5789_s17 }
0x2631   :  { %v5594_v45 = vpop.eup %5593 }
0x2632   :  { %1781 = vrot.lane.b32.xlu0 %v5594_v45, %s5787_s3 }
0x269d   :  { %v1790_v14 = vpop.permute.xlu1 %1789 }
0x269e   :  { %v1792_v27 = vmul.f32 %v1790_v14, %v1785_v49 }
0x26a0   :  { %v6348_v10 = vadd.f32 %v1792_v27, %v6285_v11 }
0x26a2   :  { %v1870_v46 = vrot.slane %v6348_v10, 4 }
0x26a4   :  { %v1782_v43 = vpop.permute.xlu0 %1781 }
0x26a5   :  { %v6306_v47 = vmul.f32 %v5592_v34, %v1782_v43 }
0x26a7   :  { %v1799_v15 = vsub.f32 %v6306_v47, %v1797_v51 }
0x26a9   :  { %v1801_v48 = vrot.slane %v1799_v15, 2 }
0x26ab   :  { %1802 = vrot.lane.b32.xlu0 %v1801_v48, %s5788_s16 }
0x271d   :  { %v1803_v50 = vpop.permute.xlu0 %1802 }
0x271e   :  { %v1805_v52 = vmul.f32 %v1803_v50, %v1785_v49 }
0x2720   :  { %v6313_v55 = vadd.f32 %v1805_v52, %v1701_v9 }
0x2722   :  { %v1814_v60 = vpack.c.bf16 %v6313_v55, %v6313_v55  ;;  %v1901_v45 = vrot.slane %v6313_v55, 4 }
0x2724   :  { %5040 = vmatmul.mubr.msk.bf16.vlgmr.msra.gmra.mrb[40].mxu1 %vm52_vm0, %v1814_v60 }
0x2725   :  { %5052 = vmatpush3.bf16.msra.mxu1 %v6318_v58  ;;  %5055 = vmatprep.mubr.msk.bf16.mxu1 %vm5786_vm1, %v5784_v7 }
0x2726   :  { %5053 = vmatprep.subr.bf16.mxu1 %v5784_v7 }
0x2729   :  { %5054 = vmatpush3.bf16.msra.mxu1 %v6327_v61 }
0x272a   :  { %5067 = vmatprep.subr.bf16.mxu1 %v5784_v7 }
0x272c   :  { %5056 = vmatmul.mubr.bf16.vlgmr.msra.gmra.mrb[44].mxu1 %v5785_v12 }
0x272d   :  { %5068 = vmatpush3.bf16.msra.mxu1 %v6318_v58  ;;  %5071 = vmatprep.mubr.msk.bf16.mxu1 %vm5786_vm1, %v5784_v7 }
0x272e   :  { %5069 = vmatprep.subr.bf16.mxu1 %v5784_v7 }
0x2731   :  { %5070 = vmatpush3.bf16.msra.mxu1 %v6327_v61 }
0x2732   :  { %5083 = vmatprep.subr.bf16.mxu1 %v5784_v7 }
0x27f7   :  { %v1852_v63 = vpop.f32.mrb[40].mxu1 }
0x27f8   :  { %v1859_v2 = vrot.slane %v1852_v63, 4  ;;  %v5041_v4 = vpop.f32.mrb[41].mxu1 }
0x27f9   :  { %v1855_v5 = vpop.f32.mrb[42].mxu1 }
0x27fa   :  { %v1861_v6 = vadd.f32 %v1859_v2, %v6274_v33  ;;  %v5042_v9 = vpop.f32.mrb[43].mxu1 }
0x27fc   :  { %5595 = vtanh.f32 %v1861_v6  ;;  %v4709_v59 = vmul.f32 -1.442695, %v1861_v6 }
0x27ff   :  { %v2051_v18 = vpop.f32.mrb[44].mxu1 }
0x2800   :  { %v2057_v19 = vadd.f32 %v2051_v18, %v6344_v13  ;;  %v5057_v26 = vpop.f32.mrb[45].mxu1 }
0x2801   :  { %v2054_v57 = vpop.f32.mrb[46].mxu1 }
0x2802   :  { %5597 = vtanh.f32 %v2057_v19  ;;  %v5058_v28 = vpop.f32.mrb[47].mxu1  ;;  %v4714_v34 = vmul.f32 -1.442695, %v2057_v19  ;;  %v6375_v19 = vld [vmem:[%s7219_s2 + $0x1c] sm:$0x3] }
0x2803   :  { %5599 = vpow2.f32 %v4709_v59  ;;  %v2082_v28 = vld [vmem:[%s7219_s2 + $0x20] sm:$0x3] }
0x2804   :  { %5601 = vpow2.f32 %v4714_v34 }
0x2806   :  { %v5596_v30 = vpop.eup %5595 }
0x2807   :  { %1876 = vrot.lane.b32.xlu0 %v5596_v30, %s5787_s3 }
0x280b   :  { %1871 = vrot.lane.b32.xlu0 %v1870_v46, %s5788_s16 }
0x280c   :  { %v5598_v56 = vpop.eup %5597 }
0x280d   :  { %2067 = vrot.lane.b32.xlu1 %v5598_v56, %s5787_s3  ;;  %v5600_v53 = vpop.eup %5599 }
0x280e   :  { %v1865_v37 = vadd.f32 1.0, %v5600_v53  ;;  %v5602_v38 = vpop.eup %5601 }
0x280f   :  { %v2061_v11 = vadd.f32 1.0, %v5602_v38 }
0x2810   :  { %5603 = vrcp.f32 %v1865_v37 }
0x2811   :  { %5605 = vrcp.f32 %v2061_v11 }
0x281a   :  { %v5604_v39 = vpop.eup %5603 }
0x281b   :  { %v5606_v41 = vpop.eup %5605 }
0x281c   :  { %v2065_v49 = vmul.f32 0.0, %v5606_v41 }
0x2879   :  { %v1877_v40 = vpop.permute.xlu0 %1876 }
0x287a   :  { %v1879_v36 = vmul.f32 %v5604_v39, %v1877_v40 }
0x287c   :  { %1881 = vrot.lane.b32.xlu1 %v1879_v36, %s5788_s16 }
0x287d   :  { %v6358_v43 = vpop.permute.xlu0 %1871 }
0x287e   :  { %v1874_v51 = vmul.f32 %v5604_v39, %v6358_v43 }
0x287f   :  { %v2068_v42 = vpop.permute.xlu1 %2067 }
0x2880   :  { %v2070_v21 = vmul.f32 %v5606_v41, %v2068_v42 }
0x2882   :  { %2072 = vrot.lane.b32.xlu0 %v2070_v21, %s5788_s16 }
0x2886   :  { %1902 = vrot.lane.b32.xlu0 %v1901_v45, %s5789_s17 }
0x28ee   :  { %v1882_v15 = vpop.permute.xlu1 %1881 }
0x28ef   :  { %v6361_v48 = vadd.f32 %v1882_v15, %v1874_v51 }
0x28f1   :  { %5607 = vtanh.f32 %v6361_v48 }
0x28f4   :  { %v2073_v50 = vpop.permute.xlu0 %2072 }
0x28f5   :  { %v2075_v52 = vadd.f32 %v2073_v50, %v2065_v49 }
0x28f7   :  { %5609 = vtanh.f32 %v2075_v52 }
0x28f8   :  { %v1903_v5 = vpop.permute.xlu0 %1902 }
0x28fb   :  { %v5608_v60 = vpop.eup %5607 }
0x28fc   :  { %1887 = vrot.lane.b32.xlu1 %v5608_v60, %s5787_s3 }
0x2901   :  { %v5610_v63 = vpop.eup %5609 }
0x2902   :  { %2078 = vrot.lane.b32.xlu1 %v5610_v63, %s5787_s3 }
0x296e   :  { %v1888_v2 = vpop.permute.xlu1 %1887 }
0x296f   :  { %v6366_v4 = vmul.f32 %v5604_v39, %v1888_v2 }
0x2971   :  { %v1905_v6 = vsub.f32 %v6366_v4, %v1903_v5 }
0x2973   :  { %v1907_v9 = vrot.slane %v1905_v6, 4 }
0x2974   :  { %v2079_v14 = vpop.permute.xlu1 %2078 }
0x2975   :  { %v2081_v18 = vmul.f32 %v5606_v41, %v2079_v14  ;;  %1908 = vrot.lane.b32.xlu0 %v1907_v9, %s5788_s16 }
0x2977   :  { %2090 = vrot.lane.b32.xlu1 %v2081_v18, %s5788_s16 }
0x2979   :  { %2084 = vrot.lane.b32.xlu0 %v2075_v52, %s5789_s17 }
0x29e7   :  { %v1909_v26 = vpop.permute.xlu0 %1908 }
0x29e8   :  { %v1911_v27 = vmul.f32 %v1909_v26, %v6375_v19 }
0x29e9   :  { %v2091_v59 = vpop.permute.xlu1 %2090 }
0x29ea   :  { %v1912_v57 = vadd.f32 %v1911_v27, %v6313_v55  ;;  %v6386_v53 = vmul.f32 %v2091_v59, %v2082_v28 }
0x29eb   :  { %v2085_v30 = vpop.permute.xlu0 %2084 }
0x29ec   :  { %v1920_v46 = vpack.c.bf16 %v1912_v57, %v1912_v57  ;;  %v2087_v56 = vmul.f32 %v2085_v30, %v2082_v28  ;;  %v2095_v55 = vpack.c.bf16 %v6386_v53, %v6386_v53  ;;  %v2182_v2 = vrot.slane %v6386_v53, 6  ;;  %v2172_v28 = vld [vmem:[%s7219_s2 + $0x22] sm:$0x3] }
0x29ee   :  { %v2151_v34 = vrot.slane %v2087_v56, 6  ;;  %5048 = vmatmul.mubr.msk.bf16.vlgmr.msra.gmra.mrb[32].mxu0 %vm52_vm0, %v1920_v46 }
0x29ef   :  { %5060 = vmatpush3.bf16.msra.mxu0 %v6318_v58  ;;  %5063 = vmatprep.mubr.msk.bf16.mxu0 %vm5786_vm1, %v5784_v7 }
0x29f0   :  { %2152 = vrot.lane.b32.xlu0 %v2151_v34, %s5788_s16  ;;  %5061 = vmatprep.subr.bf16.mxu0 %v5784_v7 }
0x29f3   :  { %5062 = vmatpush3.bf16.msra.mxu0 %v6327_v61 }
0x29f4   :  { %5075 = vmatprep.subr.bf16.mxu0 %v5784_v7 }
0x29f6   :  { %5064 = vmatmul.mubr.msk.bf16.vlgmr.msra.gmra.mrb[36].mxu0 %vm52_vm0, %v2095_v55 }
0x29f7   :  { %5076 = vmatpush3.bf16.msra.mxu0 %v6318_v58  ;;  %5079 = vmatprep.mubr.msk.bf16.mxu0 %vm5786_vm1, %v5784_v7 }
0x29f8   :  { %5077 = vmatprep.subr.bf16.mxu0 %v5784_v7 }
0x29fb   :  { %5078 = vmatpush3.bf16.msra.mxu0 %v6327_v61 }
0x29fc   :  { %5091 = vmatprep.subr.bf16.mxu0 %v5784_v7 }
0x2a62   :  { %v2153_v5 = vpop.permute.xlu0 %2152 }
0x2ac1   :  { %v6401_v37 = vpop.f32.mrb[32].mxu0 }
0x2ac2   :  { %v5049_v38 = vpop.f32.mrb[33].mxu0 }
0x2ac3   :  { %v1961_v11 = vpop.f32.mrb[34].mxu0 }
0x2ac4   :  { %v5050_v39 = vpop.f32.mrb[35].mxu0 }
0x2ac9   :  { %v2133_v40 = vpop.f32.mrb[36].mxu0 }
0x2aca   :  { %v2140_v36 = vrot.slane %v2133_v40, 6  ;;  %v5065_v41 = vpop.f32.mrb[37].mxu0 }
0x2acb   :  { %v2136_v42 = vpop.f32.mrb[38].mxu0 }
0x2acc   :  { %v2142_v21 = vadd.f32 %v2140_v36, %v6344_v13  ;;  %v5066_v45 = vpop.f32.mrb[39].mxu0 }
0x2ace   :  { %5611 = vtanh.f32 %v2142_v21  ;;  %v4716_v15 = vmul.f32 -1.442695, %v2142_v21 }
0x2ad0   :  { %5613 = vpow2.f32 %v4716_v15 }
0x2ad8   :  { %v5612_v51 = vpop.eup %5611 }
0x2ad9   :  { %2157 = vrot.lane.b32.xlu1 %v5612_v51, %s5787_s3 }
0x2ada   :  { %v5614_v49 = vpop.eup %5613 }
0x2adb   :  { %v2146_v50 = vadd.f32 1.0, %v5614_v49 }
0x2add   :  { %5615 = vrcp.f32 %v2146_v50 }
0x2ae7   :  { %v5616_v52 = vpop.eup %5615 }
0x2ae8   :  { %v2155_v6 = vmul.f32 %v5616_v52, %v2153_v5 }
0x2b4b   :  { %v2158_v60 = vpop.permute.xlu1 %2157 }
0x2b4c   :  { %v2160_v63 = vmul.f32 %v5616_v52, %v2158_v60 }
0x2b4e   :  { %2162 = vrot.lane.b32.xlu1 %v2160_v63, %s5788_s16 }
0x2b52   :  { %2183 = vrot.lane.b32.xlu1 %v2182_v2, %s5789_s17 }
0x2bc0   :  { %v2163_v9 = vpop.permute.xlu1 %2162 }
0x2bc1   :  { %v2165_v14 = vadd.f32 %v2163_v9, %v2155_v6 }
0x2bc3   :  { %5617 = vtanh.f32 %v2165_v14  ;;  %v2173_v18 = vsub.f32 %v2165_v14, %v2153_v5 }
0x2bc4   :  { %v2184_v57 = vpop.permute.xlu1 %2183 }
0x2bc5   :  { %v2175_v26 = vrot.slane %v2173_v18, 2 }
0x2bc7   :  { %2176 = vrot.lane.b32.xlu1 %v2175_v26, %s5789_s17 }
0x2bcd   :  { %v5618_v27 = vpop.eup %5617 }
0x2bce   :  { %2168 = vrot.lane.b32.xlu0 %v5618_v27, %s5787_s3 }
0x2c39   :  { %v2177_v30 = vpop.permute.xlu1 %2176 }
0x2c3a   :  { %v2179_v46 = vmul.f32 %v2177_v30, %v2172_v28 }
0x2c3c   :  { %v2180_v59 = vadd.f32 %v2179_v46, %v2087_v56 }
0x2c3e   :  { %v2257_v34 = vrot.slane %v2180_v59, 4 }
0x2c40   :  { %2258 = vrot.lane.b32.xlu1 %v2257_v34, %s5788_s16  ;;  %v2169_v55 = vpop.permute.xlu0 %2168  ;;  %v2278_v34 = vld [vmem:[%s7219_s2 + $0x24] sm:$0x3] }
0x2c41   :  { %v6414_v38 = vmul.f32 %v5616_v52, %v2169_v55 }
0x2c43   :  { %v2186_v11 = vsub.f32 %v6414_v38, %v2184_v57 }
0x2c45   :  { %v2188_v39 = vrot.slane %v2186_v11, 2 }
0x2c47   :  { %2189 = vrot.lane.b32.xlu0 %v2188_v39, %s5788_s16 }
0x2cb2   :  { %v2259_v14 = vpop.permute.xlu1 %2258 }
0x2cb9   :  { %v2190_v40 = vpop.permute.xlu0 %2189 }
0x2cba   :  { %v2192_v36 = vmul.f32 %v2190_v40, %v2172_v28 }
0x2cbc   :  { %v2193_v41 = vadd.f32 %v2192_v36, %v6386_v53 }
0x2cbe   :  { %v2201_v42 = vpack.c.bf16 %v2193_v41, %v2193_v41  ;;  %v2288_v9 = vrot.slane %v2193_v41, 4 }
0x2cc0   :  { %5072 = vmatmul.mubr.msk.bf16.vlgmr.msra.gmra.mrb[48].mxu1 %vm52_vm0, %v2201_v42 }
0x2cc1   :  { %5084 = vmatpush3.bf16.msra.mxu1 %v6318_v58  ;;  %5087 = vmatprep.mubr.msk.bf16.mxu1 %vm5786_vm1, %v5784_v7 }
0x2cc2   :  { %5085 = vmatprep.subr.bf16.mxu1 %v5784_v7 }
0x2cc5   :  { %5086 = vmatpush3.bf16.msra.mxu1 %v6327_v61 }
0x2cc6   :  { %5099 = vmatprep.subr.bf16.mxu1 %v5784_v7 }
0x2d93   :  { %v2239_v56 = vpop.f32.mrb[48].mxu1 }
0x2d94   :  { %v2246_v21 = vrot.slane %v2239_v56, 4  ;;  %v5073_v45 = vpop.f32.mrb[49].mxu1 }
0x2d95   :  { %v2242_v51 = vpop.f32.mrb[50].mxu1 }
0x2d96   :  { %v2248_v15 = vadd.f32 %v2246_v21, %v6344_v13  ;;  %v5074_v49 = vpop.f32.mrb[51].mxu1 }
0x2d98   :  { %5619 = vtanh.f32 %v2248_v15  ;;  %v4718_v52 = vmul.f32 -1.442695, %v2248_v15 }
0x2d9a   :  { %5621 = vpow2.f32 %v4718_v52 }
0x2da2   :  { %v5620_v50 = vpop.eup %5619 }
0x2da3   :  { %2263 = vrot.lane.b32.xlu0 %v5620_v50, %s5787_s3 }
0x2da4   :  { %v5622_v60 = vpop.eup %5621 }
0x2da5   :  { %v2252_v63 = vadd.f32 1.0, %v5622_v60 }
0x2da7   :  { %5623 = vrcp.f32 %v2252_v63 }
0x2db1   :  { %v5624_v2 = vpop.eup %5623 }
0x2db2   :  { %v2261_v18 = vmul.f32 %v5624_v2, %v2259_v14 }
0x2e15   :  { %v2264_v5 = vpop.permute.xlu0 %2263 }
0x2e16   :  { %v2266_v6 = vmul.f32 %v5624_v2, %v2264_v5 }
0x2e18   :  { %2268 = vrot.lane.b32.xlu0 %v2266_v6, %s5788_s16 }
0x2e1c   :  { %2289 = vrot.lane.b32.xlu0 %v2288_v9, %s5789_s17 }
0x2e8a   :  { %v2269_v26 = vpop.permute.xlu0 %2268 }
0x2e8b   :  { %v2271_v27 = vadd.f32 %v2269_v26, %v2261_v18 }
0x2e8d   :  { %5625 = vtanh.f32 %v2271_v27  ;;  %v2279_v57 = vsub.f32 %v2271_v27, %v2259_v14 }
0x2e8e   :  { %v2290_v46 = vpop.permute.xlu0 %2289 }
0x2e8f   :  { %v2281_v28 = vrot.slane %v2279_v57, 4 }
0x2e91   :  { %2282 = vrot.lane.b32.xlu0 %v2281_v28, %s5789_s17 }
0x2e97   :  { %v5626_v30 = vpop.eup %5625 }
0x2e98   :  { %2274 = vrot.lane.b32.xlu1 %v5626_v30, %s5787_s3 }
0x2f03   :  { %v2283_v55 = vpop.permute.xlu0 %2282 }
0x2f04   :  { %v2285_v11 = vmul.f32 %v2283_v55, %v2278_v34 }
0x2f06   :  { %v2286_v39 = vadd.f32 %v2285_v11, %v2180_v59 }
0x2f08   :  { %v2363_v40 = vrot.slane %v2286_v39, 2 }
0x2f0a   :  { %2364 = vrot.lane.b32.xlu0 %v2363_v40, %s5788_s16  ;;  %v2275_v36 = vpop.permute.xlu1 %2274  ;;  %v2384_v40 = vld [vmem:[%s7219_s2 + $0x26] sm:$0x3] }
0x2f0b   :  { %v6436_v42 = vmul.f32 %v5624_v2, %v2275_v36 }
0x2f0d   :  { %v2292_v56 = vsub.f32 %v6436_v42, %v2290_v46 }
0x2f0f   :  { %v2294_v21 = vrot.slane %v2292_v56, 4 }
0x2f11   :  { %2295 = vrot.lane.b32.xlu1 %v2294_v21, %s5788_s16 }
0x2f7c   :  { %v2365_v57 = vpop.permute.xlu0 %2364 }
0x2f83   :  { %v2296_v45 = vpop.permute.xlu1 %2295 }
0x2f84   :  { %v2298_v51 = vmul.f32 %v2296_v45, %v2278_v34 }
0x2f86   :  { %v2299_v15 = vadd.f32 %v2298_v51, %v2193_v41 }
0x2f88   :  { %v2307_v49 = vpack.c.bf16 %v2299_v15, %v2299_v15  ;;  %v2394_v27 = vrot.slane %v2299_v15, 2 }
0x2f8a   :  { %5080 = vmatmul.mubr.msk.bf16.vlgmr.msra.gmra.mrb[40].mxu0 %vm52_vm0, %v2307_v49 }
0x2f8b   :  { %5092 = vmatpush3.bf16.msra.mxu0 %v6318_v58  ;;  %5095 = vmatprep.mubr.msk.bf16.mxu0 %vm5786_vm1, %v5784_v7 }
0x2f8c   :  { %5093 = vmatprep.subr.bf16.mxu0 %v5784_v7 }
0x2f8f   :  { %5094 = vmatpush3.bf16.msra.mxu0 %v6327_v61 }
0x2f90   :  { %5107 = vmatprep.subr.bf16.mxu0 %v5784_v7 }
0x305d   :  { %v2345_v59 = vpop.f32.mrb[40].mxu0 }
0x305e   :  { %v2352_v50 = vrot.slane %v2345_v59, 2  ;;  %v5081_v52 = vpop.f32.mrb[41].mxu0 }
0x305f   :  { %v2348_v60 = vpop.f32.mrb[42].mxu0 }
0x3060   :  { %v2354_v41 = vadd.f32 %v2352_v50, %v6344_v13  ;;  %v5082_v63 = vpop.f32.mrb[43].mxu0 }
0x3062   :  { %5627 = vtanh.f32 %v2354_v41  ;;  %v4720_v5 = vmul.f32 -1.442695, %v2354_v41 }
0x3064   :  { %5629 = vpow2.f32 %v4720_v5 }
0x306c   :  { %v5628_v2 = vpop.eup %5627 }
0x306d   :  { %2369 = vrot.lane.b32.xlu1 %v5628_v2, %s5787_s3 }
0x306e   :  { %v5630_v6 = vpop.eup %5629 }
0x306f   :  { %v2358_v9 = vadd.f32 1.0, %v5630_v6 }
0x3071   :  { %5631 = vrcp.f32 %v2358_v9 }
0x307b   :  { %v5632_v14 = vpop.eup %5631 }
0x307c   :  { %v2367_v13 = vmul.f32 %v5632_v14, %v2365_v57 }
0x30df   :  { %v2370_v18 = vpop.permute.xlu1 %2369 }
0x30e0   :  { %v2372_v26 = vmul.f32 %v5632_v14, %v2370_v18 }
0x30e2   :  { %2374 = vrot.lane.b32.xlu1 %v2372_v26, %s5788_s16 }
0x30e6   :  { %2395 = vrot.lane.b32.xlu1 %v2394_v27, %s5789_s17 }
0x3154   :  { %v2375_v28 = vpop.permute.xlu1 %2374 }
0x3155   :  { %v2377_v30 = vadd.f32 %v2375_v28, %v2367_v13 }
0x3157   :  { %5633 = vtanh.f32 %v2377_v30  ;;  %v2385_v46 = vsub.f32 %v2377_v30, %v2365_v57 }
0x3158   :  { %v2396_v11 = vpop.permute.xlu1 %2395 }
0x3159   :  { %v2387_v34 = vrot.slane %v2385_v46, 6 }
0x315b   :  { %2388 = vrot.lane.b32.xlu1 %v2387_v34, %s5789_s17 }
0x3161   :  { %v5634_v55 = vpop.eup %5633 }
0x3162   :  { %2380 = vrot.lane.b32.xlu0 %v5634_v55, %s5787_s3 }
0x31cd   :  { %v2389_v36 = vpop.permute.xlu1 %2388 }
0x31ce   :  { %v2391_v56 = vmul.f32 %v2389_v36, %v2384_v40 }
0x31d0   :  { %v2392_v21 = vadd.f32 %v2391_v56, %v2286_v39 }
0x31d2   :  { %2466 = vrot.lane.b32.xlu1 %v2392_v21, %s5788_s16 }
0x31d4   :  { %v2381_v45 = vpop.permute.xlu0 %2380 }
0x31d5   :  { %v6457_v51 = vmul.f32 %v5632_v14, %v2381_v45 }
0x31d7   :  { %v2398_v49 = vsub.f32 %v6457_v51, %v2396_v11 }
0x31d9   :  { %v2400_v59 = vrot.slane %v2398_v49, 6 }
0x31db   :  { %2401 = vrot.lane.b32.xlu0 %v2400_v59, %s5788_s16 }
0x3244   :  { %v2467_v13 = vpop.permute.xlu1 %2466 }
0x324d   :  { %v2402_v50 = vpop.permute.xlu0 %2401 }
0x324e   :  { %v2404_v52 = vmul.f32 %v2402_v50, %v2384_v40  ;;  %v2486_v40 = vld [vmem:[%s7219_s2 + $0x28] sm:$0x3] }
0x3250   :  { %v2405_v60 = vadd.f32 %v2404_v52, %v2299_v15 }
0x3252   :  { %v2413_v41 = vpack.c.bf16 %v2405_v60, %v2405_v60 }
0x3254   :  { %5088 = vmatmul.mubr.msk.bf16.vlgmr.msra.gmra.mrb[52].mxu1 %vm52_vm0, %v2413_v41 }
0x3255   :  { %5100 = vmatpush3.bf16.msra.mxu1 %v6318_v58  ;;  %5103 = vmatprep.mubr.msk.bf16.mxu1 %vm5786_vm1, %v5784_v7 }
0x3256   :  { %5101 = vmatprep.subr.bf16.mxu1 %v5784_v7 }
0x3259   :  { %5102 = vmatpush3.bf16.msra.mxu1 %v6327_v61 }
0x3327   :  { %v2451_v39 = vpop.f32.mrb[52].mxu1 }
0x3328   :  { %v2457_v63 = vadd.f32 %v2451_v39, %v5977_v62  ;;  %v5089_v2 = vpop.f32.mrb[53].mxu1 }
0x3329   :  { %v2454_v5 = vpop.f32.mrb[54].mxu1 }
0x332a   :  { %5635 = vtanh.f32 %v2457_v63  ;;  %v5090_v6 = vpop.f32.mrb[55].mxu1  ;;  %v4722_v9 = vmul.f32 -1.442695, %v2457_v63 }
0x332c   :  { %5637 = vpow2.f32 %v4722_v9 }
0x3334   :  { %v5636_v15 = vpop.eup %5635 }
0x3335   :  { %2471 = vrot.lane.b32.xlu0 %v5636_v15, %s5787_s3 }
0x3336   :  { %v5638_v14 = vpop.eup %5637 }
0x3337   :  { %v2461_v18 = vadd.f32 1.0, %v5638_v14 }
0x3339   :  { %5639 = vrcp.f32 %v2461_v18 }
0x3343   :  { %v5640_v26 = vpop.eup %5639 }
0x3344   :  { %v2469_v28 = vmul.f32 %v5640_v26, %v2467_v13 }
0x33a7   :  { %v2472_v27 = vpop.permute.xlu0 %2471 }
0x33a8   :  { %v2474_v57 = vmul.f32 %v5640_v26, %v2472_v27 }
0x33aa   :  { %2476 = vrot.lane.b32.xlu0 %v2474_v57, %s5788_s16 }
0x33ae   :  { %2495 = vrot.lane.b32.xlu0 %v2405_v60, %s5789_s17 }
0x341c   :  { %v2477_v30 = vpop.permute.xlu0 %2476 }
0x341d   :  { %v2479_v46 = vadd.f32 %v2477_v30, %v2469_v28 }
0x341f   :  { %5641 = vtanh.f32 %v2479_v46  ;;  %v2487_v34 = vsub.f32 %v2479_v46, %v2467_v13 }
0x3420   :  { %v2496_v11 = vpop.permute.xlu0 %2495 }
0x3421   :  { %2489 = vrot.lane.b32.xlu0 %v2487_v34, %s5789_s17 }
0x3429   :  { %v5642_v55 = vpop.eup %5641 }
0x342a   :  { %2482 = vrot.lane.b32.xlu1 %v5642_v55, %s5787_s3 }
0x3493   :  { %v2490_v36 = vpop.permute.xlu0 %2489 }
0x3494   :  { %v2492_v56 = vmul.f32 %v2490_v36, %v2486_v40 }
0x3496   :  { %v2493_v45 = vadd.f32 %v2492_v56, %v2392_v21  ;;  %v6496_v56 = vld [vmem:[%s7219_s2 + $0x2a] sm:$0x3] }
0x3498   :  { %v2567_v49 = vrot.slane %v2493_v45, 6 }
0x349a   :  { %2568 = vrot.lane.b32.xlu0 %v2567_v49, %s5788_s16 }
0x349c   :  { %v2483_v59 = vpop.permute.xlu1 %2482 }
0x349d   :  { %v6477_v50 = vmul.f32 %v5640_v26, %v2483_v59 }
0x349f   :  { %v2498_v52 = vsub.f32 %v6477_v50, %v2496_v11 }
0x34a1   :  { %2500 = vrot.lane.b32.xlu1 %v2498_v52, %s5788_s16 }
0x350c   :  { %v2569_v28 = vpop.permute.xlu0 %2568 }
0x3513   :  { %v2501_v41 = vpop.permute.xlu1 %2500 }
0x3514   :  { %v2503_v39 = vmul.f32 %v2501_v41, %v2486_v40  ;;  %v6504_v41 = vld [vmem:[%s7221_s4 + $0xc] ss:$16 sps:$4 sm:$0xff]  }
0x3515   :  { %2859 = vmatprep.subr.bf16.mxu1 %v6504_v41 }
0x3516   :  { %v2504_v63 = vadd.f32 %v2503_v39, %v2405_v60 }
0x3518   :  { %v2511_v2 = vpack.c.bf16 %v2504_v63, %v2504_v63 }
0x351a   :  { %5096 = vmatmul.mubr.msk.bf16.vlgmr.msra.gmra.mrb[44].mxu0 %vm52_vm0, %v2511_v2 }
0x351b   :  { %5108 = vmatpush3.bf16.msra.mxu0 %v6318_v58  ;;  %5111 = vmatprep.mubr.msk.bf16.mxu0 %vm5786_vm1, %v5784_v7 }
0x351c   :  { %5109 = vmatprep.subr.bf16.mxu0 %v5784_v7 }
0x351f   :  { %5110 = vmatpush3.bf16.msra.mxu0 %v6327_v61  ;;  %v2598_v61 = vrot.slane %v2504_v63, 6 }
0x3520   :  { %2947 = vmatprep.subr.bf16.mxu0 %v6504_v41 }
0x35ed   :  { %v2549_v21 = vpop.f32.mrb[44].mxu0 }
0x35ee   :  { %v2556_v5 = vrot.slane %v2549_v21, 6  ;;  %v5097_v6 = vpop.f32.mrb[45].mxu0 }
0x35ef   :  { %v2552_v15 = vpop.f32.mrb[46].mxu0 }
0x35f0   :  { %v2558_v9 = vadd.f32 %v2556_v5, %v5977_v62  ;;  %v5098_v14 = vpop.f32.mrb[47].mxu0 }
0x35f1   :  { %v6520_v14 = vld [vmem:[%s7221_s4 + $0x8] ss:$16 sps:$4 sm:$0xff]  }
0x35f2   :  { %5643 = vtanh.f32 %v2558_v9  ;;  %v4724_v18 = vmul.f32 -1.442695, %v2558_v9 }
0x35f4   :  { %5645 = vpow2.f32 %v4724_v18  ;;  %v6527_v18 = vld [vmem:[%s7221_s4 + $0x2c] ss:$16 sps:$4 sm:$0xff]  }
0x35fc   :  { %v5644_v60 = vpop.eup %5643 }
0x35fd   :  { %2573 = vrot.lane.b32.xlu1 %v5644_v60, %s5787_s3 }
0x35fe   :  { %v5646_v58 = vpop.eup %5645 }
0x35ff   :  { %v2562_v26 = vadd.f32 1.0, %v5646_v58  ;;  %v6541_v58 = vld [vmem:[%s7221_s4 + $0x4c] ss:$16 sps:$4 sm:$0xff]  }
0x3601   :  { %5647 = vrcp.f32 %v2562_v26  ;;  %v6547_v26 = vld [vmem:[%s7221_s4 + $0x48] ss:$16 sps:$4 sm:$0xff]  }
0x360b   :  { %v5648_v27 = vpop.eup %5647 }
0x360c   :  { %v2571_v30 = vmul.f32 %v5648_v27, %v2569_v28 }
0x366f   :  { %v2574_v57 = vpop.permute.xlu1 %2573 }
0x3670   :  { %v2576_v13 = vmul.f32 %v5648_v27, %v2574_v57  ;;  %v6559_v57 = vld [vmem:[%s7221_s4 + $0x68] ss:$16 sps:$4 sm:$0xff]  }
0x3672   :  { %2578 = vrot.lane.b32.xlu1 %v2576_v13, %s5788_s16 }
0x3676   :  { %2599 = vrot.lane.b32.xlu1 %v2598_v61, %s5789_s17 }
0x36e4   :  { %v2579_v46 = vpop.permute.xlu1 %2578 }
0x36e5   :  { %v2581_v34 = vadd.f32 %v2579_v46, %v2571_v30 }
0x36e7   :  { %5649 = vtanh.f32 %v2581_v34  ;;  %v2589_v55 = vsub.f32 %v2581_v34, %v2569_v28 }
0x36e8   :  { %v2600_v36 = vpop.permute.xlu1 %2599 }
0x36e9   :  { %v2591_v11 = vrot.slane %v2589_v55, 2 }
0x36eb   :  { %2592 = vrot.lane.b32.xlu1 %v2591_v11, %s5789_s17 }
0x36f1   :  { %v5650_v40 = vpop.eup %5649 }
0x36f2   :  { %2584 = vrot.lane.b32.xlu0 %v5650_v40, %s5787_s3 }
0x375d   :  { %v2593_v49 = vpop.permute.xlu1 %2592 }
0x375e   :  { %v2595_v59 = vmul.f32 %v2593_v49, %v6496_v56 }
0x3760   :  { %v6499_v52 = vadd.f32 %v2595_v59, %v2493_v45 }
0x3762   :  { %v2673_v39 = vrot.slane %v6499_v52, 4 }
0x3764   :  { %2674 = vrot.lane.b32.xlu1 %v2673_v39, %s5788_s16  ;;  %v2585_v2 = vpop.permute.xlu0 %2584 }
0x3765   :  { %v6510_v21 = vmul.f32 %v5648_v27, %v2585_v2  ;;  %v6553_v27 = vld [vmem:[%s7221_s4 + $0x6c] ss:$16 sps:$4 sm:$0xff]  }
0x3767   :  { %v2602_v5 = vsub.f32 %v6510_v21, %v2600_v36 }
0x3769   :  { %v2604_v45 = vrot.slane %v2602_v5, 2 }
0x376b   :  { %2605 = vrot.lane.b32.xlu0 %v2604_v45, %s5788_s16 }
0x37dd   :  { %v2606_v6 = vpop.permute.xlu0 %2605 }
0x37de   :  { %v2608_v15 = vmul.f32 %v2606_v6, %v6496_v56 }
0x37e0   :  { %v6515_v9 = vadd.f32 %v2608_v15, %v2504_v63  ;;  %v6534_v63 = vld [vmem:[%s7221_s4 + $0x28] ss:$16 sps:$4 sm:$0xff]  }
0x37e2   :  { %v2617_v60 = vpack.c.bf16 %v6515_v9, %v6515_v9 }
0x37e4   :  { %5104 = vmatmul.mubr.msk.bf16.vlgmr.msra.gmra.mrb[56].mxu1 %vm52_vm0, %v2617_v60 }
0x37e5   :  { %2860 = vmatpush1.bf16.msra.mxu1 %v6520_v14  ;;  %2891 = vmatprep.mubr.bf16.mxu1 %v5785_v12 }
0x37e6   :  { %2861 = vmatprep.subr.bf16.mxu1 %v6527_v18 }
0x37e9   :  { %2862 = vmatpush1.bf16.msra.mxu1 %v6534_v63 }
0x37ea   :  { %2863 = vmatprep.subr.bf16.mxu1 %v6541_v58 }
0x37ed   :  { %2864 = vmatpush1.bf16.msra.mxu1 %v6547_v26 }
0x37ee   :  { %2865 = vmatprep.subr.bf16.mxu1 %v6553_v27 }
0x37f1   :  { %2866 = vmatpush1.bf16.msra.mxu1 %v6559_v57 }
0x37f2   :  { %3056 = vmatprep.subr.bf16.mxu1 %v6504_v41 }
0x37f4   :  { %2892 = vmatmul.mubr.bf16.vlgmr.msra.gmra.mrb[60].mxu1 %v5785_v12 }
0x37f5   :  { %3057 = vmatpush1.bf16.msra.mxu1 %v6520_v14  ;;  %3088 = vmatprep.mubr.bf16.mxu1 %v5785_v12 }
0x37f6   :  { %3058 = vmatprep.subr.bf16.mxu1 %v6527_v18 }
0x37f9   :  { %3059 = vmatpush1.bf16.msra.mxu1 %v6534_v63 }
0x37fa   :  { %3060 = vmatprep.subr.bf16.mxu1 %v6541_v58 }
0x37fd   :  { %3061 = vmatpush1.bf16.msra.mxu1 %v6547_v26 }
0x37fe   :  { %3062 = vmatprep.subr.bf16.mxu1 %v6553_v27 }
0x3801   :  { %3063 = vmatpush1.bf16.msra.mxu1 %v6559_v57 }
0x38b7   :  { %v2655_v13 = vpop.f32.mrb[56].mxu1 }
0x38b8   :  { %v2662_v61 = vrot.slane %v2655_v13, 4  ;;  %v5105_v28 = vpop.f32.mrb[57].mxu1 }
0x38b9   :  { %v2658_v30 = vpop.f32.mrb[58].mxu1 }
0x38ba   :  { %v2664_v46 = vadd.f32 %v2662_v61, %v5977_v62  ;;  %v5106_v34 = vpop.f32.mrb[59].mxu1 }
0x38bc   :  { %5651 = vtanh.f32 %v2664_v46  ;;  %v4726_v13 = vmul.f32 -1.442695, %v2664_v46 }
0x38c6   :  { %v5652_v55 = vpop.eup %5651 }
0x38c7   :  { %v2893_v11 = vpop.f32.mrb[60].mxu1  ;;  %2679 = vrot.lane.b32.xlu0 %v5652_v55, %s5787_s3 }
0x38c8   :  { %v2900_v40 = vadd.f32 %v2893_v11, %v5984_v22  ;;  %v2895_v36 = vpop.f32.mrb[61].mxu1  ;;  %v2704_v11 = vrot.slane %v6515_v9, 4 }
0x38c9   :  { %v2897_v49 = vpop.f32.mrb[62].mxu1  ;;  %v2901_v2 = vadd.f32 %v2895_v36, %v5988_v24 }
0x38ca   :  { %v4737_v59 = vmul.f32 -1.442695, %v2900_v40  ;;  %v2898_v39 = vpop.f32.mrb[63].mxu1  ;;  %v6580_v40 = vpop.permute.xlu1 %2674 }
0x38cb   :  { %v4738_v39 = vmul.f32 -1.442695, %v2901_v2 }
0x38cc   :  { %5653 = vpow2.f32 %v4737_v59 }
0x38cd   :  { %5655 = vtanh.f32 %v2901_v2 }
0x38d6   :  { %v5654_v5 = vpop.eup %5653 }
0x38d7   :  { %v2905_v45 = vadd.f32 1.0, %v5654_v5  ;;  %v5656_v6 = vpop.eup %5655 }
0x38d9   :  { %5657 = vrcp.f32 %v2905_v45 }
0x38da   :  { %5659 = vpow2.f32 %v4726_v13 }
0x38e3   :  { %v5658_v15 = vpop.eup %5657 }
0x38e4   :  { %v2916_v60 = vmul.f32 %v5658_v15, %v5656_v6  ;;  %v5660_v61 = vpop.eup %5659 }
0x38e5   :  { %v2668_v28 = vadd.f32 1.0, %v5660_v61 }
0x38e7   :  { %5661 = vrcp.f32 %v2668_v28 }
0x38f1   :  { %v5662_v30 = vpop.eup %5661 }
0x38f2   :  { %v2677_v36 = vmul.f32 %v5662_v30, %v6580_v40 }
0x3939   :  { %v2680_v34 = vpop.permute.xlu0 %2679 }
0x393a   :  { %v2682_v55 = vmul.f32 %v5662_v30, %v2680_v34  ;;  %v2915_v34 = vmul.f32 0.0, %v5658_v15 }
0x393c   :  { %2684 = vrot.lane.b32.xlu0 %v2682_v55, %s5788_s16 }
0x3940   :  { %2705 = vrot.lane.b32.xlu0 %v2704_v11, %s5789_s17 }
0x39ae   :  { %v2685_v49 = vpop.permute.xlu0 %2684 }
0x39af   :  { %v6583_v59 = vadd.f32 %v2685_v49, %v2677_v36 }
0x39b1   :  { %5663 = vtanh.f32 %v6583_v59 }
0x39b2   :  { %5665 = vpow2.f32 %v4738_v39  ;;  %v2706_v61 = vpop.permute.xlu0 %2705  ;;  %v2924_v39 = vld [vmem:[%s7219_s2 + $0x30] sm:$0x3] }
0x39bb   :  { %v5664_v46 = vpop.eup %5663 }
0x39bc   :  { %2690 = vrot.lane.b32.xlu1 %v5664_v46, %s5787_s3  ;;  %v5666_v5 = vpop.eup %5665 }
0x39bd   :  { %v2912_v13 = vadd.f32 1.0, %v5666_v5 }
0x39bf   :  { %5667 = vrcp.f32 %v2912_v13 }
0x39c0   :  { %2918 = vrot.lane.b32.xlu1 %v2916_v60, %s5787_s3 }
0x39c9   :  { %v5668_v2 = vpop.eup %5667 }
0x3a2e   :  { %v2691_v45 = vpop.permute.xlu1 %2690 }
0x3a2f   :  { %v6588_v6 = vmul.f32 %v5662_v30, %v2691_v45  ;;  %v6597_v30 = vld [vmem:[%s7219_s2 + $0x2c] sm:$0x3] }
0x3a31   :  { %v2708_v28 = vsub.f32 %v6588_v6, %v2706_v61 }
0x3a32   :  { %v2919_v55 = vpop.permute.xlu1 %2918 }
0x3a33   :  { %v2710_v11 = vrot.slane %v2708_v28, 4  ;;  %v2921_v36 = vadd.f32 %v2919_v55, %v2915_v34  ;;  %v1892_v55 = vsub.f32 %v6361_v48, %v6358_v43 }
0x3a35   :  { %5669 = vtanh.f32 %v2921_v36  ;;  %2711 = vrot.lane.b32.xlu0 %v2710_v11, %s5788_s16 }
0x3a39   :  { %2926 = vrot.lane.b32.xlu0 %v2921_v36, %s5787_s3  ;;  %v1894_v36 = vrot.slane %v1892_v55, 4 }
0x3a3f   :  { %v5670_v60 = vpop.eup %5669 }
0x3a40   :  { %v2923_v49 = vmul.f32 %v5670_v60, %v5668_v2 }
0x3a42   :  { %2932 = vrot.lane.b32.xlu1 %v2923_v49, %s5787_s3 }
0x3aa7   :  { %v2712_v15 = vpop.permute.xlu0 %2711 }
0x3aa8   :  { %v2714_v46 = vmul.f32 %v2712_v15, %v6597_v30 }
0x3aaa   :  { %v2715_v5 = vadd.f32 %v2714_v46, %v6515_v9 }
0x3aab   :  { %v2927_v45 = vpop.permute.xlu0 %2926 }
0x3aac   :  { %v2723_v13 = vpack.c.bf16 %v2715_v5, %v2715_v5  ;;  %v6604_v61 = vmul.f32 %v2927_v45, %v2924_v39 }
0x3aae   :  { %v3010_v28 = vrot.slane %v6604_v61, 6  ;;  %5112 = vmatmul.mubr.msk.bf16.vlgmr.msra.gmra.mrb[48].mxu0 %vm52_vm0, %v2723_v13 }
0x3aaf   :  { %2948 = vmatpush1.bf16.msra.mxu0 %v6520_v14  ;;  %2979 = vmatprep.mubr.bf16.mxu0 %v5785_v12 }
0x3ab0   :  { %3011 = vrot.lane.b32.xlu1 %v3010_v28, %s5787_s3  ;;  %2949 = vmatprep.subr.bf16.mxu0 %v6527_v18 }
0x3ab3   :  { %2950 = vmatpush1.bf16.msra.mxu0 %v6534_v63 }
0x3ab4   :  { %v2933_v34 = vpop.permute.xlu1 %2932  ;;  %2951 = vmatprep.subr.bf16.mxu0 %v6541_v58 }
0x3ab5   :  { %v6614_v9 = vmul.f32 %v2933_v34, %v2924_v39 }
0x3ab7   :  { %2952 = vmatpush1.bf16.msra.mxu0 %v6547_v26  ;;  %v3033_v11 = vrot.slane %v6614_v9, 6  ;;  %v2943_v2 = vpack.c.bf16 %v6614_v9, %v6614_v9 }
0x3ab8   :  { %2953 = vmatprep.subr.bf16.mxu0 %v6553_v27 }
0x3ab9   :  { %3034 = vrot.lane.b32.xlu1 %v3033_v11, %s5787_s3 }
0x3abb   :  { %2954 = vmatpush1.bf16.msra.mxu0 %v6559_v57 }
0x3abc   :  { %3165 = vmatprep.subr.bf16.mxu0 %v6504_v41 }
0x3abd   :  { %1895 = vrot.lane.b32.xlu1 %v1894_v36, %s5789_s17 }
0x3abe   :  { %4739 = vmatmul.mubr.msk.bf16.vlgmr.msra.gmra.mrb[52].mxu0 %vm2856_vm2, %v2943_v2 }
0x3abf   :  { %3166 = vmatpush1.bf16.msra.mxu0 %v6520_v14  ;;  %3197 = vmatprep.mubr.bf16.mxu0 %v5785_v12 }
0x3ac0   :  { %3167 = vmatprep.subr.bf16.mxu0 %v6527_v18 }
0x3ac3   :  { %3168 = vmatpush1.bf16.msra.mxu0 %v6534_v63 }
0x3ac4   :  { %3169 = vmatprep.subr.bf16.mxu0 %v6541_v58 }
0x3ac7   :  { %3170 = vmatpush1.bf16.msra.mxu0 %v6547_v26 }
0x3ac8   :  { %3171 = vmatprep.subr.bf16.mxu0 %v6553_v27 }
0x3acb   :  { %3172 = vmatpush1.bf16.msra.mxu0 %v6559_v57 }
0x3b22   :  { %v3012_v34 = vpop.permute.xlu1 %3011 }
0x3b81   :  { %v6636_v43 = vpop.f32.mrb[48].mxu0 }
0x3b82   :  { %v5113_v48 = vpop.f32.mrb[49].mxu0 }
0x3b83   :  { %v2764_v41 = vpop.f32.mrb[50].mxu0 }
0x3b84   :  { %v5114_v60 = vpop.f32.mrb[51].mxu0  ;;  %v1965_v41 = vrot.slane %v6401_v37, 2 }
0x3b91   :  { %v2981_v14 = vpop.f32.mrb[52].mxu0 }
0x3b92   :  { %v2990_v49 = vrot.slane %v2981_v14, 6  ;;  %v2983_v12 = vpop.f32.mrb[53].mxu0  ;;  %v1967_v14 = vadd.f32 %v1965_v41, %v6274_v33 }
0x3b93   :  { %v2985_v15 = vpop.f32.mrb[54].mxu0  ;;  %v2991_v58 = vrot.slane %v2983_v12, 6 }
0x3b94   :  { %v2994_v18 = vadd.f32 %v2990_v49, %v5986_v23  ;;  %v2986_v63 = vpop.f32.mrb[55].mxu0  ;;  %v3035_v49 = vpop.permute.xlu1 %3034 }
0x3b95   :  { %v2995_v26 = vadd.f32 %v2991_v58, %v5990_v25 }
0x3b96   :  { %v4740_v46 = vmul.f32 -1.442695, %v2994_v18 }
0x3b97   :  { %v4741_v13 = vmul.f32 -1.442695, %v2995_v26 }
0x3b98   :  { %5671 = vpow2.f32 %v4740_v46  ;;  %v1896_v63 = vpop.permute.xlu1 %1895 }
0x3b99   :  { %5673 = vtanh.f32 %v2995_v26  ;;  %v1898_v58 = vmul.f32 %v1896_v63, %v6375_v19 }
0x3b9b   :  { %v1899_v37 = vadd.f32 %v1898_v58, %v6348_v10 }
0x3b9d   :  { %v1976_v33 = vrot.slane %v1899_v37, 2 }
0x3ba2   :  { %v5672_v27 = vpop.eup %5671 }
0x3ba3   :  { %v2999_v39 = vadd.f32 1.0, %v5672_v27  ;;  %v5674_v57 = vpop.eup %5673 }
0x3ba5   :  { %5675 = vrcp.f32 %v2999_v39  ;;  %v4711_v39 = vmul.f32 -1.442695, %v1967_v14 }
0x3ba6   :  { %5677 = vpow2.f32 %v4741_v13 }
0x3baf   :  { %v5676_v5 = vpop.eup %5675 }
0x3bb0   :  { %v3015_v45 = vmul.f32 %v5676_v5, %v5674_v57  ;;  %v5678_v28 = vpop.eup %5677  ;;  %v3014_v11 = vmul.f32 %v5676_v5, %v3012_v34  ;;  %v3023_v57 = vld [vmem:[%s7219_s2 + $0x32] sm:$0x3] }
0x3bb1   :  { %v3006_v55 = vadd.f32 1.0, %v5678_v28 }
0x3bb2   :  { %3017 = vrot.lane.b32.xlu0 %v3015_v45, %s5787_s3 }
0x3bb3   :  { %5679 = vrcp.f32 %v3006_v55 }
0x3bbd   :  { %v5680_v12 = vpop.eup %5679 }
0x3c24   :  { %v3018_v36 = vpop.permute.xlu0 %3017 }
0x3c25   :  { %v3020_v2 = vadd.f32 %v3018_v36, %v3014_v11 }
0x3c27   :  { %5681 = vtanh.f32 %v3020_v2  ;;  %v3024_v48 = vsub.f32 %v3020_v2, %v3012_v34 }
0x3c28   :  { %5683 = vtanh.f32 %v1967_v14  ;;  %v772_v14 = vrot.slane %v6075_v0, 6 }
0x3c29   :  { %v3026_v60 = vrot.slane %v3024_v48, 2  ;;  %5685 = vpow2.f32 %v4711_v39 }
0x3c2b   :  { %3027 = vrot.lane.b32.xlu1 %v3026_v60, %s5787_s3  ;;  %v560_v60 = vrot.slane %v6032_v35, 2  ;;  %v1604_v35 = vrot.slane %v6261_v20, 6 }
0x3c31   :  { %v5682_v15 = vpop.eup %5681 }
0x3c32   :  { %v6644_v18 = vmul.f32 %v5682_v15, %v5680_v12  ;;  %v5684_v27 = vpop.eup %5683  ;;  %v1188_v12 = vrot.slane %v6163_v1, 6  ;;  %v1392_v15 = vrot.slane %v6219_v29, 2 }
0x3c33   :  { %v5686_v5 = vpop.eup %5685 }
0x3c34   :  { %v3037_v46 = vsub.f32 %v6644_v18, %v3035_v49  ;;  %v1971_v13 = vadd.f32 1.0, %v5686_v5  ;;  %v976_v49 = vrot.slane %v6121_v31, 2  ;;  %v6692_v5 = vld [vmem:[%s7222_s5] sm:$0xff] }
0x3c36   :  { %v3039_v26 = vrot.slane %v3037_v46, 2  ;;  %5687 = vrcp.f32 %v1971_v13 }
0x3c38   :  { %3040 = vrot.lane.b32.xlu0 %v3039_v26, %s5787_s3 }
0x3c3c   :  { %1982 = vrot.lane.b32.xlu0 %v5684_v27, %s5787_s3 }
0x3c40   :  { %1977 = vrot.lane.b32.xlu0 %v1976_v33, %s5788_s16  ;;  %v6663_v36 = vpop.eup %5687 }
0x3c9d   :  { %v3028_v45 = vpop.permute.xlu1 %3027 }
0x3c9e   :  { %v3030_v19 = vmul.f32 %v3028_v45, %v3023_v57 }
0x3ca0   :  { %v6656_v28 = vadd.f32 %v3030_v19, %v6604_v61 }
0x3ca2   :  { %v3119_v10 = vrot.slane %v6656_v28, 4 }
0x3ca4   :  { %3120 = vrot.lane.b32.xlu0 %v3119_v10, %s5787_s3 }
0x3caa   :  { %v3041_v34 = vpop.permute.xlu0 %3040 }
0x3cab   :  { %v3043_v55 = vmul.f32 %v3041_v34, %v3023_v57  ;;  %v666_v34 = vrot.slane %v6054_v16, 4 }
0x3cad   :  { %v6661_v11 = vadd.f32 %v3043_v55, %v6614_v9  ;;  %v1082_v55 = vrot.slane %v6142_v17, 4 }
0x3cae   :  { %v1983_v2 = vpop.permute.xlu0 %1982 }
0x3caf   :  { %v3052_v48 = vpack.c.bf16 %v6661_v11, %v6661_v11  ;;  %v3142_v41 = vrot.slane %v6661_v11, 4  ;;  %v1985_v61 = vmul.f32 %v6663_v36, %v1983_v2  ;;  %v1498_v2 = vrot.slane %v6240_v32, 4 }
0x3cb1   :  { %3143 = vrot.lane.b32.xlu0 %v3142_v41, %s5787_s3  ;;  %4742 = vmatmul.mubr.msk.bf16.vlgmr.msra.gmra.mrb[64].mxu1 %vm2856_vm2, %v3052_v48 }
0x3cb2   :  { %1987 = vrot.lane.b32.xlu1 %v1985_v61, %s5788_s16  ;;  %v1978_v33 = vpop.permute.xlu0 %1977 }
0x3cb3   :  { %v1980_v57 = vmul.f32 %v6663_v36, %v1978_v33 }
0x3cb5   :  { %561 = vrot.lane.b32.xlu0 %v560_v60, %s5788_s16 }
0x3cb9   :  { %773 = vrot.lane.b32.xlu0 %v772_v14, %s5788_s16 }
0x3cbd   :  { %977 = vrot.lane.b32.xlu0 %v976_v49, %s5788_s16 }
0x3cc1   :  { %1189 = vrot.lane.b32.xlu0 %v1188_v12, %s5788_s16 }
0x3cc5   :  { %1393 = vrot.lane.b32.xlu0 %v1392_v15, %s5788_s16 }
0x3cc9   :  { %1605 = vrot.lane.b32.xlu0 %v1604_v35, %s5788_s16 }
0x3ccd   :  { %1703 = vrot.lane.b32.xlu0 %v6289_v3, %s5788_s16 }
0x3d16   :  { %v6717_v41 = vpop.permute.xlu0 %3120 }
0x3d23   :  { %v3144_v16 = vpop.permute.xlu0 %3143 }
0x3d24   :  { %v1988_v39 = vpop.permute.xlu1 %1987 }
0x3d25   :  { %v1990_v3 = vadd.f32 %v1988_v39, %v1980_v57  ;;  %v5743_v39 = vld [vmem:[%s7219_s2 + $0xa] sm:$0x3] }
0x3d27   :  { %v562_v60 = vpop.permute.xlu0 %561 }
0x3d2b   :  { %v6720_v49 = vpop.permute.xlu0 %773 }
0x3d84   :  { %v3090_v0 = vpop.f32.mrb[64].mxu1 }
0x3d85   :  { %v3099_v63 = vrot.slane %v3090_v0, 4  ;;  %v3092_v31 = vpop.f32.mrb[65].mxu1  ;;  %v2695_v0 = vsub.f32 %v6583_v59, %v6580_v40 }
0x3d86   :  { %v3094_v46 = vpop.f32.mrb[66].mxu1  ;;  %v3100_v37 = vrot.slane %v3092_v31, 4 }
0x3d87   :  { %v3103_v58 = vadd.f32 %v3099_v63, %v5984_v22  ;;  %v3095_v1 = vpop.f32.mrb[67].mxu1  ;;  %v6697_v22 = vld [vmem:[%s7222_s5 + $0x10] sm:$0xff]  ;;  %v978_v63 = vpop.permute.xlu0 %977 }
0x3d88   :  { %v3104_v29 = vadd.f32 %v3100_v37, %v5988_v24  ;;  %v6701_v24 = vpack.i.bf16 %v6697_v22, %v6692_v5  ;;  %v5742_v1 = vld [vmem:[%s7219_s2 + $0x4] sm:$0x3]  ;;  %v2697_v37 = vrot.slane %v2695_v0, 4  ;;  %v980_v57 = vmul.f32 %v5743_v39, %v978_v63  ;;  %v5747_v63 = vld [vmem:[%s7219_s2 + $0x10] sm:$0x3] }
0x3d89   :  { %v4743_v26 = vmul.f32 -1.442695, %v3103_v58 }
0x3d8a   :  { %5387 = vrot.lane.b32.xlu0 %v6701_v24, %s5789_s17  ;;  %v4744_v48 = vmul.f32 -1.442695, %v3104_v29 }
0x3d8b   :  { %5689 = vpow2.f32 %v4743_v26  ;;  %v1190_v33 = vpop.permute.xlu0 %1189 }
0x3d8c   :  { %5691 = vtanh.f32 %v3104_v29 }
0x3d95   :  { %v5690_v27 = vpop.eup %5689 }
0x3d96   :  { %v3108_v20 = vadd.f32 1.0, %v5690_v27  ;;  %v5692_v45 = vpop.eup %5691 }
0x3d98   :  { %5693 = vrcp.f32 %v3108_v20 }
0x3d99   :  { %5695 = vtanh.f32 %v1990_v3 }
0x3d9a   :  { %5697 = vpow2.f32 %v4744_v48 }
0x3da2   :  { %v5694_v19 = vpop.eup %5693 }
0x3da3   :  { %v3124_v13 = vmul.f32 %v5694_v19, %v5692_v45  ;;  %v5696_v10 = vpop.eup %5695  ;;  %v5790_v45 = vmov 0.0|0.0  }
0x3da4   :  { %v5698_v61 = vpop.eup %5697  ;;  %5300 = vmatprep.subr.bf16.mxu0 %v5790_v45 }
0x3da5   :  { %3126 = vrot.lane.b32.xlu1 %v3124_v13, %s5787_s3  ;;  %v3115_v14 = vadd.f32 1.0, %v5698_v61  ;;  %v3265_v61 = vrot.slane %v980_v57, 6 }
0x3da7   :  { %5699 = vrcp.f32 %v3115_v14  ;;  %v1394_v14 = vpop.permute.xlu0 %1393 }
0x3da9   :  { %1993 = vrot.lane.b32.xlu1 %v5696_v10, %s5787_s3 }
0x3dad   :  { %667 = vrot.lane.b32.xlu1 %v666_v34, %s5788_s16 }
0x3db1   :  { %871 = vrot.lane.b32.xlu1 %v6100_v44, %s5788_s16  ;;  %v3123_v44 = vmul.f32 %v5694_v19, %v6717_v41  ;;  %v5744_v19 = vld [vmem:[%s7219_s2 + $0x8] sm:$0x3] }
0x3db5   :  { %1083 = vrot.lane.b32.xlu1 %v1082_v55, %s5788_s16  ;;  %v2768_v55 = vrot.slane %v6636_v43, 2  ;;  %v1808_v43 = vrot.slane %v6306_v47, 2  ;;  %v6778_v47 = vld [vmem:[%s7222_s5 + $0x20] sm:$0xff] }
0x3db9   :  { %1287 = vrot.lane.b32.xlu1 %v6193_v8, %s5788_s16  ;;  %v5741_v8 = vld [vmem:[%s7219_s2 + $0x2] sm:$0x3] }
0x3dba   :  { %v6728_v32 = vmul.f32 %v5741_v8, %v562_v60 }
0x3dbc   :  { %v3256_v46 = vrot.slane %v6728_v32, 6 }
0x3dbd   :  { %1499 = vrot.lane.b32.xlu1 %v1498_v2, %s5788_s16  ;;  %v5745_v2 = vld [vmem:[%s7219_s2 + $0xc] sm:$0x3] }
0x3dbe   :  { %v3292_v40 = vsel %vm3291_vm3, %v6008_v54, %v3256_v46 }
0x3e17   :  { %v3127_v17 = vpop.permute.xlu1 %3126 }
0x3e18   :  { %v6722_v12 = vadd.f32 %v3127_v17, %v3123_v44 }
0x3e1a   :  { %5701 = vtanh.f32 %v6722_v12 }
0x3e1b   :  { %v1994_v15 = vpop.permute.xlu1 %1993 }
0x3e1c   :  { %v1996_v35 = vmul.f32 %v6663_v36, %v1994_v15  ;;  %v5700_v36 = vpop.eup %5699  ;;  %v2770_v15 = vadd.f32 %v2768_v55, %v5977_v62  ;;  %v5748_v62 = vld [vmem:[%s7219_s2 + $0x14] sm:$0x3] }
0x3e1e   :  { %v1999_v31 = vrot.slane %v1996_v35, 6  ;;  %v5746_v35 = vld [vmem:[%s7219_s2 + $0x12] sm:$0x3]  ;;  %5703 = vtanh.f32 %v2770_v15 }
0x3e1f   :  { %v668_v58 = vpop.permute.xlu1 %667  ;;  %v1396_v0 = vmul.f32 %v5746_v35, %v1394_v14 }
0x3e20   :  { %v670_v26 = vmul.f32 %v5742_v1, %v668_v58  ;;  %2000 = vrot.lane.b32.xlu0 %v1999_v31, %s5788_s16  ;;  %v6783_v1 = vld [vmem:[%s7222_s5 + $0x30] sm:$0xff] }
0x3e22   :  { %v3259_v29 = vrot.slane %v670_v26, 4 }
0x3e23   :  { %v872_v59 = vpop.permute.xlu1 %871 }
0x3e24   :  { %v5702_v27 = vpop.eup %5701  ;;  %2698 = vrot.lane.b32.xlu0 %v2697_v37, %s5789_s17  ;;  %v6742_v20 = vsel %vm3293_vm4, %v3292_v40, %v3259_v29  ;;  %v874_v13 = vmul.f32 %v5744_v19, %v872_v59  ;;  %v1914_v37 = vrot.slane %v6366_v4, 4  ;;  %v3274_v29 = vrot.slane %v1396_v0, 6 }
0x3e25   :  { %v6747_v3 = vmul.f32 %v5702_v27, %v5700_v36  ;;  %v6790_v59 = vpack.i.bf16 %v6783_v1, %v6778_v47  ;;  %v565_v4 = vadd.f32 %v6728_v32, %v6008_v54  ;;  %v5750_v54 = vld [vmem:[%s7219_s2 + $0xe] sm:$0x3] }
0x3e26   :  { %v3297_v17 = vsel %vm3291_vm3, %v874_v13, %v3265_v61  ;;  %v6810_v32 = vmul.f32 %v5750_v54, %v1190_v33  ;;  %v5754_v54 = vld [vmem:[%s7219_s2 + $0x1c] sm:$0x3] }
0x3e27   :  { %v1084_v10 = vpop.permute.xlu1 %1083  ;;  %v3146_v34 = vsub.f32 %v6747_v3, %v3144_v16  ;;  %v671_v19 = vadd.f32 %v670_v26, %v565_v4 }
0x3e28   :  { %v1086_v48 = vmul.f32 %v5745_v2, %v1084_v10  ;;  %v5704_v39 = vpop.eup %5703  ;;  %v5749_v10 = vld [vmem:[%s7219_s2 + $0x6] sm:$0x3]  ;;  %v1606_v2 = vpop.permute.xlu0 %1605 }
0x3e29   :  { %v3148_v60 = vrot.slane %v3146_v34, 4  ;;  %v6804_v34 = vmul.f32 %v5749_v10, %v6720_v49 }
0x3e2a   :  { %v3268_v44 = vrot.slane %v1086_v48, 4 }
0x3e2b   :  { %v1288_v8 = vpop.permute.xlu1 %1287  ;;  %3149 = vrot.lane.b32.xlu1 %v3148_v60, %s5787_s3  ;;  %v777_v55 = vadd.f32 %v6804_v34, %v671_v19  ;;  %v5752_v19 = vld [vmem:[%s7219_s2 + $0x18] sm:$0x3] }
0x3e2c   :  { %v6762_v16 = vsel %vm3293_vm4, %v3297_v17, %v3268_v44  ;;  %v1290_v31 = vmul.f32 %v5747_v63, %v1288_v8  ;;  %v1704_v60 = vpop.permute.xlu0 %1703  ;;  %v4728_v8 = vmul.f32 -1.442695, %v2770_v15  ;;  %v6818_v15 = vld [vmem:[%s7219_s2 + $0x34] sm:$0x3] }
0x3e2d   :  { %v875_v61 = vadd.f32 %v874_v13, %v777_v55  ;;  %v1706_v10 = vmul.f32 %v5752_v19, %v1704_v60  ;;  %v1997_v55 = vld [vmem:[%s7219_s2 + $0x1e] sm:$0x3] }
0x3e2e   :  { %v3300_v40 = vsel %vm3291_vm3, %v1290_v31, %v3274_v29  ;;  %5705 = vpow2.f32 %v4728_v8 }
0x3e2f   :  { %v1500_v46 = vpop.permute.xlu1 %1499  ;;  %1809 = vrot.lane.b32.xlu1 %v1808_v43, %s5788_s16  ;;  %v981_v14 = vadd.f32 %v980_v57, %v875_v61  ;;  %v5753_v61 = vld [vmem:[%s7219_s2 + $0x1a] sm:$0x3] }
0x3e30   :  { %v1502_v58 = vmul.f32 %v5748_v62, %v1500_v46  ;;  %v5388_v17 = vpop.permute.xlu0 %5387 }
0x3e31   :  { %v1087_v44 = vadd.f32 %v1086_v48, %v981_v14  ;;  %v5390_v62 = vunpack.i.h.bf16 %v5388_v17 }
0x3e32   :  { %v3277_v36 = vrot.slane %v1502_v58, 4 }
0x3e33   :  { %1915 = vrot.lane.b32.xlu1 %v1914_v37, %s5788_s16  ;;  %v1193_v26 = vadd.f32 %v6810_v32, %v1087_v44  ;;  %v5389_v37 = vunpack.i.l.bf16 %v5388_v17 }
0x3e34   :  { %v6793_v27 = vsel %vm3293_vm4, %v3300_v40, %v3277_v36 }
0x3e35   :  { %v1291_v43 = vadd.f32 %v1290_v31, %v1193_v26  ;;  %v5751_v31 = vld [vmem:[%s7219_s2 + $0x16] sm:$0x3]  ;;  %v5301_v4 = vpack.c.bf16 %v5390_v62, %v5389_v37  ;;  %v3249_v37 = vld [vmem:[%s7219_s2 + $0x38] sm:$0x3] }
0x3e37   :  { %5392 = vrot.lane.b32.xlu1 %v6790_v59, %s5789_s17  ;;  %v1397_v13 = vadd.f32 %v1396_v0, %v1291_v43  ;;  %v6824_v0 = vmul.f32 %v5751_v31, %v1606_v2 }
0x3e38   :  { %v5706_v46 = vpop.eup %5705 }
0x3e39   :  { %v1503_v33 = vadd.f32 %v1502_v58, %v1397_v13  ;;  %v2774_v36 = vadd.f32 1.0, %v5706_v46 }
0x3e3b   :  { %2785 = vrot.lane.b32.xlu1 %v5704_v39, %s5787_s3  ;;  %v1609_v40 = vadd.f32 %v6824_v0, %v1503_v33  ;;  %5707 = vrcp.f32 %v2774_v36 }
0x3e3d   :  { %v1707_v44 = vadd.f32 %v1706_v10, %v1609_v40 }
0x3e45   :  { %v5708_v31 = vpop.eup %5707 }
0x3e92   :  { %v2001_v49 = vpop.permute.xlu0 %2000 }
0x3e96   :  { %v2699_v35 = vpop.permute.xlu0 %2698 }
0x3e97   :  { %v2701_v63 = vmul.f32 %v2699_v35, %v6597_v30 }
0x3e99   :  { %v2702_v57 = vadd.f32 %v2701_v63, %v6499_v52 }
0x3e9b   :  { %v2779_v48 = vrot.slane %v2702_v57, 2 }
0x3e9d   :  { %v3150_v29 = vpop.permute.xlu1 %3149  ;;  %2780 = vrot.lane.b32.xlu0 %v2779_v48, %s5788_s16 }
0x3e9e   :  { %v3152_v52 = vmul.f32 %v3150_v29, %v6818_v15 }
0x3ea0   :  { %v3153_v39 = vadd.f32 %v3152_v52, %v6661_v11  ;;  %v2003_v11 = vmul.f32 %v2001_v49, %v1997_v55 }
0x3ea1   :  { %v1810_v58 = vpop.permute.xlu1 %1809 }
0x3ea2   :  { %v3161_v2 = vpack.c.bf16 %v3153_v39, %v3153_v39  ;;  %v1812_v14 = vmul.f32 %v5753_v61, %v1810_v58  ;;  %v3289_v63 = vrot.slane %v2003_v11, 2  ;;  %v2195_v39 = vrot.slane %v6414_v38, 2 }
0x3ea3   :  { %v2717_v58 = vrot.slane %v6588_v6, 4  ;;  %v5292_v38 = vpack.c.bf16 %v6697_v22, %v6692_v5  ;;  %v5296_v6 = vpack.c.bf16 %v6783_v1, %v6778_v47  ;;  %v6878_v5 = vld [vmem:[%s7222_s5 + $0x100] ss:$0 sm:$0xff] }
0x3ea4   :  { %4745 = vmatmul.mubr.msk.bf16.vlgmr.msra.gmra.mrb[56].mxu0 %vm2856_vm2, %v3161_v2  ;;  %v3283_v17 = vrot.slane %v1812_v14, 6  ;;  %v1813_v60 = vadd.f32 %v1812_v14, %v1707_v44  ;;  %v2407_v14 = vrot.slane %v6457_v51, 6 }
0x3ea5   :  { %5302 = vmatpush3.bf16.msra.mxu0 %v5301_v4  ;;  %v1916_v8 = vpop.permute.xlu1 %1915  ;;  %5134 = vmatprep.mubr.msk.f32.mxu0 %vm5786_vm1, %v5784_v7  ;;  %v2611_v4 = vrot.slane %v6510_v21, 2  ;;  %v2301_v21 = vrot.slane %v6436_v42, 4 }
0x3ea6   :  { %v1918_v26 = vmul.f32 %v5754_v54, %v1916_v8  ;;  %5303 = vmatprep.subr.bf16.mxu0 %v5790_v45  ;;  %v3303_v13 = vsel %vm3291_vm3, %v1706_v10, %v3283_v17  ;;  %5293 = vmatprep.subr.bf16.mxu1 %v5292_v38 }
0x3ea7   :  { %5295 = vmatpush3.bf16.msra.mxu1 %v5292_v38 }
0x3ea8   :  { %v1919_v43 = vadd.f32 %v1918_v26, %v1813_v60  ;;  %v3286_v35 = vrot.slane %v1918_v26, 4  ;;  %5297 = vmatprep.subr.bf16.mxu1 %v5296_v6 }
0x3ea9   :  { %v5393_v49 = vpop.permute.xlu1 %5392 }
0x3eaa   :  { %v5395_v57 = vunpack.i.h.bf16 %v5393_v49  ;;  %v5394_v48 = vunpack.i.l.bf16 %v5393_v49  ;;  %v3304_v46 = vsel %vm3293_vm4, %v3303_v13, %v3286_v35  ;;  %v2004_v33 = vadd.f32 %v2003_v11, %v1919_v43  ;;  %v5756_v35 = vld [vmem:[%s7219_s2 + $0x24] sm:$0x3] }
0x3eab   :  { %v6848_v62 = vsel %vm3295_vm5, %v3304_v46, %v3289_v63  ;;  %5299 = vmatpush3.bf16.msra.mxu1 %v5296_v6  ;;  %v5757_v46 = vld [vmem:[%s7219_s2 + $0x26] sm:$0x3] }
0x3eac   :  { %v5304_v29 = vpack.c.bf16 %v5395_v57, %v5394_v48  ;;  %v3250_v40 = vmul.f32 %v3249_v37, %v2004_v33 }
0x3ead   :  { %v2786_v52 = vpop.permute.xlu1 %2785 }
0x3eae   :  { %v2788_v36 = vmul.f32 %v5708_v31, %v2786_v52  ;;  %5305 = vmatpush3.bf16.msra.mxu0 %v5304_v29 }
0x3eaf   :  { %5309 = vmatprep.subr.bf16.mxu0 %v5790_v45 }
0x3eb0   :  { %2790 = vrot.lane.b32.xlu1 %v2788_v36, %s5788_s16 }
0x3eb1   :  { %5135 = vmatmul.mubr.msk.f32.vlgmr.msra.gmra.mrb[60].mxu0 %vm52_vm0, %v3250_v40  ;;  %v5758_v40 = vld [vmem:[%s7219_s2 + $0x28] sm:$0x3] }
0x3eb2   :  { %5153 = vmatprep.mubr.msk.f32.mxu0 %vm5786_vm1, %v5784_v7 }
0x3eb4   :  { %2196 = vrot.lane.b32.xlu1 %v2195_v39, %s5788_s16 }
0x3eb8   :  { %2612 = vrot.lane.b32.xlu1 %v2611_v4, %s5788_s16 }
0x3ebc   :  { %2718 = vrot.lane.b32.xlu1 %v2717_v58, %s5788_s16 }
0x3f0f   :  { %v2781_v19 = vpop.permute.xlu0 %2780 }
0x3f10   :  { %v2783_v10 = vmul.f32 %v5708_v31, %v2781_v19 }
0x3f22   :  { %v2791_v55 = vpop.permute.xlu1 %2790 }
0x3f23   :  { %v2793_v2 = vadd.f32 %v2791_v55, %v2783_v10 }
0x3f25   :  { %5709 = vtanh.f32 %v2793_v2 }
0x3f26   :  { %v2197_v11 = vpop.permute.xlu1 %2196 }
0x3f2f   :  { %v5710_v61 = vpop.eup %5709 }
0x3f30   :  { %2796 = vrot.lane.b32.xlu0 %v5710_v61, %s5787_s3 }
0x3f34   :  { %2302 = vrot.lane.b32.xlu0 %v2301_v21, %s5788_s16  ;;  %v2800_v21 = vld [vmem:[%s7219_s2 + $0x2e] sm:$0x3] }
0x3f38   :  { %2408 = vrot.lane.b32.xlu0 %v2407_v14, %s5788_s16 }
0x3f3c   :  { %2506 = vrot.lane.b32.xlu0 %v6477_v50, %s5788_s16  ;;  %v5755_v50 = vld [vmem:[%s7219_s2 + $0x22] sm:$0x3] }
0x3f3d   :  { %v2199_v8 = vmul.f32 %v5755_v50, %v2197_v11 }
0x3f3f   :  { %v2200_v43 = vadd.f32 %v2199_v8, %v6386_v53  ;;  %v3307_v13 = vrot.slane %v2199_v8, 6  ;;  %v6928_v8 = vld [vmem:[%s7219_s2 + $0x46] sm:$0xff] }
0x3f40   :  { %3436 = vrot.lane.b32.xlu0 %v6878_v5, %s5789_s17 }
0x3f41   :  { %v3324_v37 = vsel %vm3291_vm3, %v6386_v53, %v3307_v13  ;;  %v2613_v53 = vpop.permute.xlu1 %2612 }
0x3f42   :  { %v2615_v55 = vmul.f32 %v2613_v53, %v6496_v56 }
0x3f44   :  { %v3316_v6 = vrot.slane %v2615_v55, 6 }
0x3f45   :  { %v2719_v2 = vpop.permute.xlu1 %2718 }
0x3f46   :  { %v2721_v38 = vmul.f32 %v2719_v2, %v6597_v30  ;;  %v6918_v30 = vld [vmem:[%s7219_s2 + $0x3e] sm:$0xff] }
0x3f77   :  { %v6882_v42 = vpop.f32.mrb[56].mxu0 }
0x3f78   :  { %v6884_v22 = vpop.f32.mrb[57].mxu0 }
0x3f79   :  { %v3203_v47 = vpop.f32.mrb[58].mxu0 }
0x3f7a   :  { %v3204_v51 = vpop.f32.mrb[59].mxu0 }
0x3f84   :  { %v3508_v1 = vpop.f32.mrb[60].mxu0 }
0x3f85   :  { %v5136_v44 = vpop.f32.mrb[61].mxu0 }
0x3fa2   :  { %v2797_v17 = vpop.permute.xlu0 %2796 }
0x3fa3   :  { %v2799_v60 = vmul.f32 %v5708_v31, %v2797_v17 }
0x3fa5   :  { %v2802_v54 = vrot.slane %v2799_v60, 6 }
0x3fa6   :  { %v2303_v26 = vpop.permute.xlu0 %2302 }
0x3fa7   :  { %v2305_v63 = vmul.f32 %v5756_v35, %v2303_v26  ;;  %2803 = vrot.lane.b32.xlu1 %v2802_v54, %s5788_s16 }
0x3fa9   :  { %v2306_v49 = vadd.f32 %v2305_v63, %v2200_v43  ;;  %v3310_v57 = vrot.slane %v2305_v63, 4 }
0x3faa   :  { %v2409_v48 = vpop.permute.xlu0 %2408 }
0x3fab   :  { %v2411_v33 = vmul.f32 %v5757_v46, %v2409_v48  ;;  %v3325_v36 = vsel %vm3293_vm4, %v3324_v37, %v3310_v57  ;;  %v4755_v46 = vadd.f32 -1.0, %v6928_v8 }
0x3fad   :  { %v2412_v29 = vadd.f32 %v2411_v33, %v2306_v49  ;;  %v3313_v31 = vrot.slane %v2411_v33, 2  ;;  %v4754_v33 = vadd.f32 -1.0, %v6918_v30  ;;  %v6941_v37 = vmul.f32 1e+30, %v4755_v46 }
0x3fae   :  { %v2507_v52 = vpop.permute.xlu0 %2506 }
0x3faf   :  { %v2509_v39 = vmul.f32 %v5758_v40, %v2507_v52  ;;  %v3326_v4 = vsel %vm3295_vm5, %v3325_v36, %v3313_v31  ;;  %v6943_v31 = vmul.f32 1e+30, %v4754_v33 }
0x3fb0   :  { %5123 = vmatprep.mubr.msk.f32.mxu1 %vm52_vm0, %v3326_v4 }
0x3fb1   :  { %v2510_v58 = vadd.f32 %v2509_v39, %v2412_v29  ;;  %v3327_v47 = vsel %vm3291_vm3, %v2509_v39, %v3316_v6 }
0x3fb2   :  { %v3437_v19 = vpop.permute.xlu0 %3436 }
0x3fb3   :  { %v3509_v10 = vadd.f32 %v3508_v1, %v3437_v19  ;;  %v2616_v61 = vadd.f32 %v2615_v55, %v2510_v58  ;;  %v3319_v1 = vrot.slane %v2721_v38, 4 }
0x3fb5   :  { %5137 = vmatprep.subr.msk.mxu1 %vm3291_vm3, %v3509_v10  ;;  %v2722_v51 = vadd.f32 %v2721_v38, %v2616_v61  ;;  %v3328_v56 = vsel %vm3293_vm4, %v3327_v47, %v3319_v1 }
0x4019   :  { %v2804_v14 = vpop.permute.xlu1 %2803 }
0x401a   :  { %v2806_v44 = vmul.f32 %v2804_v14, %v2800_v21 }
0x401c   :  { %v6912_v11 = vadd.f32 %v2806_v44, %v2722_v51  ;;  %v3322_v17 = vrot.slane %v2806_v44, 2 }
0x401e   :  { %v3329_v50 = vsel %vm3295_vm5, %v3328_v56, %v3322_v17 }
0x401f   :  { %5124 = vmatmul.mubr.msk.f32.vlgmr.msra.gmra.mrb[68].mxu1 %vm52_vm0, %v3329_v50 }
0x4020   :  { %5138 = vmatpush3.msk.msra.mxu1 %vm3291_vm3, %v3509_v10  ;;  %5139 = vmatprep.mubr.msk.f32.mxu1 %vm3512_vm6, %v6918_v30 }
0x4021   :  { %5306 = vmatprep.subr.bf16.mxu1 %v5790_v45 }
0x4023   :  { %5140 = vmatmul.mubr.msk.f32.vlgmr.msra.gmra.mrb[70].mxu1 %vm3512_vm6, %v6928_v8 }
0x4024   :  { %5146 = vmatprep.mubr.msk.f32.mxu1 %vm5786_vm1, %v5784_v7 }
0x40f2   :  { %v5125_v60 = vpop.f32.mrb[68].mxu1 }
0x40f3   :  { %v3410_v54 = vpop.f32.mrb[69].mxu1  ;;  %v3416_v26 = vadd.f32 %v5125_v60, %v6878_v5 }
0x40f4   :  { %v3411_v43 = vadd.f32 %v3410_v54, %v6878_v5 }
0x40f6   :  { %v5141_v35 = vpop.f32.mrb[70].mxu1 }
0x40f7   :  { %v3598_v63 = vmul.f32 %v5141_v35, %v3416_v26  ;;  %v3588_v13 = vpop.f32.mrb[71].mxu1 }
0x40f8   :  { %v3597_v49 = vmul.f32 %v3588_v13, %v3411_v43 }
0x40f9   :  { %v3602_v57 = vsel %vm52_vm0, %v3598_v63, 0.0 }
0x40fa   :  { %3603 = vadd.xlane.f32.xlu0 %v3602_v57  ;;  %v3599_v48 = vsel %vm52_vm0, %v3597_v49, 0.0 }
0x40fb   :  { %3600 = vadd.xlane.f32.xlu1 %v3599_v48 }
0x4187   :  { %v3604_v29 = vpop.xlane.xlu0 %3603 }
0x4188   :  { %v3606_v52 = vmul.f32 %v3604_v29, %v6928_v8  ;;  %v3601_v36 = vpop.xlane.xlu1 %3600 }
0x4189   :  { %v3605_v40 = vmul.f32 %v3601_v36, %v6918_v30 }
0x418a   :  { %v3612_v39 = vadd.f32 %v6941_v37, %v3606_v52 }
0x418b   :  { %v3611_v4 = vadd.f32 %v6943_v31, %v3605_v40 }
0x418c   :  { %v3614_v58 = vsel %vm3512_vm6, %v3612_v39, -inf }
0x418d   :  { %v3613_v19 = vsel %vm3512_vm6, %v3611_v4, -inf }
0x418e   :  { %v3615_v10 = vmax.f32 %v3613_v19, %v3614_v58  ;;  %v6968_v58 = vld [vmem:[%s7219_s2 + $0x5e] sm:$0x3]  ;;  %v3262_v19 = vrot.slane %v6804_v34, 2 }
0x4190   :  { %v3616_v53 = vrot.slane %v3615_v10, 4 }
0x4192   :  { %v3617_v55 = vmax.f32 %v3615_v10, %v3616_v53 }
0x4194   :  { %v3618_v2 = vrot.slane %v3617_v55, 2 }
0x4196   :  { %v3619_v61 = vmax.f32 %v3617_v55, %v3618_v2 }
0x4198   :  { %v3620_v38 = vrot.slane %v3619_v61, 1 }
0x419a   :  { %v3621_v21 = vmax.f32 %v3619_v61, %v3620_v38 }
0x419c   :  { %v3623_v6 = vmul.f32 %v3621_v21, %v6928_v8  ;;  %v3622_v14 = vmul.f32 %v3621_v21, %v6918_v30 }
0x419e   :  { %v3627_v47 = vsel %vm3512_vm6, %v3623_v6, 0.0  ;;  %v3624_v51 = vsel %vm3512_vm6, %v3622_v14, 0.0 }
0x419f   :  { %3628 = vadd.xlane.f32.xlu1 %v3627_v47  ;;  %3625 = vadd.xlane.f32.xlu0 %v3624_v51 }
0x41b0   :  { %5398 = vrot.lane.b32.xlu1 %v6701_v24, %s5787_s3 }
0x41b4   :  { %5403 = vrot.lane.b32.xlu1 %v6790_v59, %s5787_s3 }
0x41b8   :  { %5408 = vrot.lane.b32.xlu1 %v6701_v24, %s5788_s16 }
0x41bc   :  { %5413 = vrot.lane.b32.xlu1 %v6790_v59, %s5788_s16 }
0x41c0   :  { %3898 = vrot.lane.b32.xlu1 %v6878_v5, %s5788_s16 }
0x422c   :  { %v3629_v44 = vpop.xlane.xlu1 %3628  ;;  %v3626_v1 = vpop.xlane.xlu0 %3625 }
0x422d   :  { %v3631_v17 = vsub.f32 %v3604_v29, %v3629_v44  ;;  %v3630_v56 = vsub.f32 %v3601_v36, %v3626_v1  ;;  %v6996_v44 = vld [vmem:[%s7222_s5 + $0x8] sm:$0xff] }
0x422f   :  { %v3634_v50 = vmul.f32 1.442695, %v3631_v17  ;;  %v3632_v60 = vmul.f32 1.442695, %v3630_v56 }
0x4230   :  { %v5399_v54 = vpop.permute.xlu1 %5398 }
0x4231   :  { %5711 = vpow2.f32 %v3634_v50  ;;  %v5401_v48 = vunpack.i.h.bf16 %v5399_v54  ;;  %v5400_v59 = vunpack.i.l.bf16 %v5399_v54  ;;  %v7008_v50 = vld [vmem:[%s7222_s5 + $0x28] sm:$0xff] }
0x4232   :  { %5713 = vpow2.f32 %v3632_v60  ;;  %v7013_v60 = vld [vmem:[%s7222_s5 + $0x38] sm:$0xff] }
0x4233   :  { %v5313_v53 = vpack.c.bf16 %v5401_v48, %v5400_v59  ;;  %v5330_v54 = vpack.c.bf16 %v7013_v60, %v7008_v50 }
0x4234   :  { %v5404_v35 = vpop.permute.xlu1 %5403 }
0x4235   :  { %v5406_v55 = vunpack.i.h.bf16 %v5404_v35  ;;  %v5405_v2 = vunpack.i.l.bf16 %v5404_v35  ;;  %v3251_v35 = vld [vmem:[%s7219_s2 + $0x3a] sm:$0x3] }
0x4237   :  { %v5316_v34 = vpack.c.bf16 %v5406_v55, %v5405_v2 }
0x4238   :  { %v5409_v63 = vpop.permute.xlu1 %5408 }
0x4239   :  { %v5411_v13 = vunpack.i.h.bf16 %v5409_v63  ;;  %v5410_v49 = vunpack.i.l.bf16 %v5409_v63  ;;  %v3252_v63 = vmul.f32 %v3251_v35, %v6912_v11  ;;  %v7041_v11 = vld [vmem:[%s7219_s2 + $0x4e] sm:$0xff] }
0x423b   :  { %v5712_v24 = vpop.eup %5711  ;;  %v5318_v46 = vpack.c.bf16 %v5411_v13, %v5410_v49 }
0x423c   :  { %v5714_v57 = vpop.eup %5713  ;;  %v5414_v33 = vpop.permute.xlu1 %5413  ;;  %v3637_v52 = vmul.f32 %v5712_v24, %v3416_v26  ;;  %v3296_v26 = vsel %vm3295_vm5, %v6742_v20, %v3262_v19  ;;  %v3280_v20 = vrot.slane %v6824_v0, 2 }
0x423d   :  { %v5310_v40 = vpack.c.bf16 %v5712_v24, %v5714_v57  ;;  %v5416_v39 = vunpack.i.h.bf16 %v5414_v33  ;;  %v5415_v29 = vunpack.i.l.bf16 %v5414_v33  ;;  %v3636_v36 = vmul.f32 %v5714_v57, %v3411_v43  ;;  %v7034_v24 = vld [vmem:[%s7222_s5 + $0x108] ss:$0 sm:$0xff] }
0x423e   :  { %v3271_v43 = vrot.slane %v6810_v32, 2  ;;  %v3302_v38 = vsel %vm3295_vm5, %v6793_v27, %v3280_v20 }
0x423f   :  { %5311 = vmatpush3.bf16.msra.mxu0 %v5310_v40  ;;  %v5307_v4 = vpack.c.bf16 %v3637_v52, %v3636_v36  ;;  %v5322_v10 = vpack.c.bf16 %v5416_v39, %v5415_v29 }
0x4240   :  { %5319 = vmatprep.subr.bf16.mxu0 %v5318_v46  ;;  %v3299_v61 = vsel %vm3295_vm5, %v6762_v16, %v3271_v43  ;;  %v3899_v33 = vpop.permute.xlu1 %3898 }
0x4241   :  { %5308 = vmatpush3.bf16.msra.mxu1 %v5307_v4 }
0x4242   :  { %5154 = vmatmul.mubr.msk.f32.vlgmr.msra.gmra.mrb[62].mxu0 %vm3638_vm7, %v6968_v58  ;;  %5312 = vmatprep.subr.bf16.mxu1 %v5790_v45 }
0x4243   :  { %5321 = vmatpush3.bf16.msra.mxu0 %v5318_v46  ;;  %5175 = vmatprep.mubr.msk.f32.mxu0 %vm52_vm0, %v3296_v26  ;;  %v3885_v46 = vld [vmem:[%s7219_s2 + $0x56] sm:$0xff] }
0x4244   :  { %5323 = vmatprep.subr.bf16.mxu0 %v5322_v10  ;;  %5147 = vmatmul.mubr.msk.f32.vlgmr.msra.gmra.mrb[72].mxu1 %vm3638_vm7, %v6968_v58 }
0x4245   :  { %5314 = vmatpush3.bf16.msra.mxu1 %v5313_v53  ;;  %5164 = vmatprep.mubr.msk.f32.mxu1 %vm5786_vm1, %v5784_v7 }
0x4246   :  { %5315 = vmatprep.subr.bf16.mxu1 %v5790_v45 }
0x4247   :  { %5325 = vmatpush3.bf16.msra.mxu0 %v5322_v10 }
0x4249   :  { %5317 = vmatpush3.bf16.msra.mxu1 %v5316_v34 }
0x424a   :  { %5176 = vmatmul.mubr.msk.f32.vlgmr.msra.gmra.mrb[64].mxu0 %vm52_vm0, %v3299_v61  ;;  %5326 = vmatprep.subr.bf16.mxu1 %v5790_v45 }
0x424b   :  { %5178 = vmatprep.mubr.msk.f32.mxu0 %vm52_vm0, %v3302_v38 }
0x424e   :  { %5179 = vmatmul.mubr.msk.f32.gmra.mrb[66].mxu0 %vm52_vm0, %v6848_v62  ;;  %v7001_v62 = vld [vmem:[%s7222_s5 + $0x18] sm:$0xff] }
0x424f   :  { %5194 = vmatprep.mubr.msk.f32.mxu0 %vm3512_vm6, %v6918_v30  ;;  %v5327_v17 = vpack.c.bf16 %v7001_v62, %v6996_v44 }
0x4315   :  { %v3778_v32 = vpop.f32.mrb[62].mxu0 }
0x4316   :  { %3784 = vperm.xlu0 %5396, %v3778_v32   ;;  %v5155_v0 = vpop.f32.mrb[63].mxu0 }
0x4317   :  { %v3708_v16 = vpop.f32.mrb[72].mxu1  ;;  %v4771_v0 = vadd.f32 -1.0, %v7041_v11 }
0x4318   :  { %v5148_v21 = vpop.f32.mrb[73].mxu1 }
0x431d   :  { %v5177_v6 = vpop.f32.mrb[64].mxu0 }
0x431e   :  { %v3979_v14 = vpop.f32.mrb[65].mxu0  ;;  %v7055_v52 = vadd.f32 %v5177_v6, %v3899_v33  ;;  %v4772_v6 = vadd.f32 -1.0, %v3885_v46 }
0x431f   :  { %v7057_v40 = vadd.f32 %v3979_v14, %v3899_v33 }
0x4321   :  { %v5180_v47 = vpop.f32.mrb[66].mxu0 }
0x4322   :  { %v3989_v51 = vpop.f32.mrb[67].mxu0  ;;  %v7065_v26 = vadd.f32 %v5180_v47, %v3899_v33  ;;  %v4197_v47 = vmul.f32 1e+30, %v4771_v0 }
0x4323   :  { %v7062_v10 = vadd.f32 %v3989_v51, %v3899_v33 }
0x4395   :  { %v3785_v27 = vpop.permute.xlu0 %3784 }
0x4396   :  { %5715 = vrcp.f32 %v3785_v27 }
0x43a0   :  { %v5716_v1 = vpop.eup %5715 }
0x43a1   :  { %v3788_v56 = vmul.f32 %v5716_v1, %v3708_v16 }
0x43a3   :  { %5165 = vmatmul.mubr.msk.f32.vlgmr.msra.gmra.mrb[74].mxu1 %vm52_vm0, %v3788_v56 }
0x43a4   :  { %5328 = vmatpush3.bf16.msra.mxu1 %v5327_v17  ;;  %5189 = vmatprep.mubr.msk.f32.mxu1 %vm5786_vm1, %v5784_v7  ;;  %v4198_v17 = vmul.f32 1e+30, %v4772_v6 }
0x43a5   :  { %5329 = vmatprep.subr.bf16.mxu1 %v5790_v45 }
0x43a8   :  { %5331 = vmatpush3.bf16.msra.mxu1 %v5330_v54 }
0x43a9   :  { %5332 = vmatprep.subr.bf16.mxu1 %v5790_v45 }
0x43ab   :  { %5190 = vmatmul.mubr.msk.f32.vlgmr.msra.gmra.mrb[76].mxu1 %vm52_vm0, %v3252_v63 }
0x43ac   :  { %5208 = vmatprep.mubr.msk.f32.mxu1 %vm5786_vm1, %v5784_v7 }
0x4476   :  { %v7029_v13 = vpop.f32.mrb[74].mxu1 }
0x4477   :  { %v5166_v49 = vpop.f32.mrb[75].mxu1 }
0x447e   :  { %v4067_v57 = vpop.f32.mrb[76].mxu1 }
0x447f   :  { %v4068_v48 = vadd.f32 %v4067_v57, %v7034_v24  ;;  %v5191_v59 = vpop.f32.mrb[77].mxu1 }
0x4481   :  { %5192 = vmatprep.subr.msk.mxu0 %vm3291_vm3, %v4068_v48 }
0x4482   :  { %5193 = vmatpush3.msk.msra.mxu0 %vm3291_vm3, %v4068_v48 }
0x4483   :  { %5195 = vmatmul.mubr.msk.f32.vlgmr.msra.gmra.mrb[68].mxu0 %vm3512_vm6, %v6928_v8  ;;  %5338 = vmatprep.subr.bf16.mxu0 %v5790_v45 }
0x4484   :  { %5197 = vmatprep.mubr.msk.f32.mxu0 %vm3512_vm6, %v7041_v11 }
0x4487   :  { %5198 = vmatmul.mubr.msk.f32.gmra.mrb[70].mxu0 %vm3512_vm6, %v3885_v46 }
0x4488   :  { %5219 = vmatprep.mubr.msk.f32.mxu0 %vm5786_vm1, %v5784_v7 }
0x4556   :  { %v5196_v39 = vpop.f32.mrb[68].mxu0 }
0x4557   :  { %v4172_v29 = vmul.f32 %v5196_v39, %v7055_v52  ;;  %v4152_v36 = vpop.f32.mrb[69].mxu0 }
0x4558   :  { %v4171_v4 = vmul.f32 %v4152_v36, %v7057_v40 }
0x4559   :  { %v4178_v19 = vsel %vm52_vm0, %v4172_v29, 0.0 }
0x455a   :  { %4179 = vadd.xlane.f32.xlu0 %v4178_v19  ;;  %v5199_v53 = vpop.f32.mrb[70].mxu0  ;;  %v4175_v55 = vsel %vm52_vm0, %v4171_v4, 0.0 }
0x455b   :  { %v4162_v2 = vpop.f32.mrb[71].mxu0  ;;  %4176 = vadd.xlane.f32.xlu1 %v4175_v55  ;;  %v4174_v43 = vmul.f32 %v5199_v53, %v7065_v26 }
0x455c   :  { %v4173_v34 = vmul.f32 %v4162_v2, %v7062_v10 }
0x455d   :  { %v4184_v61 = vsel %vm52_vm0, %v4174_v43, 0.0 }
0x455e   :  { %v4181_v20 = vsel %vm52_vm0, %v4173_v34, 0.0 }
0x455f   :  { %4182 = vadd.xlane.f32.xlu1 %v4181_v20 }
0x4563   :  { %4185 = vadd.xlane.f32.xlu1 %v4184_v61 }
0x45e7   :  { %v4180_v38 = vpop.xlane.xlu0 %4179 }
0x45e8   :  { %v4177_v32 = vpop.xlane.xlu1 %4176  ;;  %v4188_v16 = vmul.f32 %v4180_v38, %v6928_v8 }
0x45e9   :  { %v4187_v21 = vmul.f32 %v4177_v32, %v6918_v30 }
0x45ea   :  { %v4200_v27 = vadd.f32 %v4188_v16, %v6941_v37 }
0x45eb   :  { %v4199_v1 = vadd.f32 %v4187_v21, %v6943_v31 }
0x45ec   :  { %v4183_v14 = vpop.xlane.xlu1 %4182  ;;  %v4204_v63 = vsel %vm3512_vm6, %v4200_v27, -inf }
0x45ed   :  { %v4189_v51 = vmul.f32 %v4183_v14, %v7041_v11  ;;  %v4203_v49 = vsel %vm3512_vm6, %v4199_v1, -inf }
0x45ee   :  { %v4207_v33 = vmax.f32 %v4203_v49, %v4204_v63 }
0x45ef   :  { %v4201_v54 = vadd.f32 %v4197_v47, %v4189_v51 }
0x45f0   :  { %v4186_v56 = vpop.xlane.xlu1 %4185 }
0x45f1   :  { %v4190_v35 = vmul.f32 %v4186_v56, %v3885_v46  ;;  %v4205_v48 = vsel %vm3512_vm6, %v4201_v54, -inf }
0x45f3   :  { %v4202_v57 = vadd.f32 %v4198_v17, %v4190_v35 }
0x45f5   :  { %v4206_v59 = vsel %vm3512_vm6, %v4202_v57, -inf }
0x45f6   :  { %v4208_v39 = vmax.f32 %v4205_v48, %v4206_v59 }
0x45f8   :  { %v4209_v29 = vmax.f32 %v4207_v33, %v4208_v39 }
0x45fa   :  { %v4210_v36 = vrot.slane %v4209_v29, 4 }
0x45fc   :  { %v4211_v37 = vmax.f32 %v4209_v29, %v4210_v36 }
0x45fe   :  { %v4212_v4 = vrot.slane %v4211_v37, 2 }
0x4600   :  { %v4213_v31 = vmax.f32 %v4211_v37, %v4212_v4 }
0x4602   :  { %v4214_v19 = vrot.slane %v4213_v31, 1 }
0x4604   :  { %v4215_v53 = vmax.f32 %v4213_v31, %v4214_v19 }
0x4606   :  { %v4217_v55 = vmul.f32 %v4215_v53, %v6928_v8  ;;  %v4216_v2 = vmul.f32 %v4215_v53, %v6918_v30  ;;  %v4219_v20 = vmul.f32 %v4215_v53, %v3885_v46  ;;  %v4218_v61 = vmul.f32 %v4215_v53, %v7041_v11 }
0x4608   :  { %v4223_v34 = vsel %vm3512_vm6, %v4217_v55, 0.0  ;;  %v4220_v43 = vsel %vm3512_vm6, %v4216_v2, 0.0  ;;  %v4229_v0 = vsel %vm3512_vm6, %v4219_v20, 0.0  ;;  %v4226_v16 = vsel %vm3512_vm6, %v4218_v61, 0.0 }
0x4609   :  { %4224 = vadd.xlane.f32.xlu1 %v4223_v34  ;;  %4221 = vadd.xlane.f32.xlu0 %v4220_v43 }
0x460d   :  { %4230 = vadd.xlane.f32.xlu1 %v4229_v0  ;;  %4227 = vadd.xlane.f32.xlu0 %v4226_v16 }
0x4696   :  { %v4225_v21 = vpop.xlane.xlu1 %4224  ;;  %v4222_v6 = vpop.xlane.xlu0 %4221 }
0x4697   :  { %v4233_v8 = vsub.f32 %v4180_v38, %v4225_v21  ;;  %v4232_v47 = vsub.f32 %v4177_v32, %v4222_v6 }
0x4699   :  { %v4238_v30 = vmul.f32 1.442695, %v4233_v8  ;;  %v4236_v51 = vmul.f32 1.442695, %v4232_v47  ;;  %v3046_v8 = vrot.slane %v6644_v18, 2  ;;  %v4496_v47 = vld [vmem:[%s7222_s5 + $0x68] sm:$0xff] }
0x469a   :  { %v4231_v27 = vpop.xlane.xlu1 %4230  ;;  %v4228_v1 = vpop.xlane.xlu0 %4227  ;;  %v4501_v18 = vld [vmem:[%s7222_s5 + $0xb8] sm:$0xff] }
0x469b   :  { %5717 = vpow2.f32 %v4238_v30  ;;  %v4235_v46 = vsub.f32 %v4186_v56, %v4231_v27  ;;  %v4234_v17 = vsub.f32 %v4183_v14, %v4228_v1  ;;  %v4497_v30 = vld [vmem:[%s7222_s5 + $0x78] sm:$0xff]  ;;  %v4504_v1 = vld [vmem:[%s7222_s5 + $0xe8] sm:$0xff] }
0x469c   :  { %5719 = vpow2.f32 %v4236_v51  ;;  %v5442_v51 = vpack.i.bf16 %v4497_v30, %v4496_v47 }
0x469d   :  { %v4242_v11 = vmul.f32 1.442695, %v4235_v46  ;;  %v4240_v54 = vmul.f32 1.442695, %v4234_v17  ;;  %v4505_v46 = vld [vmem:[%s7222_s5 + $0xf8] sm:$0xff] }
0x469e   :  { %v5462_v17 = vpack.i.bf16 %v4505_v46, %v4504_v1 }
0x469f   :  { %5721 = vpow2.f32 %v4242_v11 }
0x46a0   :  { %5723 = vpow2.f32 %v4240_v54 }
0x46a5   :  { %v5718_v35 = vpop.eup %5717 }
0x46a6   :  { %v5720_v63 = vpop.eup %5719  ;;  %v4245_v49 = vmul.f32 %v5718_v35, %v7055_v52  ;;  %v7106_v52 = vpack.i.bf16 %v7001_v62, %v6996_v44  ;;  %v3133_v62 = vsub.f32 %v6722_v12, %v6717_v41  ;;  %v3155_v12 = vrot.slane %v6747_v3, 4 }
0x46a7   :  { %v5339_v57 = vpack.c.bf16 %v5718_v35, %v5720_v63  ;;  %v4244_v38 = vmul.f32 %v5720_v63, %v7057_v40  ;;  %v5422_v40 = vpack.i.bf16 %v7013_v60, %v7008_v50 }
0x46a8   :  { %5418 = vrot.lane.b32.xlu1 %v7106_v52, %s5789_s17 }
0x46a9   :  { %v5722_v32 = vpop.eup %5721  ;;  %5340 = vmatpush3.bf16.msra.mxu0 %v5339_v57  ;;  %v5333_v48 = vpack.c.bf16 %v4245_v49, %v4244_v38 }
0x46aa   :  { %v5724_v59 = vpop.eup %5723  ;;  %5341 = vmatprep.subr.bf16.mxu0 %v5790_v45  ;;  %v4247_v14 = vmul.f32 %v5722_v32, %v7065_v26 }
0x46ab   :  { %5334 = vmatpush3.bf16.msra.mxu1 %v5333_v48  ;;  %v5342_v56 = vpack.c.bf16 %v5722_v32, %v5724_v59  ;;  %v4246_v33 = vmul.f32 %v5724_v59, %v7062_v10  ;;  %v3208_v10 = vrot.slane %v6882_v42, 2 }
0x46ac   :  { %5335 = vmatprep.subr.bf16.mxu1 %v5790_v45  ;;  %5423 = vrot.lane.b32.xlu1 %v5422_v40, %s5789_s17 }
0x46ad   :  { %5343 = vmatpush3.bf16.msra.mxu0 %v5342_v56  ;;  %v5336_v39 = vpack.c.bf16 %v4247_v14, %v4246_v33  ;;  %v3212_v26 = vadd.f32 %v3208_v10, %v5986_v23  ;;  %v3135_v23 = vrot.slane %v3133_v62, 4  ;;  %v4494_v56 = vld [vmem:[%s7222_s5 + $0x48] sm:$0xff]  ;;  %v4495_v33 = vld [vmem:[%s7222_s5 + $0x58] sm:$0xff] }
0x46ae   :  { %5350 = vmatprep.subr.bf16.mxu0 %v5790_v45  ;;  %v4499_v10 = vld [vmem:[%s7222_s5 + $0x98] sm:$0xff] }
0x46af   :  { %5337 = vmatpush3.bf16.msra.mxu1 %v5336_v39  ;;  %v5437_v39 = vpack.i.bf16 %v4495_v33, %v4494_v56 }
0x46b0   :  { %5220 = vmatmul.mubr.msk.f32.vlgmr.msra.gmra.mrb[72].mxu0 %vm52_vm0, %v6968_v58  ;;  %5344 = vmatprep.subr.bf16.mxu1 %v5790_v45 }
0x46b1   :  { %5265 = vmatprep.mubr.msk.f32.mxu0 %vm5786_vm1, %v5784_v7 }
0x46b2   :  { %5209 = vmatmul.mubr.msk.f32.vlgmr.msra.gmra.mrb[78].mxu1 %vm52_vm0, %v6968_v58  ;;  %v4746_v58 = vmul.f32 -1.442695, %v3212_v26 }
0x46b3   :  { %5230 = vmatprep.mubr.msk.f32.mxu1 %vm5786_vm1, %v5784_v7  ;;  %v3209_v7 = vrot.slane %v6884_v22, 2 }
0x46b4   :  { %5725 = vpow2.f32 %v4746_v58  ;;  %v4502_v58 = vld [vmem:[%s7222_s5 + $0xc8] sm:$0xff] }
0x46b5   :  { %v3213_v44 = vadd.f32 %v3209_v7, %v5990_v25 }
0x46b7   :  { %v4747_v11 = vmul.f32 -1.442695, %v3213_v44 }
0x46be   :  { %v5726_v29 = vpop.eup %5725 }
0x46bf   :  { %v3217_v36 = vadd.f32 1.0, %v5726_v29 }
0x46c1   :  { %5727 = vrcp.f32 %v3217_v36 }
0x46c2   :  { %5729 = vtanh.f32 %v3213_v44 }
0x46cb   :  { %v5728_v31 = vpop.eup %5727 }
0x46cc   :  { %v5730_v22 = vpop.eup %5729 }
0x46cd   :  { %v3233_v25 = vmul.f32 %v5730_v22, %v5728_v31 }
0x471a   :  { %v5419_v37 = vpop.permute.xlu1 %5418 }
0x471b   :  { %v5421_v42 = vunpack.i.h.bf16 %v5419_v37  ;;  %v5420_v4 = vunpack.i.l.bf16 %v5419_v37  ;;  %v5759_v37 = vld [vmem:[%s7219_s2 + $0x32] sm:$0x3] }
0x471d   :  { %v5345_v19 = vpack.c.bf16 %v5421_v42, %v5420_v4 }
0x471e   :  { %v5424_v53 = vpop.permute.xlu1 %5423 }
0x471f   :  { %5346 = vmatpush3.bf16.msra.mxu1 %v5345_v19  ;;  %v5426_v55 = vunpack.i.h.bf16 %v5424_v53  ;;  %v5425_v2 = vunpack.i.l.bf16 %v5424_v53 }
0x4720   :  { %5347 = vmatprep.subr.bf16.mxu1 %v5790_v45 }
0x4721   :  { %v5348_v41 = vpack.c.bf16 %v5426_v55, %v5425_v2 }
0x4723   :  { %5349 = vmatpush3.bf16.msra.mxu1 %v5348_v41 }
0x4783   :  { %v4386_v50 = vpop.f32.mrb[72].mxu0 }
0x4784   :  { %4392 = vperm.xlu0 %5396, %v4386_v50   ;;  %v5221_v60 = vpop.f32.mrb[73].mxu0 }
0x4785   :  { %v4316_v34 = vpop.f32.mrb[78].mxu1 }
0x4786   :  { %v5210_v43 = vpop.f32.mrb[79].mxu1 }
0x4788   :  { %3136 = vrot.lane.b32.xlu0 %v3135_v23, %s5787_s3 }
0x478c   :  { %3235 = vrot.lane.b32.xlu0 %v3233_v25, %s5787_s3 }
0x4790   :  { %3156 = vrot.lane.b32.xlu0 %v3155_v12, %s5787_s3 }
0x4794   :  { %4414 = vrot.lane.b32.xlu0 %v7034_v24, %s5789_s17 }
0x4798   :  { %5433 = vrot.lane.b32.xlu0 %v5422_v40, %s5787_s3  ;;  %v4498_v40 = vld [vmem:[%s7222_s5 + $0x88] sm:$0xff] }
0x4799   :  { %v5447_v26 = vpack.i.bf16 %v4499_v10, %v4498_v40 }
0x479c   :  { %5443 = vrot.lane.b32.xlu0 %v5442_v51, %s5787_s3 }
0x4803   :  { %v4393_v20 = vpop.permute.xlu0 %4392 }
0x4804   :  { %5731 = vrcp.f32 %v4393_v20 }
0x4805   :  { %5733 = vpow2.f32 %v4747_v11 }
0x4807   :  { %v3137_v61 = vpop.permute.xlu0 %3136 }
0x4808   :  { %v3139_v0 = vmul.f32 %v3137_v61, %v6818_v15 }
0x480a   :  { %v3140_v16 = vadd.f32 %v3139_v0, %v6656_v28  ;;  %v4500_v28 = vld [vmem:[%s7222_s5 + $0xa8] sm:$0xff] }
0x480b   :  { %v5452_v27 = vpack.i.bf16 %v4501_v18, %v4500_v28  ;;  %v3236_v57 = vpop.permute.xlu0 %3235 }
0x480c   :  { %v3228_v21 = vrot.slane %v3140_v16, 2 }
0x480d   :  { %5453 = vrot.lane.b32.xlu0 %v5452_v27, %s5787_s3 }
0x480e   :  { %v5732_v6 = vpop.eup %5731  ;;  %3229 = vrot.lane.b32.xlu1 %v3228_v21, %s5787_s3 }
0x480f   :  { %v4396_v3 = vmul.f32 %v5732_v6, %v4316_v34  ;;  %v5734_v54 = vpop.eup %5733  ;;  %v3157_v7 = vpop.permute.xlu0 %3156 }
0x4810   :  { %v3224_v35 = vadd.f32 1.0, %v5734_v54  ;;  %v3159_v23 = vmul.f32 %v3157_v7, %v6818_v15 }
0x4811   :  { %5231 = vmatmul.mubr.msk.f32.vlgmr.msra.gmra.mrb[80].mxu1 %vm52_vm0, %v4396_v3  ;;  %5463 = vrot.lane.b32.xlu0 %v5462_v17, %s5787_s3 }
0x4812   :  { %3047 = vrot.lane.b32.xlu1 %v3046_v8, %s5787_s3  ;;  %5735 = vrcp.f32 %v3224_v35 }
0x4813   :  { %v4415_v36 = vpop.permute.xlu0 %4414 }
0x4817   :  { %v5434_v25 = vpop.permute.xlu0 %5433 }
0x4818   :  { %v5436_v2 = vunpack.i.h.bf16 %v5434_v25  ;;  %v5435_v34 = vunpack.i.l.bf16 %v5434_v25 }
0x481a   :  { %v5354_v0 = vpack.c.bf16 %v5436_v2, %v5435_v34 }
0x481b   :  { %v5444_v16 = vpop.permute.xlu0 %5443 }
0x481c   :  { %v5736_v32 = vpop.eup %5735  ;;  %v5446_v6 = vunpack.i.h.bf16 %v5444_v16  ;;  %v5445_v3 = vunpack.i.l.bf16 %v5444_v16 }
0x481e   :  { %v5360_v28 = vpack.c.bf16 %v5446_v6, %v5445_v3 }
0x487f   :  { %v5454_v51 = vpop.permute.xlu0 %5453 }
0x4880   :  { %v3230_v63 = vpop.permute.xlu1 %3229  ;;  %v5456_v27 = vunpack.i.h.bf16 %v5454_v51  ;;  %v5455_v1 = vunpack.i.l.bf16 %v5454_v51 }
0x4881   :  { %v3232_v49 = vmul.f32 %v5728_v31, %v3230_v63 }
0x4882   :  { %v5366_v54 = vpack.c.bf16 %v5456_v27, %v5455_v1 }
0x4883   :  { %v3238_v38 = vadd.f32 %v3236_v57, %v3232_v49  ;;  %v5464_v35 = vpop.permute.xlu0 %5463 }
0x4884   :  { %v3048_v60 = vpop.permute.xlu1 %3047  ;;  %v5466_v49 = vunpack.i.h.bf16 %v5464_v35  ;;  %v5465_v57 = vunpack.i.l.bf16 %v5464_v35 }
0x4885   :  { %5737 = vtanh.f32 %v3238_v38  ;;  %v3050_v42 = vmul.f32 %v5759_v37, %v3048_v60 }
0x4886   :  { %v5372_v38 = vpack.c.bf16 %v5466_v49, %v5465_v57 }
0x4887   :  { %v3051_v4 = vadd.f32 %v3050_v42, %v6614_v9 }
0x4889   :  { %v3160_v19 = vadd.f32 %v3159_v23, %v3051_v4 }
0x488f   :  { %v5738_v48 = vpop.eup %5737 }
0x4890   :  { %v3240_v59 = vmul.f32 %v5738_v48, %v5736_v32 }
0x4892   :  { %v3243_v14 = vrot.slane %v3240_v59, 6 }
0x4894   :  { %3244 = vrot.lane.b32.xlu1 %v3243_v14, %s5787_s3 }
0x4898   :  { %5428 = vrot.lane.b32.xlu1 %v7106_v52, %s5787_s3  ;;  %v4503_v52 = vld [vmem:[%s7222_s5 + $0xd8] sm:$0xff] }
0x4899   :  { %v5457_v29 = vpack.i.bf16 %v4503_v52, %v4502_v58 }
0x489c   :  { %5438 = vrot.lane.b32.xlu1 %v5437_v39, %s5787_s3 }
0x48a0   :  { %5448 = vrot.lane.b32.xlu1 %v5447_v26, %s5787_s3 }
0x48a4   :  { %5458 = vrot.lane.b32.xlu1 %v5457_v29, %s5787_s3 }
0x48a8   :  { %3801 = vrot.lane.b32.xlu1 %v6878_v5, %s5787_s3  ;;  %v3241_v5 = vld [vmem:[%s7219_s2 + $0x36] sm:$0x3] }
0x48e4   :  { %v4486_v44 = vpop.f32.mrb[80].mxu1 }
0x48e5   :  { %v4487_v62 = vadd.f32 %v4486_v44, %v4415_v36  ;;  %v5232_v50 = vpop.f32.mrb[81].mxu1 }
0x48e7   :  { %4507 = vrot.lane.b32.xlu0 %v4487_v62, %s5788_s16 }
0x48eb   :  { %4580 = vrot.lane.b32.xlu0 %v7034_v24, %s5787_s3  ;;  %v3253_v24 = vld [vmem:[%s7219_s2 + $0x3c] sm:$0x3]  ;;  %s5791_s2 = smov [#allocation2]  }
0x4906   :  { %v3245_v31 = vpop.permute.xlu1 %3244 }
0x4907   :  { %v3247_v22 = vmul.f32 %v3245_v31, %v3241_v5 }
0x4909   :  { %v3248_v53 = vadd.f32 %v3247_v22, %v3160_v19 }
0x490a   :  { %v5429_v55 = vpop.permute.xlu1 %5428 }
0x490b   :  { %v3254_v41 = vmul.f32 %v3253_v24, %v3248_v53  ;;  %v5431_v12 = vunpack.i.h.bf16 %v5429_v55  ;;  %v5430_v9 = vunpack.i.l.bf16 %v5429_v55 }
0x490d   :  { %v5351_v43 = vpack.c.bf16 %v5431_v12, %v5430_v9  ;;  %4511 = vrot.lane.b32.xlu1 %v3254_v41, %s5787_s3  ;;  %s4661_s3 = sshll.u32 %s5791_s2, 4  ;;  %s4662_s3 = int_to_ptr.vmem [resolvable:$true] %s4661_s3 }
0x490e   :  { %v5439_v20 = vpop.permute.xlu1 %5438  ;;  %s5760_s21 = scalar_lea.vmem %s4662_s3, 32  ;;  %p5765_p1 = scmp.lt.s32.totalorder %s4662_s3, %s4662_s3 }
0x490f   :  { %v5441_v15 = vunpack.i.h.bf16 %v5439_v20  ;;  %v5440_v61 = vunpack.i.l.bf16 %v5439_v20  ;;  %5352 = vmatpush3.bf16.msra.mxu0 %v5351_v43  ;;  %p5761_p0 = scmp.ne.s32.totalorder %s4662_s3, %s5760_s21  ;;  %p5766_p2 = scmp.lt.s32.totalorder %s5760_s21, %s5760_s21 }
0x4910   :  { %5353 = vmatprep.subr.bf16.mxu0 %v5790_v45 }
0x4911   :  { %v5357_v21 = vpack.c.bf16 %v5441_v15, %v5440_v61  ;;  %p5767_p3 = por %p5766_p2, %p5765_p1 }
0x4912   :  { %v5449_v8 = vpop.permute.xlu1 %5448 }
0x4913   :  { %5355 = vmatpush3.bf16.msra.mxu0 %v5354_v0  ;;  %v5451_v47 = vunpack.i.h.bf16 %v5449_v8  ;;  %v5450_v30 = vunpack.i.l.bf16 %v5449_v8  ;;  %p5768_p4 = pnand %p5767_p3, %p5761_p0 }
0x4914   :  { %5356 = vmatprep.subr.bf16.mxu0 %v5790_v45 }
0x4915   :  { %v5363_v18 = vpack.c.bf16 %v5451_v47, %v5450_v30 }
0x4916   :  { %v5459_v46 = vpop.permute.xlu1 %5458 }
0x4917   :  { %5358 = vmatpush3.bf16.msra.mxu0 %v5357_v21  ;;  %v5461_v17 = vunpack.i.h.bf16 %v5459_v46  ;;  %v5460_v11 = vunpack.i.l.bf16 %v5459_v46 }
0x4918   :  { %5359 = vmatprep.subr.bf16.mxu0 %v5790_v45 }
0x4919   :  { %v5369_v63 = vpack.c.bf16 %v5461_v17, %v5460_v11 }
0x491a   :  { %v3802_v32 = vpop.permute.xlu1 %3801 }
0x491b   :  { %5361 = vmatpush3.bf16.msra.mxu0 %v5360_v28  ;;  %v3874_v59 = vadd.f32 %v7029_v13, %v3802_v32 }
0x491c   :  { %5362 = vmatprep.subr.bf16.mxu0 %v5790_v45 }
0x491f   :  { %5364 = vmatpush3.bf16.msra.mxu0 %v5363_v18 }
0x4920   :  { %5365 = vmatprep.subr.bf16.mxu0 %v5790_v45 }
0x4923   :  { %5367 = vmatpush3.bf16.msra.mxu0 %v5366_v54 }
0x4924   :  { %5368 = vmatprep.subr.bf16.mxu0 %v5790_v45 }
0x4927   :  { %5370 = vmatpush3.bf16.msra.mxu0 %v5369_v63 }
0x4928   :  { %5371 = vmatprep.subr.bf16.mxu0 %v5790_v45 }
0x492b   :  { %5373 = vmatpush3.bf16.msra.mxu0 %v5372_v38 }
0x4959   :  { %v4508_v48 = vpop.permute.xlu0 %4507 }
0x495a   :  { %v4514_v14 = vsel %vm52_vm0, %v3874_v59, %v4508_v48 }
0x495d   :  { %v4581_v39 = vpop.permute.xlu0 %4580 }
0x497f   :  { %v4512_v56 = vpop.permute.xlu1 %4511 }
0x4980   :  { %v4515_v33 = vsel %vm2856_vm2, %v4514_v14, %v4512_v56 }
0x4981   :  { %5266 = vmatmul.mubr.f32.vlgmr.msra.gmra.mrb[74].mxu0 %v4515_v33 }
0x4a54   :  { %v4649_v40 = vpop.f32.mrb[74].mxu0 }
0x4a55   :  { %v4650_v10 = vadd.f32 %v4649_v40, %v4581_v39  ;;  %v5267_v26 = vpop.f32.mrb[75].mxu0 }
0x4a57   :  { %4654 = vst.msk [vmem:[#allocation2] sm:$0x3] %vm4653_vm8, %v4650_v10 }
0x4a58   :  { %5771 = shalt.err (!%p5768_p4)
}
0x4a59   :  { %s5772_s23 = scalar_lea.hbm %s7223_s6, 32 }
0x4a5a   :  { %p5773_p5 = scmp.ne.s32.totalorder %s7223_s6, %s5772_s23  ;;  %p5776_p6 = scmp.lt.u32.totalorder %s5772_s23, %s7223_s6 }
0x4a5c   :  { %p5778_p7 = pnand %p5776_p6, %p5773_p5 }
0x4a5e   :  { %5781 = shalt.err (!%p5778_p7)
}
0x4a5f   :  { %4664 = dma.vmem_to_hbm [thread:$0]  %s4662_s3, 32, %s7223_s6, [#allocation3]  }
0x4a60   :  { %5782 = dma.done.wait [#allocation3], 32  }
0x4a61   :  { %5783 = vsyncadd [#allocation3], 4294967264 }
0x4a62   :  { %4668 = vsyncpa [#allocation3], 1 }

</bundles_post_ra>
